<compile_context>
chip_gen: v5e
topology: v5e:2x2
jax: 0.10.0
libtpu: 0.0.40
codegen_flags: <defaults>
</compile_context>

<pallas_src>
import math

import numpy as np
import jax
import jax.numpy as jnp
from jax.experimental import pallas as pl
from jax.experimental.pallas import tpu as pltpu

# ----------------------------- synthetic (small) configuration -----------------------------
IMG_C, IMG_HW, PATCH = 3, 16, 8          # 16x16 image, 8x8 patches -> 4 patches
NP = (IMG_HW // PATCH) ** 2              # number of patches
VIT_LEN = NP + 1                         # +1 CLS token
PATCH_DIM = IMG_C * PATCH * PATCH        # 192
E = 32                                   # ViT hidden size == decoder d_model (forward requires it)
VIT_HEADS = 4
VIT_DH = E // VIT_HEADS
VIT_MLP = 64
VIT_LAYERS = 2
D_MODEL = E
NHEAD = 4
DEC_DH = D_MODEL // NHEAD
FF = 64                                  # decoder dim_feedforward
NUM_DEC_LAYERS = 2
MEM_LEN = 8
FC_OUT = 24                              # stands in for the real out_features=768
OUT_PAD = 128                            # lane-dense output slab width
LANE = 128                               # lane width of the packed parameter slabs
LN_EPS_VIT = 1e-12
LN_EPS_DEC = 1e-5
NEG_INF = -1e30


# --------------------------------- parameter packing ---------------------------------------
class _Packer:
    """Packs all matrices into one (rows, 128) slab and all bias/LN vectors into another.

    Matrix row offsets are padded to multiples of 8 so every in-kernel slice is sublane-aligned.
    Offsets/shapes are static Python metadata closed over by the kernel builder."""

    def __init__(self):
        self._w_blocks, self._w_meta, self._w_rows = [], {}, 0
        self._b_blocks, self._b_meta, self._b_rows = [], {}, 0

    def w(self, name, arr):
        arr = jnp.asarray(arr, jnp.float32)
        r, c = arr.shape
        r8 = -(-r // 8) * 8
        blk = jnp.zeros((r8, LANE), jnp.float32).at[:r, :c].set(arr)
        self._w_blocks.append(blk)
        self._w_meta[name] = (self._w_rows, r, c)
        self._w_rows += r8

    def b(self, name, vec):
        vec = jnp.asarray(vec, jnp.float32).reshape(-1)
        c = vec.shape[0]
        row = jnp.zeros((1, LANE), jnp.float32).at[0, :c].set(vec)
        self._b_blocks.append(row)
        self._b_meta[name] = (self._b_rows, c)
        self._b_rows += 1

    def finalize(self):
        pad = (-self._b_rows) % 8
        b_blocks = self._b_blocks + ([jnp.zeros((pad, LANE), jnp.float32)] if pad else [])
        return (jnp.concatenate(self._w_blocks, axis=0),
                jnp.concatenate(b_blocks, axis=0),
                self._w_meta, self._b_meta)


def _pack_params(params, batch):
    """Flatten the PyTorch-style nested params into two packed slabs.

    Fusions done here (once, in the wrapper): Q/K/V -> one (E,3E); cross K/V -> one (E,2E);
    decoder self-attention (tgt length 1 => softmax == 1) folded to Wv@Wo / bv@Wo+bo;
    CLS + position + conv-bias folded into a per-row `token_add`; block-diagonal same-batch
    masks precomputed; fc padded to 128 lanes."""
    v = params["vit"]
    pk = _Packer()

    pk.w("patch_w", v["patch_w"])

    # Row layout of the ViT token stream: rows 0..B-1 = CLS tokens, row B + b*NP + p = patch p
    # of batch b.  token_add = pos + [cls | conv bias], laid out the same way.
    cls_row = v["pos"][0, 0] + v["cls"][0, 0]                         # (E,)
    patch_rows = v["pos"][0, 1:] + v["patch_b"][None, :]              # (NP, E)
    token_add = jnp.concatenate([jnp.tile(cls_row[None, :], (batch, 1)),
                                 jnp.tile(patch_rows, (batch, 1))], axis=0)
    pk.w("token_add", token_add)                                      # (B*VIT_LEN, E)

    # Block-diagonal (same-batch) additive masks matching that row layout.
    row_batch = np.concatenate([np.arange(batch), np.repeat(np.arange(batch), NP)])
    vit_mask = np.where(row_batch[:, None] == row_batch[None, :], 0.0, NEG_INF)
    pk.w("vit_mask", jnp.asarray(vit_mask, jnp.float32))              # (B*VIT_LEN, B*VIT_LEN)
    mem_batch = np.repeat(np.arange(batch), MEM_LEN)
    cross_mask = np.where(np.arange(batch)[:, None] == mem_batch[None, :], 0.0, NEG_INF)
    pk.w("cross_mask", jnp.asarray(cross_mask, jnp.float32))          # (B, B*MEM_LEN)

    for i, lp in enumerate(v["layers"]):
        a = lp["attn"]
        pk.b(f"v{i}_ln1_g", lp["ln1_g"]); pk.b(f"v{i}_ln1_b", lp["ln1_b"])
        pk.w(f"v{i}_wqkv", jnp.concatenate([a["wq"], a["wk"], a["wv"]], axis=1))
        pk.b(f"v{i}_bqkv", jnp.concatenate([a["bq"], a["bk"], a["bv"]]))
        pk.w(f"v{i}_wo", a["wo"]); pk.b(f"v{i}_bo", a["bo"])
        pk.b(f"v{i}_ln2_g", lp["ln2_g"]); pk.b(f"v{i}_ln2_b", lp["ln2_b"])
        pk.w(f"v{i}_fc1", lp["fc1_w"]); pk.b(f"v{i}_fc1_b", lp["fc1_b"])
        pk.w(f"v{i}_fc2", lp["fc2_w"]); pk.b(f"v{i}_fc2_b", lp["fc2_b"])

    pk.b("lnf_g", v["lnf_g"]); pk.b("lnf_b", v["lnf_b"])
    pk.w("pool_w", v["pool_w"]); pk.b("pool_b", v["pool_b"])

    for i, lp in enumerate(params["decoder"]):
        sa, ca = lp["self_attn"], lp["cross_attn"]
        # tgt length == 1  =>  softmax over one key is exactly 1  =>  SA(y) = y@(Wv@Wo)+(bv@Wo+bo)
        pk.w(f"d{i}_sw", jnp.dot(sa["wv"], sa["wo"]))
        pk.b(f"d{i}_sb", jnp.dot(sa["bv"], sa["wo"]) + sa["bo"])
        pk.w(f"d{i}_cwq", ca["wq"]); pk.b(f"d{i}_cbq", ca["bq"])
        pk.w(f"d{i}_cwkv", jnp.concatenate([ca["wk"], ca["wv"]], axis=1))
        pk.b(f"d{i}_cbkv", jnp.concatenate([ca["bk"], ca["bv"]]))
        pk.w(f"d{i}_cwo", ca["wo"]); pk.b(f"d{i}_cbo", ca["bo"])
        pk.b(f"d{i}_n1_g", lp["n1_g"]); pk.b(f"d{i}_n1_b", lp["n1_b"])
        pk.b(f"d{i}_n2_g", lp["n2_g"]); pk.b(f"d{i}_n2_b", lp["n2_b"])
        pk.b(f"d{i}_n3_g", lp["n3_g"]); pk.b(f"d{i}_n3_b", lp["n3_b"])
        pk.w(f"d{i}_ff1", lp["ff1_w"]); pk.b(f"d{i}_ff1_b", lp["ff1_b"])
        pk.w(f"d{i}_ff2", lp["ff2_w"]); pk.b(f"d{i}_ff2_b", lp["ff2_b"])

    fc_w_pad = jnp.zeros((D_MODEL, OUT_PAD), jnp.float32).at[:, :FC_OUT].set(params["fc_w"])
    fc_b_pad = jnp.zeros((OUT_PAD,), jnp.float32).at[:FC_OUT].set(params["fc_b"])
    pk.w("fc_w", fc_w_pad); pk.b("fc_b", fc_b_pad)

    return pk.finalize()


# ------------------------------------ fused kernel ------------------------------------------
def _make_kernel(w_meta, b_meta, batch, out_rows):
    """Builds the fused kernel; all offsets/shapes are static Python constants in the closure."""

    def kernel(tok_ref, mem_ref, w_ref, b_ref, out_ref):
        def W(name):                       # static slice out of the packed weight slab
            off, r, c = w_meta[name]
            return w_ref[off:off + r, :c]

        def Bv(name):                      # one (1, c) row out of the packed bias slab
            off, c = b_meta[name]
            return b_ref[off:off + 1, :c]

        def ln(x, gname, bname, eps):
            mu = jnp.mean(x, axis=-1, keepdims=True)
            var = jnp.mean((x - mu) ** 2, axis=-1, keepdims=True)
            return (x - mu) * jax.lax.rsqrt(var + eps) * Bv(gname) + Bv(bname)

        def mha(q, k, v, wo, bo, nheads, dh, mask):
            """Multi-head attention with a block-diagonal (same-batch) additive mask.
            Head outputs are lane-concatenated and merged through Wo in one matmul."""
            scale = 1.0 / math.sqrt(dh)
            heads = []
            for h in range(nheads):
                sl = slice(h * dh, (h + 1) * dh)
                s = jax.lax.dot_general(q[:, sl], k[:, sl], (((1,), (1,)), ((), ())),
                                        preferred_element_type=jnp.float32) * scale + mask
                s = s - jnp.max(s, axis=-1, keepdims=True)
                p = jnp.exp(s)
                p = p * pl.reciprocal(jnp.sum(p, axis=-1, keepdims=True), approx=True)
                heads.append(jnp.dot(p, v[:, sl], preferred_element_type=jnp.float32))
            o = jnp.concatenate(heads, axis=-1)                                # (Lq, E)
            return jnp.dot(o, wo, preferred_element_type=jnp.float32) + bo

        vit_mask = W("vit_mask")           # (B*VIT_LEN, B*VIT_LEN)
        cross_mask = W("cross_mask")       # (B, B*MEM_LEN)

        # ----- ViT: patch embedding (+CLS/pos/conv-bias folded into token_add) -----
        x = jnp.dot(tok_ref[...], W("patch_w"),
                    preferred_element_type=jnp.float32) + W("token_add")       # (B*VIT_LEN, E)

        # ----- ViT encoder layers (pre-LN, GELU MLP), whole batch at once -----
        for i in range(VIT_LAYERS):
            h = ln(x, f"v{i}_ln1_g", f"v{i}_ln1_b", LN_EPS_VIT)
            qkv = jnp.dot(h, W(f"v{i}_wqkv"),
                          preferred_element_type=jnp.float32) + Bv(f"v{i}_bqkv")
            att = mha(qkv[:, :E], qkv[:, E:2 * E], qkv[:, 2 * E:],
                      W(f"v{i}_wo"), Bv(f"v{i}_bo"), VIT_HEADS, VIT_DH, vit_mask)
            x = x + att
            h = ln(x, f"v{i}_ln2_g", f"v{i}_ln2_b", LN_EPS_VIT)
            # TODO(synk): HF ViT uses exact erf-GELU; tanh approximation kept for Mosaic-safe lowering.
            h = jax.nn.gelu(jnp.dot(h, W(f"v{i}_fc1"),
                                    preferred_element_type=jnp.float32) + Bv(f"v{i}_fc1_b"),
                            approximate=True)
            h = jnp.dot(h, W(f"v{i}_fc2"),
                        preferred_element_type=jnp.float32) + Bv(f"v{i}_fc2_b")
            x = x + h

        # ----- final LN + pooler (Linear + tanh on CLS; CLS rows are rows 0..B-1) -----
        x = ln(x, "lnf_g", "lnf_b", LN_EPS_VIT)
        cls = x[:batch, :]                                                     # (B, E)
        y = jnp.tanh(jnp.dot(cls, W("pool_w"),
                             preferred_element_type=jnp.float32) + Bv("pool_b"))

        # ----- TransformerDecoder (post-LN, ReLU FFN); tgt length == 1 per batch elem -----
        mem = mem_ref[...]                                                     # (B*MEM_LEN, E)
        for i in range(NUM_DEC_LAYERS):
            # self-attention over a length-1 target is exactly V@Wo (softmax == 1), pre-folded
            sa = jnp.dot(y, W(f"d{i}_sw"),
                         preferred_element_type=jnp.float32) + Bv(f"d{i}_sb")
            y = ln(y + sa, f"d{i}_n1_g", f"d{i}_n1_b", LN_EPS_DEC)

            q = jnp.dot(y, W(f"d{i}_cwq"),
                        preferred_element_type=jnp.float32) + Bv(f"d{i}_cbq")
            kv = jnp.dot(mem, W(f"d{i}_cwkv"),
                         preferred_element_type=jnp.float32) + Bv(f"d{i}_cbkv")
            ca = mha(q, kv[:, :D_MODEL], kv[:, D_MODEL:],
                     W(f"d{i}_cwo"), Bv(f"d{i}_cbo"), NHEAD, DEC_DH, cross_mask)
            y = ln(y + ca, f"d{i}_n2_g", f"d{i}_n2_b", LN_EPS_DEC)

            hh = jnp.maximum(jnp.dot(y, W(f"d{i}_ff1"),
                                     preferred_element_type=jnp.float32) + Bv(f"d{i}_ff1_b"), 0.0)
            hh = jnp.dot(hh, W(f"d{i}_ff2"),
                         preferred_element_type=jnp.float32) + Bv(f"d{i}_ff2_b")
            y = ln(y + hh, f"d{i}_n3_g", f"d{i}_n3_b", LN_EPS_DEC)

        # ----- final Linear: one lane/sublane-dense slab, row b == batch element b -----
        out = jnp.dot(y, W("fc_w"), preferred_element_type=jnp.float32) + Bv("fc_b")   # (B, 128)
        out_ref[...] = jnp.concatenate(
            [out, jnp.zeros((out_rows - batch, OUT_PAD), jnp.float32)], axis=0)

    return kernel


# ----------------------------------- wrapper / glue ----------------------------------------
def _im2col_tokens(img):
    """im2col of the non-overlapping PxP conv ((C, ph, pw) flatten order == Conv2d weight order).
    Row layout: rows 0..B-1 are zero CLS slots (CLS embedding folded into token_add inside the
    kernel); row B + b*NP + p is patch p of batch b."""
    B, C, H, Wd = img.shape
    P = PATCH
    nh, nw = H // P, Wd // P
    p = img.reshape(B, C, nh, P, nw, P).transpose(0, 2, 4, 1, 3, 5)
    p = p.reshape(B * nh * nw, C * P * P)
    return jnp.concatenate([jnp.zeros((B, C * P * P), jnp.float32), p], axis=0)


def recipe_multi_head_attn_forward(img, memory, params):
    """Forward of RecipeMultiHeadAttn as one fused Pallas kernel (single grid step, whole batch);
    img:(B,C,H,W) NCHW, memory:(B,S,d_model) batch_first -> (B, FC_OUT)."""
    B = img.shape[0]
    out_rows = max(8, -(-B // 8) * 8)

    tokens = _im2col_tokens(img)                              # (B*VIT_LEN, PATCH_DIM)
    mem2d = memory.reshape(B * MEM_LEN, D_MODEL)              # (B*MEM_LEN, D_MODEL)
    wmat, bmat, w_meta, b_meta = _pack_params(params, B)      # two packed slabs -> 2 DMAs

    kernel = _make_kernel(w_meta, b_meta, B, out_rows)

    out = pl.pallas_call(
        kernel,
        out_shape=jax.ShapeDtypeStruct((out_rows, OUT_PAD), jnp.float32),
        grid=(1,),
        in_specs=[
            pl.BlockSpec(tokens.shape, lambda i: (0, 0)),
            pl.BlockSpec(mem2d.shape, lambda i: (0, 0)),
            pl.BlockSpec(wmat.shape, lambda i: (0, 0)),
            pl.BlockSpec(bmat.shape, lambda i: (0, 0)),
        ],
        out_specs=pl.BlockSpec((out_rows, OUT_PAD), lambda i: (0, 0)),
        compiler_params=pltpu.CompilerParams(dimension_semantics=("arbitrary",)),
    )(tokens, mem2d, wmat, bmat)
    return out[:B, :FC_OUT]


# -------------------------------- deterministic parameters ---------------------------------
class _KeyGen:
    def __init__(self, key):
        self.key = key

    def __call__(self):
        self.key, k = jax.random.split(self.key)
        return k


def init_params(key):
    kg = _KeyGen(key)

    def dense(din, dout):
        w = 0.02 * jax.random.normal(kg(), (din, dout), jnp.float32)
        return w, jnp.zeros((dout,), jnp.float32)

    def attn_params(dim):
        wq, bq = dense(dim, dim)
        wk, bk = dense(dim, dim)
        wv, bv = dense(dim, dim)
        wo, bo = dense(dim, dim)
        return dict(wq=wq, bq=bq, wk=wk, bk=bk, wv=wv, bv=bv, wo=wo, bo=bo)

    ones = lambda n: jnp.ones((n,), jnp.float32)
    zeros = lambda n: jnp.zeros((n,), jnp.float32)

    vit_layers = []
    for _ in range(VIT_LAYERS):
        fc1_w, fc1_b = dense(E, VIT_MLP)
        fc2_w, fc2_b = dense(VIT_MLP, E)
        vit_layers.append(dict(
            ln1_g=ones(E), ln1_b=zeros(E),
            attn=attn_params(E),
            ln2_g=ones(E), ln2_b=zeros(E),
            fc1_w=fc1_w, fc1_b=fc1_b, fc2_w=fc2_w, fc2_b=fc2_b))

    patch_w, patch_b = dense(PATCH_DIM, E)
    pool_w, pool_b = dense(E, E)
    vit = dict(
        patch_w=patch_w, patch_b=patch_b,
        cls=0.02 * jax.random.normal(kg(), (1, 1, E), jnp.float32),
        pos=0.02 * jax.random.normal(kg(), (1, VIT_LEN, E), jnp.float32),
        layers=vit_layers,
        lnf_g=ones(E), lnf_b=zeros(E),
        pool_w=pool_w, pool_b=pool_b)

    dec_layers = []
    for _ in range(NUM_DEC_LAYERS):
        ff1_w, ff1_b = dense(D_MODEL, FF)
        ff2_w, ff2_b = dense(FF, D_MODEL)
        dec_layers.append(dict(
            self_attn=attn_params(D_MODEL), cross_attn=attn_params(D_MODEL),
            ff1_w=ff1_w, ff1_b=ff1_b, ff2_w=ff2_w, ff2_b=ff2_b,
            n1_g=ones(D_MODEL), n1_b=zeros(D_MODEL),
            n2_g=ones(D_MODEL), n2_b=zeros(D_MODEL),
            n3_g=ones(D_MODEL), n3_b=zeros(D_MODEL)))

    fc_w, fc_b = dense(D_MODEL, FC_OUT)
    return dict(vit=vit, decoder=dec_layers, fc_w=fc_w, fc_b=fc_b)


# --------------------------------------------- main ----------------------------------------
if __name__ == "__main__":
    key = jax.random.PRNGKey(0)
    k_img, k_mem, k_par = jax.random.split(key, 3)

    img = jax.random.normal(k_img, (2, IMG_C, IMG_HW, IMG_HW), jnp.float32)   # NCHW
    memory = jax.random.normal(k_mem, (2, MEM_LEN, D_MODEL), jnp.float32)     # batch_first
    params = init_params(k_par)

    fwd = jax.jit(recipe_multi_head_attn_forward)
    out = fwd(img, memory, params)
    out = jax.block_until_ready(out)

    assert out.shape == (2, FC_OUT), out.shape
    assert bool(jnp.all(jnp.isfinite(out)))
    print("KERNEL_OK")
</pallas_src>

<mosaic_0001>
module attributes {stable_mosaic.version = 11 : i64} {
  func.func @kernel(%arg0: i32, %arg1: memref<10x192xf32, #tpu.memory_space<vmem>>, %arg2: memref<16x32xf32, #tpu.memory_space<vmem>>, %arg3: memref<1064x128xf32, #tpu.memory_space<vmem>>, %arg4: memref<48x128xf32, #tpu.memory_space<vmem>>, %arg5: memref<8x128xf32, #tpu.memory_space<vmem>>) attributes {dimension_semantics = [#tpu.dimension_semantics<arbitrary>], iteration_bounds = array<i64: 1>, scalar_prefetch = 0 : i64, scratch_operands = 0 : i64, tpu.core_type = #tpu.core_type<tc>, window_params = [{pipeline_mode = #tpu.pipeline_mode<synchronous>, transform_indices = @transform_0, window_bounds = array<i64: 10, 192>}, {pipeline_mode = #tpu.pipeline_mode<synchronous>, transform_indices = @transform_1, window_bounds = array<i64: 16, 32>}, {pipeline_mode = #tpu.pipeline_mode<synchronous>, transform_indices = @transform_2, window_bounds = array<i64: 1064, 128>}, {pipeline_mode = #tpu.pipeline_mode<synchronous>, transform_indices = @transform_3, window_bounds = array<i64: 48, 128>}, {pipeline_mode = #tpu.pipeline_mode<synchronous>, transform_indices = @transform_4, window_bounds = array<i64: 8, 128>}]} {
    %c208 = arith.constant 208 : index
    %c0 = arith.constant 0 : index
    %0 = vector.load %arg3[%c208, %c0] : memref<1064x128xf32, #tpu.memory_space<vmem>>, vector<10x10xf32>
    %c224 = arith.constant 224 : index
    %c0_0 = arith.constant 0 : index
    %1 = vector.load %arg3[%c224, %c0_0] : memref<1064x128xf32, #tpu.memory_space<vmem>>, vector<2x16xf32>
    %c0_1 = arith.constant 0 : index
    %c0_2 = arith.constant 0 : index
    %2 = vector.load %arg1[%c0_1, %c0_2] : memref<10x192xf32, #tpu.memory_space<vmem>>, vector<10x192xf32>
    %c0_3 = arith.constant 0 : index
    %c0_4 = arith.constant 0 : index
    %3 = vector.load %arg3[%c0_3, %c0_4] : memref<1064x128xf32, #tpu.memory_space<vmem>>, vector<192x32xf32>
    %cst = arith.constant dense<0.000000e+00> : vector<10x32xf32>
    %4 = tpu.matmul %2, %3, %cst {dimension_numbers = #tpu.dot_dimension_numbers<[1], [0], [0], [1], [0, 0, 1, 1], [], []>} : vector<10x192xf32>, vector<192x32xf32>, vector<10x32xf32> -> vector<10x32xf32>
    %c192 = arith.constant 192 : index
    %c0_5 = arith.constant 0 : index
    %5 = vector.load %arg3[%c192, %c0_5] : memref<1064x128xf32, #tpu.memory_space<vmem>>, vector<10x32xf32>
    %6 = arith.addf %4, %5 : vector<10x32xf32>
    %cst_6 = arith.constant dense<0.000000e+00> : vector<10xf32>
    %7 = vector.multi_reduction <add>, %6, %cst_6 [1] : vector<10x32xf32> to vector<10xf32>
    %8 = vector.shape_cast %7 : vector<10xf32> to vector<10x1xf32>
    %cst_7 = arith.constant 3.200000e+01 : f32
    %9 = vector.broadcast %cst_7 : f32 to vector<10x1xf32>
    %10 = arith.divf %8, %9 : vector<10x1xf32>
    %11 = vector.broadcast %10 : vector<10x1xf32> to vector<10x32xf32>
    %12 = arith.subf %6, %11 : vector<10x32xf32>
    %13 = arith.mulf %12, %12 : vector<10x32xf32>
    %cst_8 = arith.constant dense<0.000000e+00> : vector<10xf32>
    %14 = vector.multi_reduction <add>, %13, %cst_8 [1] : vector<10x32xf32> to vector<10xf32>
    %15 = vector.shape_cast %14 : vector<10xf32> to vector<10x1xf32>
    %cst_9 = arith.constant 3.200000e+01 : f32
    %16 = vector.broadcast %cst_9 : f32 to vector<10x1xf32>
    %17 = arith.divf %15, %16 : vector<10x1xf32>
    %18 = vector.broadcast %10 : vector<10x1xf32> to vector<10x32xf32>
    %19 = arith.subf %6, %18 : vector<10x32xf32>
    %cst_10 = arith.constant 9.99999996E-13 : f32
    %20 = vector.broadcast %cst_10 : f32 to vector<10x1xf32>
    %21 = arith.addf %17, %20 : vector<10x1xf32>
    %22 = math.rsqrt %21 : vector<10x1xf32>
    %23 = vector.broadcast %22 : vector<10x1xf32> to vector<10x32xf32>
    %24 = arith.mulf %19, %23 : vector<10x32xf32>
    %c0_11 = arith.constant 0 : index
    %c0_12 = arith.constant 0 : index
    %25 = vector.load %arg4[%c0_11, %c0_12] : memref<48x128xf32, #tpu.memory_space<vmem>>, vector<1x32xf32>
    %26 = vector.broadcast %25 : vector<1x32xf32> to vector<10x32xf32>
    %27 = arith.mulf %24, %26 : vector<10x32xf32>
    %c1 = arith.constant 1 : index
    %c0_13 = arith.constant 0 : index
    %28 = vector.load %arg4[%c1, %c0_13] : memref<48x128xf32, #tpu.memory_space<vmem>>, vector<1x32xf32>
    %29 = vector.broadcast %28 : vector<1x32xf32> to vector<10x32xf32>
    %30 = arith.addf %27, %29 : vector<10x32xf32>
    %c232 = arith.constant 232 : index
    %c0_14 = arith.constant 0 : index
    %31 = vector.load %arg3[%c232, %c0_14] : memref<1064x128xf32, #tpu.memory_space<vmem>>, vector<32x96xf32>
    %cst_15 = arith.constant dense<0.000000e+00> : vector<10x96xf32>
    %32 = tpu.matmul %30, %31, %cst_15 {dimension_numbers = #tpu.dot_dimension_numbers<[1], [0], [0], [1], [0, 0, 1, 1], [], []>} : vector<10x32xf32>, vector<32x96xf32>, vector<10x96xf32> -> vector<10x96xf32>
    %c2 = arith.constant 2 : index
    %c0_16 = arith.constant 0 : index
    %33 = vector.load %arg4[%c2, %c0_16] : memref<48x128xf32, #tpu.memory_space<vmem>>, vector<1x96xf32>
    %34 = vector.broadcast %33 : vector<1x96xf32> to vector<10x96xf32>
    %35 = arith.addf %32, %34 : vector<10x96xf32>
    %36 = vector.extract_strided_slice %35 {offsets = [0, 0], sizes = [10, 32], strides = [1, 1]} : vector<10x96xf32> to vector<10x32xf32>
    %37 = vector.extract_strided_slice %35 {offsets = [0, 32], sizes = [10, 32], strides = [1, 1]} : vector<10x96xf32> to vector<10x32xf32>
    %38 = vector.extract_strided_slice %35 {offsets = [0, 64], sizes = [10, 32], strides = [1, 1]} : vector<10x96xf32> to vector<10x32xf32>
    %c264 = arith.constant 264 : index
    %c0_17 = arith.constant 0 : index
    %39 = vector.load %arg3[%c264, %c0_17] : memref<1064x128xf32, #tpu.memory_space<vmem>>, vector<32x32xf32>
    %c3 = arith.constant 3 : index
    %c0_18 = arith.constant 0 : index
    %40 = vector.load %arg4[%c3, %c0_18] : memref<48x128xf32, #tpu.memory_space<vmem>>, vector<1x32xf32>
    %41 = vector.extract_strided_slice %36 {offsets = [0, 0], sizes = [10, 8], strides = [1, 1]} : vector<10x32xf32> to vector<10x8xf32>
    %42 = vector.extract_strided_slice %37 {offsets = [0, 0], sizes = [10, 8], strides = [1, 1]} : vector<10x32xf32> to vector<10x8xf32>
    %cst_19 = arith.constant dense<0.000000e+00> : vector<10x10xf32>
    %43 = tpu.matmul %41, %42, %cst_19 {dimension_numbers = #tpu.dot_dimension_numbers<[1], [1], [0], [0], [0, 0, 1, 0], [], []>} : vector<10x8xf32>, vector<10x8xf32>, vector<10x10xf32> -> vector<10x10xf32>
    %cst_20 = arith.constant 0.353553385 : f32
    %44 = vector.broadcast %cst_20 : f32 to vector<10x10xf32>
    %45 = arith.mulf %43, %44 : vector<10x10xf32>
    %46 = arith.addf %45, %0 : vector<10x10xf32>
    %cst_21 = arith.constant dense<0xFF800000> : vector<10xf32>
    %47 = vector.multi_reduction <maximumf>, %46, %cst_21 [1] : vector<10x10xf32> to vector<10xf32>
    %48 = vector.shape_cast %47 : vector<10xf32> to vector<10x1xf32>
    %49 = vector.broadcast %48 : vector<10x1xf32> to vector<10x10xf32>
    %50 = arith.subf %46, %49 : vector<10x10xf32>
    %51 = math.exp %50 : vector<10x10xf32>
    %cst_22 = arith.constant dense<0.000000e+00> : vector<10xf32>
    %52 = vector.multi_reduction <add>, %51, %cst_22 [1] : vector<10x10xf32> to vector<10xf32>
    %53 = vector.shape_cast %52 : vector<10xf32> to vector<10x1xf32>
    %54 = tpu.reciprocal %53 {approx = true} : vector<10x1xf32> -> vector<10x1xf32>
    %55 = vector.broadcast %54 : vector<10x1xf32> to vector<10x10xf32>
    %56 = arith.mulf %51, %55 : vector<10x10xf32>
    %57 = vector.extract_strided_slice %38 {offsets = [0, 0], sizes = [10, 8], strides = [1, 1]} : vector<10x32xf32> to vector<10x8xf32>
    %cst_23 = arith.constant dense<0.000000e+00> : vector<10x8xf32>
    %58 = tpu.matmul %56, %57, %cst_23 {dimension_numbers = #tpu.dot_dimension_numbers<[1], [0], [0], [1], [0, 0, 1, 1], [], []>} : vector<10x10xf32>, vector<10x8xf32>, vector<10x8xf32> -> vector<10x8xf32>
    %59 = vector.extract_strided_slice %36 {offsets = [0, 8], sizes = [10, 8], strides = [1, 1]} : vector<10x32xf32> to vector<10x8xf32>
    %60 = vector.extract_strided_slice %37 {offsets = [0, 8], sizes = [10, 8], strides = [1, 1]} : vector<10x32xf32> to vector<10x8xf32>
    %cst_24 = arith.constant dense<0.000000e+00> : vector<10x10xf32>
    %61 = tpu.matmul %59, %60, %cst_24 {dimension_numbers = #tpu.dot_dimension_numbers<[1], [1], [0], [0], [0, 0, 1, 0], [], []>} : vector<10x8xf32>, vector<10x8xf32>, vector<10x10xf32> -> vector<10x10xf32>
    %cst_25 = arith.constant 0.353553385 : f32
    %62 = vector.broadcast %cst_25 : f32 to vector<10x10xf32>
    %63 = arith.mulf %61, %62 : vector<10x10xf32>
    %64 = arith.addf %63, %0 : vector<10x10xf32>
    %cst_26 = arith.constant dense<0xFF800000> : vector<10xf32>
    %65 = vector.multi_reduction <maximumf>, %64, %cst_26 [1] : vector<10x10xf32> to vector<10xf32>
    %66 = vector.shape_cast %65 : vector<10xf32> to vector<10x1xf32>
    %67 = vector.broadcast %66 : vector<10x1xf32> to vector<10x10xf32>
    %68 = arith.subf %64, %67 : vector<10x10xf32>
    %69 = math.exp %68 : vector<10x10xf32>
    %cst_27 = arith.constant dense<0.000000e+00> : vector<10xf32>
    %70 = vector.multi_reduction <add>, %69, %cst_27 [1] : vector<10x10xf32> to vector<10xf32>
    %71 = vector.shape_cast %70 : vector<10xf32> to vector<10x1xf32>
    %72 = tpu.reciprocal %71 {approx = true} : vector<10x1xf32> -> vector<10x1xf32>
    %73 = vector.broadcast %72 : vector<10x1xf32> to vector<10x10xf32>
    %74 = arith.mulf %69, %73 : vector<10x10xf32>
    %75 = vector.extract_strided_slice %38 {offsets = [0, 8], sizes = [10, 8], strides = [1, 1]} : vector<10x32xf32> to vector<10x8xf32>
    %cst_28 = arith.constant dense<0.000000e+00> : vector<10x8xf32>
    %76 = tpu.matmul %74, %75, %cst_28 {dimension_numbers = #tpu.dot_dimension_numbers<[1], [0], [0], [1], [0, 0, 1, 1], [], []>} : vector<10x10xf32>, vector<10x8xf32>, vector<10x8xf32> -> vector<10x8xf32>
    %77 = vector.extract_strided_slice %36 {offsets = [0, 16], sizes = [10, 8], strides = [1, 1]} : vector<10x32xf32> to vector<10x8xf32>
    %78 = vector.extract_strided_slice %37 {offsets = [0, 16], sizes = [10, 8], strides = [1, 1]} : vector<10x32xf32> to vector<10x8xf32>
    %cst_29 = arith.constant dense<0.000000e+00> : vector<10x10xf32>
    %79 = tpu.matmul %77, %78, %cst_29 {dimension_numbers = #tpu.dot_dimension_numbers<[1], [1], [0], [0], [0, 0, 1, 0], [], []>} : vector<10x8xf32>, vector<10x8xf32>, vector<10x10xf32> -> vector<10x10xf32>
    %cst_30 = arith.constant 0.353553385 : f32
    %80 = vector.broadcast %cst_30 : f32 to vector<10x10xf32>
    %81 = arith.mulf %79, %80 : vector<10x10xf32>
    %82 = arith.addf %81, %0 : vector<10x10xf32>
    %cst_31 = arith.constant dense<0xFF800000> : vector<10xf32>
    %83 = vector.multi_reduction <maximumf>, %82, %cst_31 [1] : vector<10x10xf32> to vector<10xf32>
    %84 = vector.shape_cast %83 : vector<10xf32> to vector<10x1xf32>
    %85 = vector.broadcast %84 : vector<10x1xf32> to vector<10x10xf32>
    %86 = arith.subf %82, %85 : vector<10x10xf32>
    %87 = math.exp %86 : vector<10x10xf32>
    %cst_32 = arith.constant dense<0.000000e+00> : vector<10xf32>
    %88 = vector.multi_reduction <add>, %87, %cst_32 [1] : vector<10x10xf32> to vector<10xf32>
    %89 = vector.shape_cast %88 : vector<10xf32> to vector<10x1xf32>
    %90 = tpu.reciprocal %89 {approx = true} : vector<10x1xf32> -> vector<10x1xf32>
    %91 = vector.broadcast %90 : vector<10x1xf32> to vector<10x10xf32>
    %92 = arith.mulf %87, %91 : vector<10x10xf32>
    %93 = vector.extract_strided_slice %38 {offsets = [0, 16], sizes = [10, 8], strides = [1, 1]} : vector<10x32xf32> to vector<10x8xf32>
    %cst_33 = arith.constant dense<0.000000e+00> : vector<10x8xf32>
    %94 = tpu.matmul %92, %93, %cst_33 {dimension_numbers = #tpu.dot_dimension_numbers<[1], [0], [0], [1], [0, 0, 1, 1], [], []>} : vector<10x10xf32>, vector<10x8xf32>, vector<10x8xf32> -> vector<10x8xf32>
    %95 = vector.extract_strided_slice %36 {offsets = [0, 24], sizes = [10, 8], strides = [1, 1]} : vector<10x32xf32> to vector<10x8xf32>
    %96 = vector.extract_strided_slice %37 {offsets = [0, 24], sizes = [10, 8], strides = [1, 1]} : vector<10x32xf32> to vector<10x8xf32>
    %cst_34 = arith.constant dense<0.000000e+00> : vector<10x10xf32>
    %97 = tpu.matmul %95, %96, %cst_34 {dimension_numbers = #tpu.dot_dimension_numbers<[1], [1], [0], [0], [0, 0, 1, 0], [], []>} : vector<10x8xf32>, vector<10x8xf32>, vector<10x10xf32> -> vector<10x10xf32>
    %cst_35 = arith.constant 0.353553385 : f32
    %98 = vector.broadcast %cst_35 : f32 to vector<10x10xf32>
    %99 = arith.mulf %97, %98 : vector<10x10xf32>
    %100 = arith.addf %99, %0 : vector<10x10xf32>
    %cst_36 = arith.constant dense<0xFF800000> : vector<10xf32>
    %101 = vector.multi_reduction <maximumf>, %100, %cst_36 [1] : vector<10x10xf32> to vector<10xf32>
    %102 = vector.shape_cast %101 : vector<10xf32> to vector<10x1xf32>
    %103 = vector.broadcast %102 : vector<10x1xf32> to vector<10x10xf32>
    %104 = arith.subf %100, %103 : vector<10x10xf32>
    %105 = math.exp %104 : vector<10x10xf32>
    %cst_37 = arith.constant dense<0.000000e+00> : vector<10xf32>
    %106 = vector.multi_reduction <add>, %105, %cst_37 [1] : vector<10x10xf32> to vector<10xf32>
    %107 = vector.shape_cast %106 : vector<10xf32> to vector<10x1xf32>
    %108 = tpu.reciprocal %107 {approx = true} : vector<10x1xf32> -> vector<10x1xf32>
    %109 = vector.broadcast %108 : vector<10x1xf32> to vector<10x10xf32>
    %110 = arith.mulf %105, %109 : vector<10x10xf32>
    %111 = vector.extract_strided_slice %38 {offsets = [0, 24], sizes = [10, 8], strides = [1, 1]} : vector<10x32xf32> to vector<10x8xf32>
    %cst_38 = arith.constant dense<0.000000e+00> : vector<10x8xf32>
    %112 = tpu.matmul %110, %111, %cst_38 {dimension_numbers = #tpu.dot_dimension_numbers<[1], [0], [0], [1], [0, 0, 1, 1], [], []>} : vector<10x10xf32>, vector<10x8xf32>, vector<10x8xf32> -> vector<10x8xf32>
    %113 = tpu.concatenate %58, %76, %94, %112 in 1 : vector<10x8xf32>, vector<10x8xf32>, vector<10x8xf32>, vector<10x8xf32> -> vector<10x32xf32>
    %cst_39 = arith.constant dense<0.000000e+00> : vector<10x32xf32>
    %114 = tpu.matmul %113, %39, %cst_39 {dimension_numbers = #tpu.dot_dimension_numbers<[1], [0], [0], [1], [0, 0, 1, 1], [], []>} : vector<10x32xf32>, vector<32x32xf32>, vector<10x32xf32> -> vector<10x32xf32>
    %115 = vector.broadcast %40 : vector<1x32xf32> to vector<10x32xf32>
    %116 = arith.addf %114, %115 : vector<10x32xf32>
    %117 = arith.addf %6, %116 : vector<10x32xf32>
    %cst_40 = arith.constant dense<0.000000e+00> : vector<10xf32>
    %118 = vector.multi_reduction <add>, %117, %cst_40 [1] : vector<10x32xf32> to vector<10xf32>
    %119 = vector.shape_cast %118 : vector<10xf32> to vector<10x1xf32>
    %cst_41 = arith.constant 3.200000e+01 : f32
    %120 = vector.broadcast %cst_41 : f32 to vector<10x1xf32>
    %121 = arith.divf %119, %120 : vector<10x1xf32>
    %122 = vector.broadcast %121 : vector<10x1xf32> to vector<10x32xf32>
    %123 = arith.subf %117, %122 : vector<10x32xf32>
    %124 = arith.mulf %123, %123 : vector<10x32xf32>
    %cst_42 = arith.constant dense<0.000000e+00> : vector<10xf32>
    %125 = vector.multi_reduction <add>, %124, %cst_42 [1] : vector<10x32xf32> to vector<10xf32>
    %126 = vector.shape_cast %125 : vector<10xf32> to vector<10x1xf32>
    %cst_43 = arith.constant 3.200000e+01 : f32
    %127 = vector.broadcast %cst_43 : f32 to vector<10x1xf32>
    %128 = arith.divf %126, %127 : vector<10x1xf32>
    %129 = vector.broadcast %121 : vector<10x1xf32> to vector<10x32xf32>
    %130 = arith.subf %117, %129 : vector<10x32xf32>
    %cst_44 = arith.constant 9.99999996E-13 : f32
    %131 = vector.broadcast %cst_44 : f32 to vector<10x1xf32>
    %132 = arith.addf %128, %131 : vector<10x1xf32>
    %133 = math.rsqrt %132 : vector<10x1xf32>
    %134 = vector.broadcast %133 : vector<10x1xf32> to vector<10x32xf32>
    %135 = arith.mulf %130, %134 : vector<10x32xf32>
    %c4 = arith.constant 4 : index
    %c0_45 = arith.constant 0 : index
    %136 = vector.load %arg4[%c4, %c0_45] : memref<48x128xf32, #tpu.memory_space<vmem>>, vector<1x32xf32>
    %137 = vector.broadcast %136 : vector<1x32xf32> to vector<10x32xf32>
    %138 = arith.mulf %135, %137 : vector<10x32xf32>
    %c5 = arith.constant 5 : index
    %c0_46 = arith.constant 0 : index
    %139 = vector.load %arg4[%c5, %c0_46] : memref<48x128xf32, #tpu.memory_space<vmem>>, vector<1x32xf32>
    %140 = vector.broadcast %139 : vector<1x32xf32> to vector<10x32xf32>
    %141 = arith.addf %138, %140 : vector<10x32xf32>
    %c296 = arith.constant 296 : index
    %c0_47 = arith.constant 0 : index
    %142 = vector.load %arg3[%c296, %c0_47] : memref<1064x128xf32, #tpu.memory_space<vmem>>, vector<32x64xf32>
    %cst_48 = arith.constant dense<0.000000e+00> : vector<10x64xf32>
    %143 = tpu.matmul %141, %142, %cst_48 {dimension_numbers = #tpu.dot_dimension_numbers<[1], [0], [0], [1], [0, 0, 1, 1], [], []>} : vector<10x32xf32>, vector<32x64xf32>, vector<10x64xf32> -> vector<10x64xf32>
    %c6 = arith.constant 6 : index
    %c0_49 = arith.constant 0 : index
    %144 = vector.load %arg4[%c6, %c0_49] : memref<48x128xf32, #tpu.memory_space<vmem>>, vector<1x64xf32>
    %145 = vector.broadcast %144 : vector<1x64xf32> to vector<10x64xf32>
    %146 = arith.addf %143, %145 : vector<10x64xf32>
    %147 = arith.mulf %146, %146 : vector<10x64xf32>
    %148 = arith.mulf %146, %147 : vector<10x64xf32>
    %cst_50 = arith.constant 4.471500e-02 : f32
    %149 = vector.broadcast %cst_50 : f32 to vector<10x64xf32>
    %150 = arith.mulf %149, %148 : vector<10x64xf32>
    %151 = arith.addf %146, %150 : vector<10x64xf32>
    %cst_51 = arith.constant 0.797884583 : f32
    %152 = vector.broadcast %cst_51 : f32 to vector<10x64xf32>
    %153 = arith.mulf %152, %151 : vector<10x64xf32>
    %154 = math.tanh %153 : vector<10x64xf32>
    %cst_52 = arith.constant 1.000000e+00 : f32
    %155 = vector.broadcast %cst_52 : f32 to vector<10x64xf32>
    %156 = arith.addf %155, %154 : vector<10x64xf32>
    %cst_53 = arith.constant 5.000000e-01 : f32
    %157 = vector.broadcast %cst_53 : f32 to vector<10x64xf32>
    %158 = arith.mulf %157, %156 : vector<10x64xf32>
    %159 = arith.mulf %146, %158 : vector<10x64xf32>
    %c328 = arith.constant 328 : index
    %c0_54 = arith.constant 0 : index
    %160 = vector.load %arg3[%c328, %c0_54] : memref<1064x128xf32, #tpu.memory_space<vmem>>, vector<64x32xf32>
    %cst_55 = arith.constant dense<0.000000e+00> : vector<10x32xf32>
    %161 = tpu.matmul %159, %160, %cst_55 {dimension_numbers = #tpu.dot_dimension_numbers<[1], [0], [0], [1], [0, 0, 1, 1], [], []>} : vector<10x64xf32>, vector<64x32xf32>, vector<10x32xf32> -> vector<10x32xf32>
    %c7 = arith.constant 7 : index
    %c0_56 = arith.constant 0 : index
    %162 = vector.load %arg4[%c7, %c0_56] : memref<48x128xf32, #tpu.memory_space<vmem>>, vector<1x32xf32>
    %163 = vector.broadcast %162 : vector<1x32xf32> to vector<10x32xf32>
    %164 = arith.addf %161, %163 : vector<10x32xf32>
    %165 = arith.addf %117, %164 : vector<10x32xf32>
    %cst_57 = arith.constant dense<0.000000e+00> : vector<10xf32>
    %166 = vector.multi_reduction <add>, %165, %cst_57 [1] : vector<10x32xf32> to vector<10xf32>
    %167 = vector.shape_cast %166 : vector<10xf32> to vector<10x1xf32>
    %cst_58 = arith.constant 3.200000e+01 : f32
    %168 = vector.broadcast %cst_58 : f32 to vector<10x1xf32>
    %169 = arith.divf %167, %168 : vector<10x1xf32>
    %170 = vector.broadcast %169 : vector<10x1xf32> to vector<10x32xf32>
    %171 = arith.subf %165, %170 : vector<10x32xf32>
    %172 = arith.mulf %171, %171 : vector<10x32xf32>
    %cst_59 = arith.constant dense<0.000000e+00> : vector<10xf32>
    %173 = vector.multi_reduction <add>, %172, %cst_59 [1] : vector<10x32xf32> to vector<10xf32>
    %174 = vector.shape_cast %173 : vector<10xf32> to vector<10x1xf32>
    %cst_60 = arith.constant 3.200000e+01 : f32
    %175 = vector.broadcast %cst_60 : f32 to vector<10x1xf32>
    %176 = arith.divf %174, %175 : vector<10x1xf32>
    %177 = vector.broadcast %169 : vector<10x1xf32> to vector<10x32xf32>
    %178 = arith.subf %165, %177 : vector<10x32xf32>
    %cst_61 = arith.constant 9.99999996E-13 : f32
    %179 = vector.broadcast %cst_61 : f32 to vector<10x1xf32>
    %180 = arith.addf %176, %179 : vector<10x1xf32>
    %181 = math.rsqrt %180 : vector<10x1xf32>
    %182 = vector.broadcast %181 : vector<10x1xf32> to vector<10x32xf32>
    %183 = arith.mulf %178, %182 : vector<10x32xf32>
    %c8 = arith.constant 8 : index
    %c0_62 = arith.constant 0 : index
    %184 = vector.load %arg4[%c8, %c0_62] : memref<48x128xf32, #tpu.memory_space<vmem>>, vector<1x32xf32>
    %185 = vector.broadcast %184 : vector<1x32xf32> to vector<10x32xf32>
    %186 = arith.mulf %183, %185 : vector<10x32xf32>
    %c9 = arith.constant 9 : index
    %c0_63 = arith.constant 0 : index
    %187 = vector.load %arg4[%c9, %c0_63] : memref<48x128xf32, #tpu.memory_space<vmem>>, vector<1x32xf32>
    %188 = vector.broadcast %187 : vector<1x32xf32> to vector<10x32xf32>
    %189 = arith.addf %186, %188 : vector<10x32xf32>
    %c392 = arith.constant 392 : index
    %c0_64 = arith.constant 0 : index
    %190 = vector.load %arg3[%c392, %c0_64] : memref<1064x128xf32, #tpu.memory_space<vmem>>, vector<32x96xf32>
    %cst_65 = arith.constant dense<0.000000e+00> : vector<10x96xf32>
    %191 = tpu.matmul %189, %190, %cst_65 {dimension_numbers = #tpu.dot_dimension_numbers<[1], [0], [0], [1], [0, 0, 1, 1], [], []>} : vector<10x32xf32>, vector<32x96xf32>, vector<10x96xf32> -> vector<10x96xf32>
    %c10 = arith.constant 10 : index
    %c0_66 = arith.constant 0 : index
    %192 = vector.load %arg4[%c10, %c0_66] : memref<48x128xf32, #tpu.memory_space<vmem>>, vector<1x96xf32>
    %193 = vector.broadcast %192 : vector<1x96xf32> to vector<10x96xf32>
    %194 = arith.addf %191, %193 : vector<10x96xf32>
    %195 = vector.extract_strided_slice %194 {offsets = [0, 0], sizes = [10, 32], strides = [1, 1]} : vector<10x96xf32> to vector<10x32xf32>
    %196 = vector.extract_strided_slice %194 {offsets = [0, 32], sizes = [10, 32], strides = [1, 1]} : vector<10x96xf32> to vector<10x32xf32>
    %197 = vector.extract_strided_slice %194 {offsets = [0, 64], sizes = [10, 32], strides = [1, 1]} : vector<10x96xf32> to vector<10x32xf32>
    %c424 = arith.constant 424 : index
    %c0_67 = arith.constant 0 : index
    %198 = vector.load %arg3[%c424, %c0_67] : memref<1064x128xf32, #tpu.memory_space<vmem>>, vector<32x32xf32>
    %c11 = arith.constant 11 : index
    %c0_68 = arith.constant 0 : index
    %199 = vector.load %arg4[%c11, %c0_68] : memref<48x128xf32, #tpu.memory_space<vmem>>, vector<1x32xf32>
    %200 = vector.extract_strided_slice %195 {offsets = [0, 0], sizes = [10, 8], strides = [1, 1]} : vector<10x32xf32> to vector<10x8xf32>
    %201 = vector.extract_strided_slice %196 {offsets = [0, 0], sizes = [10, 8], strides = [1, 1]} : vector<10x32xf32> to vector<10x8xf32>
    %cst_69 = arith.constant dense<0.000000e+00> : vector<10x10xf32>
    %202 = tpu.matmul %200, %201, %cst_69 {dimension_numbers = #tpu.dot_dimension_numbers<[1], [1], [0], [0], [0, 0, 1, 0], [], []>} : vector<10x8xf32>, vector<10x8xf32>, vector<10x10xf32> -> vector<10x10xf32>
    %cst_70 = arith.constant 0.353553385 : f32
    %203 = vector.broadcast %cst_70 : f32 to vector<10x10xf32>
    %204 = arith.mulf %202, %203 : vector<10x10xf32>
    %205 = arith.addf %204, %0 : vector<10x10xf32>
    %cst_71 = arith.constant dense<0xFF800000> : vector<10xf32>
    %206 = vector.multi_reduction <maximumf>, %205, %cst_71 [1] : vector<10x10xf32> to vector<10xf32>
    %207 = vector.shape_cast %206 : vector<10xf32> to vector<10x1xf32>
    %208 = vector.broadcast %207 : vector<10x1xf32> to vector<10x10xf32>
    %209 = arith.subf %205, %208 : vector<10x10xf32>
    %210 = math.exp %209 : vector<10x10xf32>
    %cst_72 = arith.constant dense<0.000000e+00> : vector<10xf32>
    %211 = vector.multi_reduction <add>, %210, %cst_72 [1] : vector<10x10xf32> to vector<10xf32>
    %212 = vector.shape_cast %211 : vector<10xf32> to vector<10x1xf32>
    %213 = tpu.reciprocal %212 {approx = true} : vector<10x1xf32> -> vector<10x1xf32>
    %214 = vector.broadcast %213 : vector<10x1xf32> to vector<10x10xf32>
    %215 = arith.mulf %210, %214 : vector<10x10xf32>
    %216 = vector.extract_strided_slice %197 {offsets = [0, 0], sizes = [10, 8], strides = [1, 1]} : vector<10x32xf32> to vector<10x8xf32>
    %cst_73 = arith.constant dense<0.000000e+00> : vector<10x8xf32>
    %217 = tpu.matmul %215, %216, %cst_73 {dimension_numbers = #tpu.dot_dimension_numbers<[1], [0], [0], [1], [0, 0, 1, 1], [], []>} : vector<10x10xf32>, vector<10x8xf32>, vector<10x8xf32> -> vector<10x8xf32>
    %218 = vector.extract_strided_slice %195 {offsets = [0, 8], sizes = [10, 8], strides = [1, 1]} : vector<10x32xf32> to vector<10x8xf32>
    %219 = vector.extract_strided_slice %196 {offsets = [0, 8], sizes = [10, 8], strides = [1, 1]} : vector<10x32xf32> to vector<10x8xf32>
    %cst_74 = arith.constant dense<0.000000e+00> : vector<10x10xf32>
    %220 = tpu.matmul %218, %219, %cst_74 {dimension_numbers = #tpu.dot_dimension_numbers<[1], [1], [0], [0], [0, 0, 1, 0], [], []>} : vector<10x8xf32>, vector<10x8xf32>, vector<10x10xf32> -> vector<10x10xf32>
    %cst_75 = arith.constant 0.353553385 : f32
    %221 = vector.broadcast %cst_75 : f32 to vector<10x10xf32>
    %222 = arith.mulf %220, %221 : vector<10x10xf32>
    %223 = arith.addf %222, %0 : vector<10x10xf32>
    %cst_76 = arith.constant dense<0xFF800000> : vector<10xf32>
    %224 = vector.multi_reduction <maximumf>, %223, %cst_76 [1] : vector<10x10xf32> to vector<10xf32>
    %225 = vector.shape_cast %224 : vector<10xf32> to vector<10x1xf32>
    %226 = vector.broadcast %225 : vector<10x1xf32> to vector<10x10xf32>
    %227 = arith.subf %223, %226 : vector<10x10xf32>
    %228 = math.exp %227 : vector<10x10xf32>
    %cst_77 = arith.constant dense<0.000000e+00> : vector<10xf32>
    %229 = vector.multi_reduction <add>, %228, %cst_77 [1] : vector<10x10xf32> to vector<10xf32>
    %230 = vector.shape_cast %229 : vector<10xf32> to vector<10x1xf32>
    %231 = tpu.reciprocal %230 {approx = true} : vector<10x1xf32> -> vector<10x1xf32>
    %232 = vector.broadcast %231 : vector<10x1xf32> to vector<10x10xf32>
    %233 = arith.mulf %228, %232 : vector<10x10xf32>
    %234 = vector.extract_strided_slice %197 {offsets = [0, 8], sizes = [10, 8], strides = [1, 1]} : vector<10x32xf32> to vector<10x8xf32>
    %cst_78 = arith.constant dense<0.000000e+00> : vector<10x8xf32>
    %235 = tpu.matmul %233, %234, %cst_78 {dimension_numbers = #tpu.dot_dimension_numbers<[1], [0], [0], [1], [0, 0, 1, 1], [], []>} : vector<10x10xf32>, vector<10x8xf32>, vector<10x8xf32> -> vector<10x8xf32>
    %236 = vector.extract_strided_slice %195 {offsets = [0, 16], sizes = [10, 8], strides = [1, 1]} : vector<10x32xf32> to vector<10x8xf32>
    %237 = vector.extract_strided_slice %196 {offsets = [0, 16], sizes = [10, 8], strides = [1, 1]} : vector<10x32xf32> to vector<10x8xf32>
    %cst_79 = arith.constant dense<0.000000e+00> : vector<10x10xf32>
    %238 = tpu.matmul %236, %237, %cst_79 {dimension_numbers = #tpu.dot_dimension_numbers<[1], [1], [0], [0], [0, 0, 1, 0], [], []>} : vector<10x8xf32>, vector<10x8xf32>, vector<10x10xf32> -> vector<10x10xf32>
    %cst_80 = arith.constant 0.353553385 : f32
    %239 = vector.broadcast %cst_80 : f32 to vector<10x10xf32>
    %240 = arith.mulf %238, %239 : vector<10x10xf32>
    %241 = arith.addf %240, %0 : vector<10x10xf32>
    %cst_81 = arith.constant dense<0xFF800000> : vector<10xf32>
    %242 = vector.multi_reduction <maximumf>, %241, %cst_81 [1] : vector<10x10xf32> to vector<10xf32>
    %243 = vector.shape_cast %242 : vector<10xf32> to vector<10x1xf32>
    %244 = vector.broadcast %243 : vector<10x1xf32> to vector<10x10xf32>
    %245 = arith.subf %241, %244 : vector<10x10xf32>
    %246 = math.exp %245 : vector<10x10xf32>
    %cst_82 = arith.constant dense<0.000000e+00> : vector<10xf32>
    %247 = vector.multi_reduction <add>, %246, %cst_82 [1] : vector<10x10xf32> to vector<10xf32>
    %248 = vector.shape_cast %247 : vector<10xf32> to vector<10x1xf32>
    %249 = tpu.reciprocal %248 {approx = true} : vector<10x1xf32> -> vector<10x1xf32>
    %250 = vector.broadcast %249 : vector<10x1xf32> to vector<10x10xf32>
    %251 = arith.mulf %246, %250 : vector<10x10xf32>
    %252 = vector.extract_strided_slice %197 {offsets = [0, 16], sizes = [10, 8], strides = [1, 1]} : vector<10x32xf32> to vector<10x8xf32>
    %cst_83 = arith.constant dense<0.000000e+00> : vector<10x8xf32>
    %253 = tpu.matmul %251, %252, %cst_83 {dimension_numbers = #tpu.dot_dimension_numbers<[1], [0], [0], [1], [0, 0, 1, 1], [], []>} : vector<10x10xf32>, vector<10x8xf32>, vector<10x8xf32> -> vector<10x8xf32>
    %254 = vector.extract_strided_slice %195 {offsets = [0, 24], sizes = [10, 8], strides = [1, 1]} : vector<10x32xf32> to vector<10x8xf32>
    %255 = vector.extract_strided_slice %196 {offsets = [0, 24], sizes = [10, 8], strides = [1, 1]} : vector<10x32xf32> to vector<10x8xf32>
    %cst_84 = arith.constant dense<0.000000e+00> : vector<10x10xf32>
    %256 = tpu.matmul %254, %255, %cst_84 {dimension_numbers = #tpu.dot_dimension_numbers<[1], [1], [0], [0], [0, 0, 1, 0], [], []>} : vector<10x8xf32>, vector<10x8xf32>, vector<10x10xf32> -> vector<10x10xf32>
    %cst_85 = arith.constant 0.353553385 : f32
    %257 = vector.broadcast %cst_85 : f32 to vector<10x10xf32>
    %258 = arith.mulf %256, %257 : vector<10x10xf32>
    %259 = arith.addf %258, %0 : vector<10x10xf32>
    %cst_86 = arith.constant dense<0xFF800000> : vector<10xf32>
    %260 = vector.multi_reduction <maximumf>, %259, %cst_86 [1] : vector<10x10xf32> to vector<10xf32>
    %261 = vector.shape_cast %260 : vector<10xf32> to vector<10x1xf32>
    %262 = vector.broadcast %261 : vector<10x1xf32> to vector<10x10xf32>
    %263 = arith.subf %259, %262 : vector<10x10xf32>
    %264 = math.exp %263 : vector<10x10xf32>
    %cst_87 = arith.constant dense<0.000000e+00> : vector<10xf32>
    %265 = vector.multi_reduction <add>, %264, %cst_87 [1] : vector<10x10xf32> to vector<10xf32>
    %266 = vector.shape_cast %265 : vector<10xf32> to vector<10x1xf32>
    %267 = tpu.reciprocal %266 {approx = true} : vector<10x1xf32> -> vector<10x1xf32>
    %268 = vector.broadcast %267 : vector<10x1xf32> to vector<10x10xf32>
    %269 = arith.mulf %264, %268 : vector<10x10xf32>
    %270 = vector.extract_strided_slice %197 {offsets = [0, 24], sizes = [10, 8], strides = [1, 1]} : vector<10x32xf32> to vector<10x8xf32>
    %cst_88 = arith.constant dense<0.000000e+00> : vector<10x8xf32>
    %271 = tpu.matmul %269, %270, %cst_88 {dimension_numbers = #tpu.dot_dimension_numbers<[1], [0], [0], [1], [0, 0, 1, 1], [], []>} : vector<10x10xf32>, vector<10x8xf32>, vector<10x8xf32> -> vector<10x8xf32>
    %272 = tpu.concatenate %217, %235, %253, %271 in 1 : vector<10x8xf32>, vector<10x8xf32>, vector<10x8xf32>, vector<10x8xf32> -> vector<10x32xf32>
    %cst_89 = arith.constant dense<0.000000e+00> : vector<10x32xf32>
    %273 = tpu.matmul %272, %198, %cst_89 {dimension_numbers = #tpu.dot_dimension_numbers<[1], [0], [0], [1], [0, 0, 1, 1], [], []>} : vector<10x32xf32>, vector<32x32xf32>, vector<10x32xf32> -> vector<10x32xf32>
    %274 = vector.broadcast %199 : vector<1x32xf32> to vector<10x32xf32>
    %275 = arith.addf %273, %274 : vector<10x32xf32>
    %276 = arith.addf %165, %275 : vector<10x32xf32>
    %cst_90 = arith.constant dense<0.000000e+00> : vector<10xf32>
    %277 = vector.multi_reduction <add>, %276, %cst_90 [1] : vector<10x32xf32> to vector<10xf32>
    %278 = vector.shape_cast %277 : vector<10xf32> to vector<10x1xf32>
    %cst_91 = arith.constant 3.200000e+01 : f32
    %279 = vector.broadcast %cst_91 : f32 to vector<10x1xf32>
    %280 = arith.divf %278, %279 : vector<10x1xf32>
    %281 = vector.broadcast %280 : vector<10x1xf32> to vector<10x32xf32>
    %282 = arith.subf %276, %281 : vector<10x32xf32>
    %283 = arith.mulf %282, %282 : vector<10x32xf32>
    %cst_92 = arith.constant dense<0.000000e+00> : vector<10xf32>
    %284 = vector.multi_reduction <add>, %283, %cst_92 [1] : vector<10x32xf32> to vector<10xf32>
    %285 = vector.shape_cast %284 : vector<10xf32> to vector<10x1xf32>
    %cst_93 = arith.constant 3.200000e+01 : f32
    %286 = vector.broadcast %cst_93 : f32 to vector<10x1xf32>
    %287 = arith.divf %285, %286 : vector<10x1xf32>
    %288 = vector.broadcast %280 : vector<10x1xf32> to vector<10x32xf32>
    %289 = arith.subf %276, %288 : vector<10x32xf32>
    %cst_94 = arith.constant 9.99999996E-13 : f32
    %290 = vector.broadcast %cst_94 : f32 to vector<10x1xf32>
    %291 = arith.addf %287, %290 : vector<10x1xf32>
    %292 = math.rsqrt %291 : vector<10x1xf32>
    %293 = vector.broadcast %292 : vector<10x1xf32> to vector<10x32xf32>
    %294 = arith.mulf %289, %293 : vector<10x32xf32>
    %c12 = arith.constant 12 : index
    %c0_95 = arith.constant 0 : index
    %295 = vector.load %arg4[%c12, %c0_95] : memref<48x128xf32, #tpu.memory_space<vmem>>, vector<1x32xf32>
    %296 = vector.broadcast %295 : vector<1x32xf32> to vector<10x32xf32>
    %297 = arith.mulf %294, %296 : vector<10x32xf32>
    %c13 = arith.constant 13 : index
    %c0_96 = arith.constant 0 : index
    %298 = vector.load %arg4[%c13, %c0_96] : memref<48x128xf32, #tpu.memory_space<vmem>>, vector<1x32xf32>
    %299 = vector.broadcast %298 : vector<1x32xf32> to vector<10x32xf32>
    %300 = arith.addf %297, %299 : vector<10x32xf32>
    %c456 = arith.constant 456 : index
    %c0_97 = arith.constant 0 : index
    %301 = vector.load %arg3[%c456, %c0_97] : memref<1064x128xf32, #tpu.memory_space<vmem>>, vector<32x64xf32>
    %cst_98 = arith.constant dense<0.000000e+00> : vector<10x64xf32>
    %302 = tpu.matmul %300, %301, %cst_98 {dimension_numbers = #tpu.dot_dimension_numbers<[1], [0], [0], [1], [0, 0, 1, 1], [], []>} : vector<10x32xf32>, vector<32x64xf32>, vector<10x64xf32> -> vector<10x64xf32>
    %c14 = arith.constant 14 : index
    %c0_99 = arith.constant 0 : index
    %303 = vector.load %arg4[%c14, %c0_99] : memref<48x128xf32, #tpu.memory_space<vmem>>, vector<1x64xf32>
    %304 = vector.broadcast %303 : vector<1x64xf32> to vector<10x64xf32>
    %305 = arith.addf %302, %304 : vector<10x64xf32>
    %306 = arith.mulf %305, %305 : vector<10x64xf32>
    %307 = arith.mulf %305, %306 : vector<10x64xf32>
    %cst_100 = arith.constant 4.471500e-02 : f32
    %308 = vector.broadcast %cst_100 : f32 to vector<10x64xf32>
    %309 = arith.mulf %308, %307 : vector<10x64xf32>
    %310 = arith.addf %305, %309 : vector<10x64xf32>
    %cst_101 = arith.constant 0.797884583 : f32
    %311 = vector.broadcast %cst_101 : f32 to vector<10x64xf32>
    %312 = arith.mulf %311, %310 : vector<10x64xf32>
    %313 = math.tanh %312 : vector<10x64xf32>
    %cst_102 = arith.constant 1.000000e+00 : f32
    %314 = vector.broadcast %cst_102 : f32 to vector<10x64xf32>
    %315 = arith.addf %314, %313 : vector<10x64xf32>
    %cst_103 = arith.constant 5.000000e-01 : f32
    %316 = vector.broadcast %cst_103 : f32 to vector<10x64xf32>
    %317 = arith.mulf %316, %315 : vector<10x64xf32>
    %318 = arith.mulf %305, %317 : vector<10x64xf32>
    %c488 = arith.constant 488 : index
    %c0_104 = arith.constant 0 : index
    %319 = vector.load %arg3[%c488, %c0_104] : memref<1064x128xf32, #tpu.memory_space<vmem>>, vector<64x32xf32>
    %cst_105 = arith.constant dense<0.000000e+00> : vector<10x32xf32>
    %320 = tpu.matmul %318, %319, %cst_105 {dimension_numbers = #tpu.dot_dimension_numbers<[1], [0], [0], [1], [0, 0, 1, 1], [], []>} : vector<10x64xf32>, vector<64x32xf32>, vector<10x32xf32> -> vector<10x32xf32>
    %c15 = arith.constant 15 : index
    %c0_106 = arith.constant 0 : index
    %321 = vector.load %arg4[%c15, %c0_106] : memref<48x128xf32, #tpu.memory_space<vmem>>, vector<1x32xf32>
    %322 = vector.broadcast %321 : vector<1x32xf32> to vector<10x32xf32>
    %323 = arith.addf %320, %322 : vector<10x32xf32>
    %324 = arith.addf %276, %323 : vector<10x32xf32>
    %cst_107 = arith.constant dense<0.000000e+00> : vector<10xf32>
    %325 = vector.multi_reduction <add>, %324, %cst_107 [1] : vector<10x32xf32> to vector<10xf32>
    %326 = vector.shape_cast %325 : vector<10xf32> to vector<10x1xf32>
    %cst_108 = arith.constant 3.200000e+01 : f32
    %327 = vector.broadcast %cst_108 : f32 to vector<10x1xf32>
    %328 = arith.divf %326, %327 : vector<10x1xf32>
    %329 = vector.broadcast %328 : vector<10x1xf32> to vector<10x32xf32>
    %330 = arith.subf %324, %329 : vector<10x32xf32>
    %331 = arith.mulf %330, %330 : vector<10x32xf32>
    %cst_109 = arith.constant dense<0.000000e+00> : vector<10xf32>
    %332 = vector.multi_reduction <add>, %331, %cst_109 [1] : vector<10x32xf32> to vector<10xf32>
    %333 = vector.shape_cast %332 : vector<10xf32> to vector<10x1xf32>
    %cst_110 = arith.constant 3.200000e+01 : f32
    %334 = vector.broadcast %cst_110 : f32 to vector<10x1xf32>
    %335 = arith.divf %333, %334 : vector<10x1xf32>
    %336 = vector.broadcast %328 : vector<10x1xf32> to vector<10x32xf32>
    %337 = arith.subf %324, %336 : vector<10x32xf32>
    %cst_111 = arith.constant 9.99999996E-13 : f32
    %338 = vector.broadcast %cst_111 : f32 to vector<10x1xf32>
    %339 = arith.addf %335, %338 : vector<10x1xf32>
    %340 = math.rsqrt %339 : vector<10x1xf32>
    %341 = vector.broadcast %340 : vector<10x1xf32> to vector<10x32xf32>
    %342 = arith.mulf %337, %341 : vector<10x32xf32>
    %c16 = arith.constant 16 : index
    %c0_112 = arith.constant 0 : index
    %343 = vector.load %arg4[%c16, %c0_112] : memref<48x128xf32, #tpu.memory_space<vmem>>, vector<1x32xf32>
    %344 = vector.broadcast %343 : vector<1x32xf32> to vector<10x32xf32>
    %345 = arith.mulf %342, %344 : vector<10x32xf32>
    %c17 = arith.constant 17 : index
    %c0_113 = arith.constant 0 : index
    %346 = vector.load %arg4[%c17, %c0_113] : memref<48x128xf32, #tpu.memory_space<vmem>>, vector<1x32xf32>
    %347 = vector.broadcast %346 : vector<1x32xf32> to vector<10x32xf32>
    %348 = arith.addf %345, %347 : vector<10x32xf32>
    %349 = vector.extract_strided_slice %348 {offsets = [0, 0], sizes = [2, 32], strides = [1, 1]} : vector<10x32xf32> to vector<2x32xf32>
    %c552 = arith.constant 552 : index
    %c0_114 = arith.constant 0 : index
    %350 = vector.load %arg3[%c552, %c0_114] : memref<1064x128xf32, #tpu.memory_space<vmem>>, vector<32x32xf32>
    %cst_115 = arith.constant dense<0.000000e+00> : vector<2x32xf32>
    %351 = tpu.matmul %349, %350, %cst_115 {dimension_numbers = #tpu.dot_dimension_numbers<[1], [0], [0], [1], [0, 0, 1, 1], [], []>} : vector<2x32xf32>, vector<32x32xf32>, vector<2x32xf32> -> vector<2x32xf32>
    %c18 = arith.constant 18 : index
    %c0_116 = arith.constant 0 : index
    %352 = vector.load %arg4[%c18, %c0_116] : memref<48x128xf32, #tpu.memory_space<vmem>>, vector<1x32xf32>
    %353 = vector.broadcast %352 : vector<1x32xf32> to vector<2x32xf32>
    %354 = arith.addf %351, %353 : vector<2x32xf32>
    %355 = math.tanh %354 : vector<2x32xf32>
    %c0_117 = arith.constant 0 : index
    %c0_118 = arith.constant 0 : index
    %356 = vector.load %arg2[%c0_117, %c0_118] : memref<16x32xf32, #tpu.memory_space<vmem>>, vector<16x32xf32>
    %c584 = arith.constant 584 : index
    %c0_119 = arith.constant 0 : index
    %357 = vector.load %arg3[%c584, %c0_119] : memref<1064x128xf32, #tpu.memory_space<vmem>>, vector<32x32xf32>
    %cst_120 = arith.constant dense<0.000000e+00> : vector<2x32xf32>
    %358 = tpu.matmul %355, %357, %cst_120 {dimension_numbers = #tpu.dot_dimension_numbers<[1], [0], [0], [1], [0, 0, 1, 1], [], []>} : vector<2x32xf32>, vector<32x32xf32>, vector<2x32xf32> -> vector<2x32xf32>
    %c19 = arith.constant 19 : index
    %c0_121 = arith.constant 0 : index
    %359 = vector.load %arg4[%c19, %c0_121] : memref<48x128xf32, #tpu.memory_space<vmem>>, vector<1x32xf32>
    %360 = vector.broadcast %359 : vector<1x32xf32> to vector<2x32xf32>
    %361 = arith.addf %358, %360 : vector<2x32xf32>
    %362 = arith.addf %355, %361 : vector<2x32xf32>
    %cst_122 = arith.constant dense<0.000000e+00> : vector<2xf32>
    %363 = vector.multi_reduction <add>, %362, %cst_122 [1] : vector<2x32xf32> to vector<2xf32>
    %364 = vector.shape_cast %363 : vector<2xf32> to vector<2x1xf32>
    %cst_123 = arith.constant 3.200000e+01 : f32
    %365 = vector.broadcast %cst_123 : f32 to vector<2x1xf32>
    %366 = arith.divf %364, %365 : vector<2x1xf32>
    %367 = vector.broadcast %366 : vector<2x1xf32> to vector<2x32xf32>
    %368 = arith.subf %362, %367 : vector<2x32xf32>
    %369 = arith.mulf %368, %368 : vector<2x32xf32>
    %cst_124 = arith.constant dense<0.000000e+00> : vector<2xf32>
    %370 = vector.multi_reduction <add>, %369, %cst_124 [1] : vector<2x32xf32> to vector<2xf32>
    %371 = vector.shape_cast %370 : vector<2xf32> to vector<2x1xf32>
    %cst_125 = arith.constant 3.200000e+01 : f32
    %372 = vector.broadcast %cst_125 : f32 to vector<2x1xf32>
    %373 = arith.divf %371, %372 : vector<2x1xf32>
    %374 = vector.broadcast %366 : vector<2x1xf32> to vector<2x32xf32>
    %375 = arith.subf %362, %374 : vector<2x32xf32>
    %cst_126 = arith.constant 9.99999974E-6 : f32
    %376 = vector.broadcast %cst_126 : f32 to vector<2x1xf32>
    %377 = arith.addf %373, %376 : vector<2x1xf32>
    %378 = math.rsqrt %377 : vector<2x1xf32>
    %379 = vector.broadcast %378 : vector<2x1xf32> to vector<2x32xf32>
    %380 = arith.mulf %375, %379 : vector<2x32xf32>
    %c23 = arith.constant 23 : index
    %c0_127 = arith.constant 0 : index
    %381 = vector.load %arg4[%c23, %c0_127] : memref<48x128xf32, #tpu.memory_space<vmem>>, vector<1x32xf32>
    %382 = vector.broadcast %381 : vector<1x32xf32> to vector<2x32xf32>
    %383 = arith.mulf %380, %382 : vector<2x32xf32>
    %c24 = arith.constant 24 : index
    %c0_128 = arith.constant 0 : index
    %384 = vector.load %arg4[%c24, %c0_128] : memref<48x128xf32, #tpu.memory_space<vmem>>, vector<1x32xf32>
    %385 = vector.broadcast %384 : vector<1x32xf32> to vector<2x32xf32>
    %386 = arith.addf %383, %385 : vector<2x32xf32>
    %c616 = arith.constant 616 : index
    %c0_129 = arith.constant 0 : index
    %387 = vector.load %arg3[%c616, %c0_129] : memref<1064x128xf32, #tpu.memory_space<vmem>>, vector<32x32xf32>
    %cst_130 = arith.constant dense<0.000000e+00> : vector<2x32xf32>
    %388 = tpu.matmul %386, %387, %cst_130 {dimension_numbers = #tpu.dot_dimension_numbers<[1], [0], [0], [1], [0, 0, 1, 1], [], []>} : vector<2x32xf32>, vector<32x32xf32>, vector<2x32xf32> -> vector<2x32xf32>
    %c20 = arith.constant 20 : index
    %c0_131 = arith.constant 0 : index
    %389 = vector.load %arg4[%c20, %c0_131] : memref<48x128xf32, #tpu.memory_space<vmem>>, vector<1x32xf32>
    %390 = vector.broadcast %389 : vector<1x32xf32> to vector<2x32xf32>
    %391 = arith.addf %388, %390 : vector<2x32xf32>
    %c648 = arith.constant 648 : index
    %c0_132 = arith.constant 0 : index
    %392 = vector.load %arg3[%c648, %c0_132] : memref<1064x128xf32, #tpu.memory_space<vmem>>, vector<32x64xf32>
    %cst_133 = arith.constant dense<0.000000e+00> : vector<16x64xf32>
    %393 = tpu.matmul %356, %392, %cst_133 {dimension_numbers = #tpu.dot_dimension_numbers<[1], [0], [0], [1], [0, 0, 1, 1], [], []>} : vector<16x32xf32>, vector<32x64xf32>, vector<16x64xf32> -> vector<16x64xf32>
    %c21 = arith.constant 21 : index
    %c0_134 = arith.constant 0 : index
    %394 = vector.load %arg4[%c21, %c0_134] : memref<48x128xf32, #tpu.memory_space<vmem>>, vector<1x64xf32>
    %395 = vector.broadcast %394 : vector<1x64xf32> to vector<16x64xf32>
    %396 = arith.addf %393, %395 : vector<16x64xf32>
    %397 = vector.extract_strided_slice %396 {offsets = [0, 0], sizes = [16, 32], strides = [1, 1]} : vector<16x64xf32> to vector<16x32xf32>
    %398 = vector.extract_strided_slice %396 {offsets = [0, 32], sizes = [16, 32], strides = [1, 1]} : vector<16x64xf32> to vector<16x32xf32>
    %c680 = arith.constant 680 : index
    %c0_135 = arith.constant 0 : index
    %399 = vector.load %arg3[%c680, %c0_135] : memref<1064x128xf32, #tpu.memory_space<vmem>>, vector<32x32xf32>
    %c22 = arith.constant 22 : index
    %c0_136 = arith.constant 0 : index
    %400 = vector.load %arg4[%c22, %c0_136] : memref<48x128xf32, #tpu.memory_space<vmem>>, vector<1x32xf32>
    %401 = vector.extract_strided_slice %391 {offsets = [0, 0], sizes = [2, 8], strides = [1, 1]} : vector<2x32xf32> to vector<2x8xf32>
    %402 = vector.extract_strided_slice %397 {offsets = [0, 0], sizes = [16, 8], strides = [1, 1]} : vector<16x32xf32> to vector<16x8xf32>
    %cst_137 = arith.constant dense<0.000000e+00> : vector<2x16xf32>
    %403 = tpu.matmul %401, %402, %cst_137 {dimension_numbers = #tpu.dot_dimension_numbers<[1], [1], [0], [0], [0, 0, 1, 0], [], []>} : vector<2x8xf32>, vector<16x8xf32>, vector<2x16xf32> -> vector<2x16xf32>
    %cst_138 = arith.constant 0.353553385 : f32
    %404 = vector.broadcast %cst_138 : f32 to vector<2x16xf32>
    %405 = arith.mulf %403, %404 : vector<2x16xf32>
    %406 = arith.addf %405, %1 : vector<2x16xf32>
    %cst_139 = arith.constant dense<0xFF800000> : vector<2xf32>
    %407 = vector.multi_reduction <maximumf>, %406, %cst_139 [1] : vector<2x16xf32> to vector<2xf32>
    %408 = vector.shape_cast %407 : vector<2xf32> to vector<2x1xf32>
    %409 = vector.broadcast %408 : vector<2x1xf32> to vector<2x16xf32>
    %410 = arith.subf %406, %409 : vector<2x16xf32>
    %411 = math.exp %410 : vector<2x16xf32>
    %cst_140 = arith.constant dense<0.000000e+00> : vector<2xf32>
    %412 = vector.multi_reduction <add>, %411, %cst_140 [1] : vector<2x16xf32> to vector<2xf32>
    %413 = vector.shape_cast %412 : vector<2xf32> to vector<2x1xf32>
    %414 = tpu.reciprocal %413 {approx = true} : vector<2x1xf32> -> vector<2x1xf32>
    %415 = vector.broadcast %414 : vector<2x1xf32> to vector<2x16xf32>
    %416 = arith.mulf %411, %415 : vector<2x16xf32>
    %417 = vector.extract_strided_slice %398 {offsets = [0, 0], sizes = [16, 8], strides = [1, 1]} : vector<16x32xf32> to vector<16x8xf32>
    %cst_141 = arith.constant dense<0.000000e+00> : vector<2x8xf32>
    %418 = tpu.matmul %416, %417, %cst_141 {dimension_numbers = #tpu.dot_dimension_numbers<[1], [0], [0], [1], [0, 0, 1, 1], [], []>} : vector<2x16xf32>, vector<16x8xf32>, vector<2x8xf32> -> vector<2x8xf32>
    %419 = vector.extract_strided_slice %391 {offsets = [0, 8], sizes = [2, 8], strides = [1, 1]} : vector<2x32xf32> to vector<2x8xf32>
    %420 = vector.extract_strided_slice %397 {offsets = [0, 8], sizes = [16, 8], strides = [1, 1]} : vector<16x32xf32> to vector<16x8xf32>
    %cst_142 = arith.constant dense<0.000000e+00> : vector<2x16xf32>
    %421 = tpu.matmul %419, %420, %cst_142 {dimension_numbers = #tpu.dot_dimension_numbers<[1], [1], [0], [0], [0, 0, 1, 0], [], []>} : vector<2x8xf32>, vector<16x8xf32>, vector<2x16xf32> -> vector<2x16xf32>
    %cst_143 = arith.constant 0.353553385 : f32
    %422 = vector.broadcast %cst_143 : f32 to vector<2x16xf32>
    %423 = arith.mulf %421, %422 : vector<2x16xf32>
    %424 = arith.addf %423, %1 : vector<2x16xf32>
    %cst_144 = arith.constant dense<0xFF800000> : vector<2xf32>
    %425 = vector.multi_reduction <maximumf>, %424, %cst_144 [1] : vector<2x16xf32> to vector<2xf32>
    %426 = vector.shape_cast %425 : vector<2xf32> to vector<2x1xf32>
    %427 = vector.broadcast %426 : vector<2x1xf32> to vector<2x16xf32>
    %428 = arith.subf %424, %427 : vector<2x16xf32>
    %429 = math.exp %428 : vector<2x16xf32>
    %cst_145 = arith.constant dense<0.000000e+00> : vector<2xf32>
    %430 = vector.multi_reduction <add>, %429, %cst_145 [1] : vector<2x16xf32> to vector<2xf32>
    %431 = vector.shape_cast %430 : vector<2xf32> to vector<2x1xf32>
    %432 = tpu.reciprocal %431 {approx = true} : vector<2x1xf32> -> vector<2x1xf32>
    %433 = vector.broadcast %432 : vector<2x1xf32> to vector<2x16xf32>
    %434 = arith.mulf %429, %433 : vector<2x16xf32>
    %435 = vector.extract_strided_slice %398 {offsets = [0, 8], sizes = [16, 8], strides = [1, 1]} : vector<16x32xf32> to vector<16x8xf32>
    %cst_146 = arith.constant dense<0.000000e+00> : vector<2x8xf32>
    %436 = tpu.matmul %434, %435, %cst_146 {dimension_numbers = #tpu.dot_dimension_numbers<[1], [0], [0], [1], [0, 0, 1, 1], [], []>} : vector<2x16xf32>, vector<16x8xf32>, vector<2x8xf32> -> vector<2x8xf32>
    %437 = vector.extract_strided_slice %391 {offsets = [0, 16], sizes = [2, 8], strides = [1, 1]} : vector<2x32xf32> to vector<2x8xf32>
    %438 = vector.extract_strided_slice %397 {offsets = [0, 16], sizes = [16, 8], strides = [1, 1]} : vector<16x32xf32> to vector<16x8xf32>
    %cst_147 = arith.constant dense<0.000000e+00> : vector<2x16xf32>
    %439 = tpu.matmul %437, %438, %cst_147 {dimension_numbers = #tpu.dot_dimension_numbers<[1], [1], [0], [0], [0, 0, 1, 0], [], []>} : vector<2x8xf32>, vector<16x8xf32>, vector<2x16xf32> -> vector<2x16xf32>
    %cst_148 = arith.constant 0.353553385 : f32
    %440 = vector.broadcast %cst_148 : f32 to vector<2x16xf32>
    %441 = arith.mulf %439, %440 : vector<2x16xf32>
    %442 = arith.addf %441, %1 : vector<2x16xf32>
    %cst_149 = arith.constant dense<0xFF800000> : vector<2xf32>
    %443 = vector.multi_reduction <maximumf>, %442, %cst_149 [1] : vector<2x16xf32> to vector<2xf32>
    %444 = vector.shape_cast %443 : vector<2xf32> to vector<2x1xf32>
    %445 = vector.broadcast %444 : vector<2x1xf32> to vector<2x16xf32>
    %446 = arith.subf %442, %445 : vector<2x16xf32>
    %447 = math.exp %446 : vector<2x16xf32>
    %cst_150 = arith.constant dense<0.000000e+00> : vector<2xf32>
    %448 = vector.multi_reduction <add>, %447, %cst_150 [1] : vector<2x16xf32> to vector<2xf32>
    %449 = vector.shape_cast %448 : vector<2xf32> to vector<2x1xf32>
    %450 = tpu.reciprocal %449 {approx = true} : vector<2x1xf32> -> vector<2x1xf32>
    %451 = vector.broadcast %450 : vector<2x1xf32> to vector<2x16xf32>
    %452 = arith.mulf %447, %451 : vector<2x16xf32>
    %453 = vector.extract_strided_slice %398 {offsets = [0, 16], sizes = [16, 8], strides = [1, 1]} : vector<16x32xf32> to vector<16x8xf32>
    %cst_151 = arith.constant dense<0.000000e+00> : vector<2x8xf32>
    %454 = tpu.matmul %452, %453, %cst_151 {dimension_numbers = #tpu.dot_dimension_numbers<[1], [0], [0], [1], [0, 0, 1, 1], [], []>} : vector<2x16xf32>, vector<16x8xf32>, vector<2x8xf32> -> vector<2x8xf32>
    %455 = vector.extract_strided_slice %391 {offsets = [0, 24], sizes = [2, 8], strides = [1, 1]} : vector<2x32xf32> to vector<2x8xf32>
    %456 = vector.extract_strided_slice %397 {offsets = [0, 24], sizes = [16, 8], strides = [1, 1]} : vector<16x32xf32> to vector<16x8xf32>
    %cst_152 = arith.constant dense<0.000000e+00> : vector<2x16xf32>
    %457 = tpu.matmul %455, %456, %cst_152 {dimension_numbers = #tpu.dot_dimension_numbers<[1], [1], [0], [0], [0, 0, 1, 0], [], []>} : vector<2x8xf32>, vector<16x8xf32>, vector<2x16xf32> -> vector<2x16xf32>
    %cst_153 = arith.constant 0.353553385 : f32
    %458 = vector.broadcast %cst_153 : f32 to vector<2x16xf32>
    %459 = arith.mulf %457, %458 : vector<2x16xf32>
    %460 = arith.addf %459, %1 : vector<2x16xf32>
    %cst_154 = arith.constant dense<0xFF800000> : vector<2xf32>
    %461 = vector.multi_reduction <maximumf>, %460, %cst_154 [1] : vector<2x16xf32> to vector<2xf32>
    %462 = vector.shape_cast %461 : vector<2xf32> to vector<2x1xf32>
    %463 = vector.broadcast %462 : vector<2x1xf32> to vector<2x16xf32>
    %464 = arith.subf %460, %463 : vector<2x16xf32>
    %465 = math.exp %464 : vector<2x16xf32>
    %cst_155 = arith.constant dense<0.000000e+00> : vector<2xf32>
    %466 = vector.multi_reduction <add>, %465, %cst_155 [1] : vector<2x16xf32> to vector<2xf32>
    %467 = vector.shape_cast %466 : vector<2xf32> to vector<2x1xf32>
    %468 = tpu.reciprocal %467 {approx = true} : vector<2x1xf32> -> vector<2x1xf32>
    %469 = vector.broadcast %468 : vector<2x1xf32> to vector<2x16xf32>
    %470 = arith.mulf %465, %469 : vector<2x16xf32>
    %471 = vector.extract_strided_slice %398 {offsets = [0, 24], sizes = [16, 8], strides = [1, 1]} : vector<16x32xf32> to vector<16x8xf32>
    %cst_156 = arith.constant dense<0.000000e+00> : vector<2x8xf32>
    %472 = tpu.matmul %470, %471, %cst_156 {dimension_numbers = #tpu.dot_dimension_numbers<[1], [0], [0], [1], [0, 0, 1, 1], [], []>} : vector<2x16xf32>, vector<16x8xf32>, vector<2x8xf32> -> vector<2x8xf32>
    %473 = tpu.concatenate %418, %436, %454, %472 in 1 : vector<2x8xf32>, vector<2x8xf32>, vector<2x8xf32>, vector<2x8xf32> -> vector<2x32xf32>
    %cst_157 = arith.constant dense<0.000000e+00> : vector<2x32xf32>
    %474 = tpu.matmul %473, %399, %cst_157 {dimension_numbers = #tpu.dot_dimension_numbers<[1], [0], [0], [1], [0, 0, 1, 1], [], []>} : vector<2x32xf32>, vector<32x32xf32>, vector<2x32xf32> -> vector<2x32xf32>
    %475 = vector.broadcast %400 : vector<1x32xf32> to vector<2x32xf32>
    %476 = arith.addf %474, %475 : vector<2x32xf32>
    %477 = arith.addf %386, %476 : vector<2x32xf32>
    %cst_158 = arith.constant dense<0.000000e+00> : vector<2xf32>
    %478 = vector.multi_reduction <add>, %477, %cst_158 [1] : vector<2x32xf32> to vector<2xf32>
    %479 = vector.shape_cast %478 : vector<2xf32> to vector<2x1xf32>
    %cst_159 = arith.constant 3.200000e+01 : f32
    %480 = vector.broadcast %cst_159 : f32 to vector<2x1xf32>
    %481 = arith.divf %479, %480 : vector<2x1xf32>
    %482 = vector.broadcast %481 : vector<2x1xf32> to vector<2x32xf32>
    %483 = arith.subf %477, %482 : vector<2x32xf32>
    %484 = arith.mulf %483, %483 : vector<2x32xf32>
    %cst_160 = arith.constant dense<0.000000e+00> : vector<2xf32>
    %485 = vector.multi_reduction <add>, %484, %cst_160 [1] : vector<2x32xf32> to vector<2xf32>
    %486 = vector.shape_cast %485 : vector<2xf32> to vector<2x1xf32>
    %cst_161 = arith.constant 3.200000e+01 : f32
    %487 = vector.broadcast %cst_161 : f32 to vector<2x1xf32>
    %488 = arith.divf %486, %487 : vector<2x1xf32>
    %489 = vector.broadcast %481 : vector<2x1xf32> to vector<2x32xf32>
    %490 = arith.subf %477, %489 : vector<2x32xf32>
    %cst_162 = arith.constant 9.99999974E-6 : f32
    %491 = vector.broadcast %cst_162 : f32 to vector<2x1xf32>
    %492 = arith.addf %488, %491 : vector<2x1xf32>
    %493 = math.rsqrt %492 : vector<2x1xf32>
    %494 = vector.broadcast %493 : vector<2x1xf32> to vector<2x32xf32>
    %495 = arith.mulf %490, %494 : vector<2x32xf32>
    %c25 = arith.constant 25 : index
    %c0_163 = arith.constant 0 : index
    %496 = vector.load %arg4[%c25, %c0_163] : memref<48x128xf32, #tpu.memory_space<vmem>>, vector<1x32xf32>
    %497 = vector.broadcast %496 : vector<1x32xf32> to vector<2x32xf32>
    %498 = arith.mulf %495, %497 : vector<2x32xf32>
    %c26 = arith.constant 26 : index
    %c0_164 = arith.constant 0 : index
    %499 = vector.load %arg4[%c26, %c0_164] : memref<48x128xf32, #tpu.memory_space<vmem>>, vector<1x32xf32>
    %500 = vector.broadcast %499 : vector<1x32xf32> to vector<2x32xf32>
    %501 = arith.addf %498, %500 : vector<2x32xf32>
    %c712 = arith.constant 712 : index
    %c0_165 = arith.constant 0 : index
    %502 = vector.load %arg3[%c712, %c0_165] : memref<1064x128xf32, #tpu.memory_space<vmem>>, vector<32x64xf32>
    %cst_166 = arith.constant dense<0.000000e+00> : vector<2x64xf32>
    %503 = tpu.matmul %501, %502, %cst_166 {dimension_numbers = #tpu.dot_dimension_numbers<[1], [0], [0], [1], [0, 0, 1, 1], [], []>} : vector<2x32xf32>, vector<32x64xf32>, vector<2x64xf32> -> vector<2x64xf32>
    %c29 = arith.constant 29 : index
    %c0_167 = arith.constant 0 : index
    %504 = vector.load %arg4[%c29, %c0_167] : memref<48x128xf32, #tpu.memory_space<vmem>>, vector<1x64xf32>
    %505 = vector.broadcast %504 : vector<1x64xf32> to vector<2x64xf32>
    %506 = arith.addf %503, %505 : vector<2x64xf32>
    %cst_168 = arith.constant 0.000000e+00 : f32
    %507 = vector.broadcast %cst_168 : f32 to vector<2x64xf32>
    %508 = arith.maximumf %506, %507 : vector<2x64xf32>
    %c744 = arith.constant 744 : index
    %c0_169 = arith.constant 0 : index
    %509 = vector.load %arg3[%c744, %c0_169] : memref<1064x128xf32, #tpu.memory_space<vmem>>, vector<64x32xf32>
    %cst_170 = arith.constant dense<0.000000e+00> : vector<2x32xf32>
    %510 = tpu.matmul %508, %509, %cst_170 {dimension_numbers = #tpu.dot_dimension_numbers<[1], [0], [0], [1], [0, 0, 1, 1], [], []>} : vector<2x64xf32>, vector<64x32xf32>, vector<2x32xf32> -> vector<2x32xf32>
    %c30 = arith.constant 30 : index
    %c0_171 = arith.constant 0 : index
    %511 = vector.load %arg4[%c30, %c0_171] : memref<48x128xf32, #tpu.memory_space<vmem>>, vector<1x32xf32>
    %512 = vector.broadcast %511 : vector<1x32xf32> to vector<2x32xf32>
    %513 = arith.addf %510, %512 : vector<2x32xf32>
    %514 = arith.addf %501, %513 : vector<2x32xf32>
    %cst_172 = arith.constant dense<0.000000e+00> : vector<2xf32>
    %515 = vector.multi_reduction <add>, %514, %cst_172 [1] : vector<2x32xf32> to vector<2xf32>
    %516 = vector.shape_cast %515 : vector<2xf32> to vector<2x1xf32>
    %cst_173 = arith.constant 3.200000e+01 : f32
    %517 = vector.broadcast %cst_173 : f32 to vector<2x1xf32>
    %518 = arith.divf %516, %517 : vector<2x1xf32>
    %519 = vector.broadcast %518 : vector<2x1xf32> to vector<2x32xf32>
    %520 = arith.subf %514, %519 : vector<2x32xf32>
    %521 = arith.mulf %520, %520 : vector<2x32xf32>
    %cst_174 = arith.constant dense<0.000000e+00> : vector<2xf32>
    %522 = vector.multi_reduction <add>, %521, %cst_174 [1] : vector<2x32xf32> to vector<2xf32>
    %523 = vector.shape_cast %522 : vector<2xf32> to vector<2x1xf32>
    %cst_175 = arith.constant 3.200000e+01 : f32
    %524 = vector.broadcast %cst_175 : f32 to vector<2x1xf32>
    %525 = arith.divf %523, %524 : vector<2x1xf32>
    %526 = vector.broadcast %518 : vector<2x1xf32> to vector<2x32xf32>
    %527 = arith.subf %514, %526 : vector<2x32xf32>
    %cst_176 = arith.constant 9.99999974E-6 : f32
    %528 = vector.broadcast %cst_176 : f32 to vector<2x1xf32>
    %529 = arith.addf %525, %528 : vector<2x1xf32>
    %530 = math.rsqrt %529 : vector<2x1xf32>
    %531 = vector.broadcast %530 : vector<2x1xf32> to vector<2x32xf32>
    %532 = arith.mulf %527, %531 : vector<2x32xf32>
    %c27 = arith.constant 27 : index
    %c0_177 = arith.constant 0 : index
    %533 = vector.load %arg4[%c27, %c0_177] : memref<48x128xf32, #tpu.memory_space<vmem>>, vector<1x32xf32>
    %534 = vector.broadcast %533 : vector<1x32xf32> to vector<2x32xf32>
    %535 = arith.mulf %532, %534 : vector<2x32xf32>
    %c28 = arith.constant 28 : index
    %c0_178 = arith.constant 0 : index
    %536 = vector.load %arg4[%c28, %c0_178] : memref<48x128xf32, #tpu.memory_space<vmem>>, vector<1x32xf32>
    %537 = vector.broadcast %536 : vector<1x32xf32> to vector<2x32xf32>
    %538 = arith.addf %535, %537 : vector<2x32xf32>
    %c808 = arith.constant 808 : index
    %c0_179 = arith.constant 0 : index
    %539 = vector.load %arg3[%c808, %c0_179] : memref<1064x128xf32, #tpu.memory_space<vmem>>, vector<32x32xf32>
    %cst_180 = arith.constant dense<0.000000e+00> : vector<2x32xf32>
    %540 = tpu.matmul %538, %539, %cst_180 {dimension_numbers = #tpu.dot_dimension_numbers<[1], [0], [0], [1], [0, 0, 1, 1], [], []>} : vector<2x32xf32>, vector<32x32xf32>, vector<2x32xf32> -> vector<2x32xf32>
    %c31 = arith.constant 31 : index
    %c0_181 = arith.constant 0 : index
    %541 = vector.load %arg4[%c31, %c0_181] : memref<48x128xf32, #tpu.memory_space<vmem>>, vector<1x32xf32>
    %542 = vector.broadcast %541 : vector<1x32xf32> to vector<2x32xf32>
    %543 = arith.addf %540, %542 : vector<2x32xf32>
    %544 = arith.addf %538, %543 : vector<2x32xf32>
    %cst_182 = arith.constant dense<0.000000e+00> : vector<2xf32>
    %545 = vector.multi_reduction <add>, %544, %cst_182 [1] : vector<2x32xf32> to vector<2xf32>
    %546 = vector.shape_cast %545 : vector<2xf32> to vector<2x1xf32>
    %cst_183 = arith.constant 3.200000e+01 : f32
    %547 = vector.broadcast %cst_183 : f32 to vector<2x1xf32>
    %548 = arith.divf %546, %547 : vector<2x1xf32>
    %549 = vector.broadcast %548 : vector<2x1xf32> to vector<2x32xf32>
    %550 = arith.subf %544, %549 : vector<2x32xf32>
    %551 = arith.mulf %550, %550 : vector<2x32xf32>
    %cst_184 = arith.constant dense<0.000000e+00> : vector<2xf32>
    %552 = vector.multi_reduction <add>, %551, %cst_184 [1] : vector<2x32xf32> to vector<2xf32>
    %553 = vector.shape_cast %552 : vector<2xf32> to vector<2x1xf32>
    %cst_185 = arith.constant 3.200000e+01 : f32
    %554 = vector.broadcast %cst_185 : f32 to vector<2x1xf32>
    %555 = arith.divf %553, %554 : vector<2x1xf32>
    %556 = vector.broadcast %548 : vector<2x1xf32> to vector<2x32xf32>
    %557 = arith.subf %544, %556 : vector<2x32xf32>
    %cst_186 = arith.constant 9.99999974E-6 : f32
    %558 = vector.broadcast %cst_186 : f32 to vector<2x1xf32>
    %559 = arith.addf %555, %558 : vector<2x1xf32>
    %560 = math.rsqrt %559 : vector<2x1xf32>
    %561 = vector.broadcast %560 : vector<2x1xf32> to vector<2x32xf32>
    %562 = arith.mulf %557, %561 : vector<2x32xf32>
    %c35 = arith.constant 35 : index
    %c0_187 = arith.constant 0 : index
    %563 = vector.load %arg4[%c35, %c0_187] : memref<48x128xf32, #tpu.memory_space<vmem>>, vector<1x32xf32>
    %564 = vector.broadcast %563 : vector<1x32xf32> to vector<2x32xf32>
    %565 = arith.mulf %562, %564 : vector<2x32xf32>
    %c36 = arith.constant 36 : index
    %c0_188 = arith.constant 0 : index
    %566 = vector.load %arg4[%c36, %c0_188] : memref<48x128xf32, #tpu.memory_space<vmem>>, vector<1x32xf32>
    %567 = vector.broadcast %566 : vector<1x32xf32> to vector<2x32xf32>
    %568 = arith.addf %565, %567 : vector<2x32xf32>
    %c840 = arith.constant 840 : index
    %c0_189 = arith.constant 0 : index
    %569 = vector.load %arg3[%c840, %c0_189] : memref<1064x128xf32, #tpu.memory_space<vmem>>, vector<32x32xf32>
    %cst_190 = arith.constant dense<0.000000e+00> : vector<2x32xf32>
    %570 = tpu.matmul %568, %569, %cst_190 {dimension_numbers = #tpu.dot_dimension_numbers<[1], [0], [0], [1], [0, 0, 1, 1], [], []>} : vector<2x32xf32>, vector<32x32xf32>, vector<2x32xf32> -> vector<2x32xf32>
    %c32 = arith.constant 32 : index
    %c0_191 = arith.constant 0 : index
    %571 = vector.load %arg4[%c32, %c0_191] : memref<48x128xf32, #tpu.memory_space<vmem>>, vector<1x32xf32>
    %572 = vector.broadcast %571 : vector<1x32xf32> to vector<2x32xf32>
    %573 = arith.addf %570, %572 : vector<2x32xf32>
    %c872 = arith.constant 872 : index
    %c0_192 = arith.constant 0 : index
    %574 = vector.load %arg3[%c872, %c0_192] : memref<1064x128xf32, #tpu.memory_space<vmem>>, vector<32x64xf32>
    %cst_193 = arith.constant dense<0.000000e+00> : vector<16x64xf32>
    %575 = tpu.matmul %356, %574, %cst_193 {dimension_numbers = #tpu.dot_dimension_numbers<[1], [0], [0], [1], [0, 0, 1, 1], [], []>} : vector<16x32xf32>, vector<32x64xf32>, vector<16x64xf32> -> vector<16x64xf32>
    %c33 = arith.constant 33 : index
    %c0_194 = arith.constant 0 : index
    %576 = vector.load %arg4[%c33, %c0_194] : memref<48x128xf32, #tpu.memory_space<vmem>>, vector<1x64xf32>
    %577 = vector.broadcast %576 : vector<1x64xf32> to vector<16x64xf32>
    %578 = arith.addf %575, %577 : vector<16x64xf32>
    %579 = vector.extract_strided_slice %578 {offsets = [0, 0], sizes = [16, 32], strides = [1, 1]} : vector<16x64xf32> to vector<16x32xf32>
    %580 = vector.extract_strided_slice %578 {offsets = [0, 32], sizes = [16, 32], strides = [1, 1]} : vector<16x64xf32> to vector<16x32xf32>
    %c904 = arith.constant 904 : index
    %c0_195 = arith.constant 0 : index
    %581 = vector.load %arg3[%c904, %c0_195] : memref<1064x128xf32, #tpu.memory_space<vmem>>, vector<32x32xf32>
    %c34 = arith.constant 34 : index
    %c0_196 = arith.constant 0 : index
    %582 = vector.load %arg4[%c34, %c0_196] : memref<48x128xf32, #tpu.memory_space<vmem>>, vector<1x32xf32>
    %583 = vector.extract_strided_slice %573 {offsets = [0, 0], sizes = [2, 8], strides = [1, 1]} : vector<2x32xf32> to vector<2x8xf32>
    %584 = vector.extract_strided_slice %579 {offsets = [0, 0], sizes = [16, 8], strides = [1, 1]} : vector<16x32xf32> to vector<16x8xf32>
    %cst_197 = arith.constant dense<0.000000e+00> : vector<2x16xf32>
    %585 = tpu.matmul %583, %584, %cst_197 {dimension_numbers = #tpu.dot_dimension_numbers<[1], [1], [0], [0], [0, 0, 1, 0], [], []>} : vector<2x8xf32>, vector<16x8xf32>, vector<2x16xf32> -> vector<2x16xf32>
    %cst_198 = arith.constant 0.353553385 : f32
    %586 = vector.broadcast %cst_198 : f32 to vector<2x16xf32>
    %587 = arith.mulf %585, %586 : vector<2x16xf32>
    %588 = arith.addf %587, %1 : vector<2x16xf32>
    %cst_199 = arith.constant dense<0xFF800000> : vector<2xf32>
    %589 = vector.multi_reduction <maximumf>, %588, %cst_199 [1] : vector<2x16xf32> to vector<2xf32>
    %590 = vector.shape_cast %589 : vector<2xf32> to vector<2x1xf32>
    %591 = vector.broadcast %590 : vector<2x1xf32> to vector<2x16xf32>
    %592 = arith.subf %588, %591 : vector<2x16xf32>
    %593 = math.exp %592 : vector<2x16xf32>
    %cst_200 = arith.constant dense<0.000000e+00> : vector<2xf32>
    %594 = vector.multi_reduction <add>, %593, %cst_200 [1] : vector<2x16xf32> to vector<2xf32>
    %595 = vector.shape_cast %594 : vector<2xf32> to vector<2x1xf32>
    %596 = tpu.reciprocal %595 {approx = true} : vector<2x1xf32> -> vector<2x1xf32>
    %597 = vector.broadcast %596 : vector<2x1xf32> to vector<2x16xf32>
    %598 = arith.mulf %593, %597 : vector<2x16xf32>
    %599 = vector.extract_strided_slice %580 {offsets = [0, 0], sizes = [16, 8], strides = [1, 1]} : vector<16x32xf32> to vector<16x8xf32>
    %cst_201 = arith.constant dense<0.000000e+00> : vector<2x8xf32>
    %600 = tpu.matmul %598, %599, %cst_201 {dimension_numbers = #tpu.dot_dimension_numbers<[1], [0], [0], [1], [0, 0, 1, 1], [], []>} : vector<2x16xf32>, vector<16x8xf32>, vector<2x8xf32> -> vector<2x8xf32>
    %601 = vector.extract_strided_slice %573 {offsets = [0, 8], sizes = [2, 8], strides = [1, 1]} : vector<2x32xf32> to vector<2x8xf32>
    %602 = vector.extract_strided_slice %579 {offsets = [0, 8], sizes = [16, 8], strides = [1, 1]} : vector<16x32xf32> to vector<16x8xf32>
    %cst_202 = arith.constant dense<0.000000e+00> : vector<2x16xf32>
    %603 = tpu.matmul %601, %602, %cst_202 {dimension_numbers = #tpu.dot_dimension_numbers<[1], [1], [0], [0], [0, 0, 1, 0], [], []>} : vector<2x8xf32>, vector<16x8xf32>, vector<2x16xf32> -> vector<2x16xf32>
    %cst_203 = arith.constant 0.353553385 : f32
    %604 = vector.broadcast %cst_203 : f32 to vector<2x16xf32>
    %605 = arith.mulf %603, %604 : vector<2x16xf32>
    %606 = arith.addf %605, %1 : vector<2x16xf32>
    %cst_204 = arith.constant dense<0xFF800000> : vector<2xf32>
    %607 = vector.multi_reduction <maximumf>, %606, %cst_204 [1] : vector<2x16xf32> to vector<2xf32>
    %608 = vector.shape_cast %607 : vector<2xf32> to vector<2x1xf32>
    %609 = vector.broadcast %608 : vector<2x1xf32> to vector<2x16xf32>
    %610 = arith.subf %606, %609 : vector<2x16xf32>
    %611 = math.exp %610 : vector<2x16xf32>
    %cst_205 = arith.constant dense<0.000000e+00> : vector<2xf32>
    %612 = vector.multi_reduction <add>, %611, %cst_205 [1] : vector<2x16xf32> to vector<2xf32>
    %613 = vector.shape_cast %612 : vector<2xf32> to vector<2x1xf32>
    %614 = tpu.reciprocal %613 {approx = true} : vector<2x1xf32> -> vector<2x1xf32>
    %615 = vector.broadcast %614 : vector<2x1xf32> to vector<2x16xf32>
    %616 = arith.mulf %611, %615 : vector<2x16xf32>
    %617 = vector.extract_strided_slice %580 {offsets = [0, 8], sizes = [16, 8], strides = [1, 1]} : vector<16x32xf32> to vector<16x8xf32>
    %cst_206 = arith.constant dense<0.000000e+00> : vector<2x8xf32>
    %618 = tpu.matmul %616, %617, %cst_206 {dimension_numbers = #tpu.dot_dimension_numbers<[1], [0], [0], [1], [0, 0, 1, 1], [], []>} : vector<2x16xf32>, vector<16x8xf32>, vector<2x8xf32> -> vector<2x8xf32>
    %619 = vector.extract_strided_slice %573 {offsets = [0, 16], sizes = [2, 8], strides = [1, 1]} : vector<2x32xf32> to vector<2x8xf32>
    %620 = vector.extract_strided_slice %579 {offsets = [0, 16], sizes = [16, 8], strides = [1, 1]} : vector<16x32xf32> to vector<16x8xf32>
    %cst_207 = arith.constant dense<0.000000e+00> : vector<2x16xf32>
    %621 = tpu.matmul %619, %620, %cst_207 {dimension_numbers = #tpu.dot_dimension_numbers<[1], [1], [0], [0], [0, 0, 1, 0], [], []>} : vector<2x8xf32>, vector<16x8xf32>, vector<2x16xf32> -> vector<2x16xf32>
    %cst_208 = arith.constant 0.353553385 : f32
    %622 = vector.broadcast %cst_208 : f32 to vector<2x16xf32>
    %623 = arith.mulf %621, %622 : vector<2x16xf32>
    %624 = arith.addf %623, %1 : vector<2x16xf32>
    %cst_209 = arith.constant dense<0xFF800000> : vector<2xf32>
    %625 = vector.multi_reduction <maximumf>, %624, %cst_209 [1] : vector<2x16xf32> to vector<2xf32>
    %626 = vector.shape_cast %625 : vector<2xf32> to vector<2x1xf32>
    %627 = vector.broadcast %626 : vector<2x1xf32> to vector<2x16xf32>
    %628 = arith.subf %624, %627 : vector<2x16xf32>
    %629 = math.exp %628 : vector<2x16xf32>
    %cst_210 = arith.constant dense<0.000000e+00> : vector<2xf32>
    %630 = vector.multi_reduction <add>, %629, %cst_210 [1] : vector<2x16xf32> to vector<2xf32>
    %631 = vector.shape_cast %630 : vector<2xf32> to vector<2x1xf32>
    %632 = tpu.reciprocal %631 {approx = true} : vector<2x1xf32> -> vector<2x1xf32>
    %633 = vector.broadcast %632 : vector<2x1xf32> to vector<2x16xf32>
    %634 = arith.mulf %629, %633 : vector<2x16xf32>
    %635 = vector.extract_strided_slice %580 {offsets = [0, 16], sizes = [16, 8], strides = [1, 1]} : vector<16x32xf32> to vector<16x8xf32>
    %cst_211 = arith.constant dense<0.000000e+00> : vector<2x8xf32>
    %636 = tpu.matmul %634, %635, %cst_211 {dimension_numbers = #tpu.dot_dimension_numbers<[1], [0], [0], [1], [0, 0, 1, 1], [], []>} : vector<2x16xf32>, vector<16x8xf32>, vector<2x8xf32> -> vector<2x8xf32>
    %637 = vector.extract_strided_slice %573 {offsets = [0, 24], sizes = [2, 8], strides = [1, 1]} : vector<2x32xf32> to vector<2x8xf32>
    %638 = vector.extract_strided_slice %579 {offsets = [0, 24], sizes = [16, 8], strides = [1, 1]} : vector<16x32xf32> to vector<16x8xf32>
    %cst_212 = arith.constant dense<0.000000e+00> : vector<2x16xf32>
    %639 = tpu.matmul %637, %638, %cst_212 {dimension_numbers = #tpu.dot_dimension_numbers<[1], [1], [0], [0], [0, 0, 1, 0], [], []>} : vector<2x8xf32>, vector<16x8xf32>, vector<2x16xf32> -> vector<2x16xf32>
    %cst_213 = arith.constant 0.353553385 : f32
    %640 = vector.broadcast %cst_213 : f32 to vector<2x16xf32>
    %641 = arith.mulf %639, %640 : vector<2x16xf32>
    %642 = arith.addf %641, %1 : vector<2x16xf32>
    %cst_214 = arith.constant dense<0xFF800000> : vector<2xf32>
    %643 = vector.multi_reduction <maximumf>, %642, %cst_214 [1] : vector<2x16xf32> to vector<2xf32>
    %644 = vector.shape_cast %643 : vector<2xf32> to vector<2x1xf32>
    %645 = vector.broadcast %644 : vector<2x1xf32> to vector<2x16xf32>
    %646 = arith.subf %642, %645 : vector<2x16xf32>
    %647 = math.exp %646 : vector<2x16xf32>
    %cst_215 = arith.constant dense<0.000000e+00> : vector<2xf32>
    %648 = vector.multi_reduction <add>, %647, %cst_215 [1] : vector<2x16xf32> to vector<2xf32>
    %649 = vector.shape_cast %648 : vector<2xf32> to vector<2x1xf32>
    %650 = tpu.reciprocal %649 {approx = true} : vector<2x1xf32> -> vector<2x1xf32>
    %651 = vector.broadcast %650 : vector<2x1xf32> to vector<2x16xf32>
    %652 = arith.mulf %647, %651 : vector<2x16xf32>
    %653 = vector.extract_strided_slice %580 {offsets = [0, 24], sizes = [16, 8], strides = [1, 1]} : vector<16x32xf32> to vector<16x8xf32>
    %cst_216 = arith.constant dense<0.000000e+00> : vector<2x8xf32>
    %654 = tpu.matmul %652, %653, %cst_216 {dimension_numbers = #tpu.dot_dimension_numbers<[1], [0], [0], [1], [0, 0, 1, 1], [], []>} : vector<2x16xf32>, vector<16x8xf32>, vector<2x8xf32> -> vector<2x8xf32>
    %655 = tpu.concatenate %600, %618, %636, %654 in 1 : vector<2x8xf32>, vector<2x8xf32>, vector<2x8xf32>, vector<2x8xf32> -> vector<2x32xf32>
    %cst_217 = arith.constant dense<0.000000e+00> : vector<2x32xf32>
    %656 = tpu.matmul %655, %581, %cst_217 {dimension_numbers = #tpu.dot_dimension_numbers<[1], [0], [0], [1], [0, 0, 1, 1], [], []>} : vector<2x32xf32>, vector<32x32xf32>, vector<2x32xf32> -> vector<2x32xf32>
    %657 = vector.broadcast %582 : vector<1x32xf32> to vector<2x32xf32>
    %658 = arith.addf %656, %657 : vector<2x32xf32>
    %659 = arith.addf %568, %658 : vector<2x32xf32>
    %cst_218 = arith.constant dense<0.000000e+00> : vector<2xf32>
    %660 = vector.multi_reduction <add>, %659, %cst_218 [1] : vector<2x32xf32> to vector<2xf32>
    %661 = vector.shape_cast %660 : vector<2xf32> to vector<2x1xf32>
    %cst_219 = arith.constant 3.200000e+01 : f32
    %662 = vector.broadcast %cst_219 : f32 to vector<2x1xf32>
    %663 = arith.divf %661, %662 : vector<2x1xf32>
    %664 = vector.broadcast %663 : vector<2x1xf32> to vector<2x32xf32>
    %665 = arith.subf %659, %664 : vector<2x32xf32>
    %666 = arith.mulf %665, %665 : vector<2x32xf32>
    %cst_220 = arith.constant dense<0.000000e+00> : vector<2xf32>
    %667 = vector.multi_reduction <add>, %666, %cst_220 [1] : vector<2x32xf32> to vector<2xf32>
    %668 = vector.shape_cast %667 : vector<2xf32> to vector<2x1xf32>
    %cst_221 = arith.constant 3.200000e+01 : f32
    %669 = vector.broadcast %cst_221 : f32 to vector<2x1xf32>
    %670 = arith.divf %668, %669 : vector<2x1xf32>
    %671 = vector.broadcast %663 : vector<2x1xf32> to vector<2x32xf32>
    %672 = arith.subf %659, %671 : vector<2x32xf32>
    %cst_222 = arith.constant 9.99999974E-6 : f32
    %673 = vector.broadcast %cst_222 : f32 to vector<2x1xf32>
    %674 = arith.addf %670, %673 : vector<2x1xf32>
    %675 = math.rsqrt %674 : vector<2x1xf32>
    %676 = vector.broadcast %675 : vector<2x1xf32> to vector<2x32xf32>
    %677 = arith.mulf %672, %676 : vector<2x32xf32>
    %c37 = arith.constant 37 : index
    %c0_223 = arith.constant 0 : index
    %678 = vector.load %arg4[%c37, %c0_223] : memref<48x128xf32, #tpu.memory_space<vmem>>, vector<1x32xf32>
    %679 = vector.broadcast %678 : vector<1x32xf32> to vector<2x32xf32>
    %680 = arith.mulf %677, %679 : vector<2x32xf32>
    %c38 = arith.constant 38 : index
    %c0_224 = arith.constant 0 : index
    %681 = vector.load %arg4[%c38, %c0_224] : memref<48x128xf32, #tpu.memory_space<vmem>>, vector<1x32xf32>
    %682 = vector.broadcast %681 : vector<1x32xf32> to vector<2x32xf32>
    %683 = arith.addf %680, %682 : vector<2x32xf32>
    %c936 = arith.constant 936 : index
    %c0_225 = arith.constant 0 : index
    %684 = vector.load %arg3[%c936, %c0_225] : memref<1064x128xf32, #tpu.memory_space<vmem>>, vector<32x64xf32>
    %cst_226 = arith.constant dense<0.000000e+00> : vector<2x64xf32>
    %685 = tpu.matmul %683, %684, %cst_226 {dimension_numbers = #tpu.dot_dimension_numbers<[1], [0], [0], [1], [0, 0, 1, 1], [], []>} : vector<2x32xf32>, vector<32x64xf32>, vector<2x64xf32> -> vector<2x64xf32>
    %c41 = arith.constant 41 : index
    %c0_227 = arith.constant 0 : index
    %686 = vector.load %arg4[%c41, %c0_227] : memref<48x128xf32, #tpu.memory_space<vmem>>, vector<1x64xf32>
    %687 = vector.broadcast %686 : vector<1x64xf32> to vector<2x64xf32>
    %688 = arith.addf %685, %687 : vector<2x64xf32>
    %cst_228 = arith.constant 0.000000e+00 : f32
    %689 = vector.broadcast %cst_228 : f32 to vector<2x64xf32>
    %690 = arith.maximumf %688, %689 : vector<2x64xf32>
    %c968 = arith.constant 968 : index
    %c0_229 = arith.constant 0 : index
    %691 = vector.load %arg3[%c968, %c0_229] : memref<1064x128xf32, #tpu.memory_space<vmem>>, vector<64x32xf32>
    %cst_230 = arith.constant dense<0.000000e+00> : vector<2x32xf32>
    %692 = tpu.matmul %690, %691, %cst_230 {dimension_numbers = #tpu.dot_dimension_numbers<[1], [0], [0], [1], [0, 0, 1, 1], [], []>} : vector<2x64xf32>, vector<64x32xf32>, vector<2x32xf32> -> vector<2x32xf32>
    %c42 = arith.constant 42 : index
    %c0_231 = arith.constant 0 : index
    %693 = vector.load %arg4[%c42, %c0_231] : memref<48x128xf32, #tpu.memory_space<vmem>>, vector<1x32xf32>
    %694 = vector.broadcast %693 : vector<1x32xf32> to vector<2x32xf32>
    %695 = arith.addf %692, %694 : vector<2x32xf32>
    %696 = arith.addf %683, %695 : vector<2x32xf32>
    %cst_232 = arith.constant dense<0.000000e+00> : vector<2xf32>
    %697 = vector.multi_reduction <add>, %696, %cst_232 [1] : vector<2x32xf32> to vector<2xf32>
    %698 = vector.shape_cast %697 : vector<2xf32> to vector<2x1xf32>
    %cst_233 = arith.constant 3.200000e+01 : f32
    %699 = vector.broadcast %cst_233 : f32 to vector<2x1xf32>
    %700 = arith.divf %698, %699 : vector<2x1xf32>
    %701 = vector.broadcast %700 : vector<2x1xf32> to vector<2x32xf32>
    %702 = arith.subf %696, %701 : vector<2x32xf32>
    %703 = arith.mulf %702, %702 : vector<2x32xf32>
    %cst_234 = arith.constant dense<0.000000e+00> : vector<2xf32>
    %704 = vector.multi_reduction <add>, %703, %cst_234 [1] : vector<2x32xf32> to vector<2xf32>
    %705 = vector.shape_cast %704 : vector<2xf32> to vector<2x1xf32>
    %cst_235 = arith.constant 3.200000e+01 : f32
    %706 = vector.broadcast %cst_235 : f32 to vector<2x1xf32>
    %707 = arith.divf %705, %706 : vector<2x1xf32>
    %708 = vector.broadcast %700 : vector<2x1xf32> to vector<2x32xf32>
    %709 = arith.subf %696, %708 : vector<2x32xf32>
    %cst_236 = arith.constant 9.99999974E-6 : f32
    %710 = vector.broadcast %cst_236 : f32 to vector<2x1xf32>
    %711 = arith.addf %707, %710 : vector<2x1xf32>
    %712 = math.rsqrt %711 : vector<2x1xf32>
    %713 = vector.broadcast %712 : vector<2x1xf32> to vector<2x32xf32>
    %714 = arith.mulf %709, %713 : vector<2x32xf32>
    %c39 = arith.constant 39 : index
    %c0_237 = arith.constant 0 : index
    %715 = vector.load %arg4[%c39, %c0_237] : memref<48x128xf32, #tpu.memory_space<vmem>>, vector<1x32xf32>
    %716 = vector.broadcast %715 : vector<1x32xf32> to vector<2x32xf32>
    %717 = arith.mulf %714, %716 : vector<2x32xf32>
    %c40 = arith.constant 40 : index
    %c0_238 = arith.constant 0 : index
    %718 = vector.load %arg4[%c40, %c0_238] : memref<48x128xf32, #tpu.memory_space<vmem>>, vector<1x32xf32>
    %719 = vector.broadcast %718 : vector<1x32xf32> to vector<2x32xf32>
    %720 = arith.addf %717, %719 : vector<2x32xf32>
    %c1032 = arith.constant 1032 : index
    %c0_239 = arith.constant 0 : index
    %721 = vector.load %arg3[%c1032, %c0_239] : memref<1064x128xf32, #tpu.memory_space<vmem>>, vector<32x128xf32>
    %cst_240 = arith.constant dense<0.000000e+00> : vector<2x128xf32>
    %722 = tpu.matmul %720, %721, %cst_240 {dimension_numbers = #tpu.dot_dimension_numbers<[1], [0], [0], [1], [0, 0, 1, 1], [], []>} : vector<2x32xf32>, vector<32x128xf32>, vector<2x128xf32> -> vector<2x128xf32>
    %c43 = arith.constant 43 : index
    %c0_241 = arith.constant 0 : index
    %723 = vector.load %arg4[%c43, %c0_241] : memref<48x128xf32, #tpu.memory_space<vmem>>, vector<1x128xf32>
    %724 = vector.broadcast %723 : vector<1x128xf32> to vector<2x128xf32>
    %725 = arith.addf %722, %724 : vector<2x128xf32>
    %cst_242 = arith.constant 0.000000e+00 : f32
    %726 = vector.broadcast %cst_242 : f32 to vector<6x128xf32>
    %727 = tpu.concatenate %725, %726 in 0 : vector<2x128xf32>, vector<6x128xf32> -> vector<8x128xf32>
    %c0_243 = arith.constant 0 : index
    %c0_244 = arith.constant 0 : index
    %728 = vector.load %arg5[%c0_243, %c0_244] : memref<8x128xf32, #tpu.memory_space<vmem>>, vector<8x128xf32>
    tpu.vector_store %arg5[%c0_243, %c0_244], %727 {strides = array<i32>} : memref<8x128xf32, #tpu.memory_space<vmem>>, vector<8x128xf32>,
    return
  }
  func.func @transform_0(%arg0: i32) -> (i32, i32) {
    %c0_i32 = arith.constant 0 : i32
    %c0_i32_0 = arith.constant 0 : i32
    %c0_i32_1 = arith.constant 0 : i32
    return %c0_i32, %c0_i32_0 : i32, i32
  }
  func.func @transform_1(%arg0: i32) -> (i32, i32) {
    %c0_i32 = arith.constant 0 : i32
    %c0_i32_0 = arith.constant 0 : i32
    %c0_i32_1 = arith.constant 0 : i32
    return %c0_i32, %c0_i32_0 : i32, i32
  }
  func.func @transform_2(%arg0: i32) -> (i32, i32) {
    %c0_i32 = arith.constant 0 : i32
    %c0_i32_0 = arith.constant 0 : i32
    %c0_i32_1 = arith.constant 0 : i32
    return %c0_i32, %c0_i32_0 : i32, i32
  }
  func.func @transform_3(%arg0: i32) -> (i32, i32) {
    %c0_i32 = arith.constant 0 : i32
    %c0_i32_0 = arith.constant 0 : i32
    %c0_i32_1 = arith.constant 0 : i32
    return %c0_i32, %c0_i32_0 : i32, i32
  }
  func.func @transform_4(%arg0: i32) -> (i32, i32) {
    %c0_i32 = arith.constant 0 : i32
    %c0_i32_0 = arith.constant 0 : i32
    %c0_i32_1 = arith.constant 0 : i32
    return %c0_i32, %c0_i32_0 : i32, i32
  }
}

</mosaic_0001>

<bundles_post_ra>
// kernel: recipe_multi_head_attn_forward.1
= control target key start
LH: loop header
LB: loop body
LE: loop exit
PB: predicated region body
PF: predicated region fallthrough
CT: control target
= control target key end

     0   :  { %vm50_vm0 = vcmask 523264   ;;  %vm103_vm1 = vcmask 261120   ;;  %vm107_vm2 = vcmask 254976   ;;  %v3130_v40 = vmov 32.0   ;;  %s3131_s10 = smov 64   ;;  %s3132_s11 = smov 120   ;;  %s4249_s2 = inlined_call_operand.vmem [shape: f32[1064,128], index: 2, kind: input, shape index: {}]   ;;  %s4250_s0 = inlined_call_operand.vmem [shape: f32[10,192], index: 0, kind: input, shape index: {}]   ;;  %s4251_s3 = inlined_call_operand.vmem [shape: f32[48,128], index: 3, kind: input, shape index: {}]   ;;  %s4252_s1 = inlined_call_operand.vmem [shape: f32[16,32], index: 1, kind: input, shape index: {}]   ;;  %s4253_s4 = inlined_call_operand.vmem [shape: f32[8,128], index: 4, kind: output, shape index: {}]  }
   0x1   :  { %v39_v0 = vld [vmem:[%s4249_s2 + $0x78] sm:$0xff]  ;;  %v38_v1 = vld [vmem:[%s4249_s2 + $0x70] sm:$0xff]  ;;  %v37_v2 = vld [vmem:[%s4249_s2 + $0x68] sm:$0xff]  ;;  %2991 = vrcp.f32 %v3130_v40  ;;  %s3133_s12 = smov 96   ;;  %s3134_s13 = smov 80   ;;  %vm210_vm10 = vcmask 64512  }
   0x2   :  { %57 = vmatpush.msra.mxu0 %v39_v0  ;;  %v47_v3 = vld [vmem:[%s4249_s2 + $0xb8] sm:$0xff]  ;;  %v36_v4 = vld [vmem:[%s4249_s2 + $0x60] sm:$0xff]  ;;  %v46_v5 = vld [vmem:[%s4249_s2 + $0xb0] sm:$0xff]  ;;  %vm246_vm11 = vcmask 80896   ;;  %vm250_vm12 = vcmask 74752   ;;  %s3135_s18 = smov 88  }
   0x3   :  { %88 = vmatpush.msra.mxu1 %v47_v3  ;;  %v45_v6 = vld [vmem:[%s4249_s2 + $0xa8] sm:$0xff]  ;;  %v35_v7 = vld [vmem:[%s4249_s2 + $0x58] sm:$0xff]  ;;  %v44_v8 = vld [vmem:[%s4249_s2 + $0xa0] sm:$0xff]  ;;  %s3136_s19 = smov 72   ;;  %s3137_s20 = smov 112   ;;  %vm281_vm13 = vcmask 1041408  }
   0x4   :  { %58 = vmatpush.msra.mxu0 %v38_v1  ;;  %v34_v9 = vld [vmem:[%s4249_s2 + $0x50] sm:$0xff]  ;;  %v43_v10 = vld [vmem:[%s4249_s2 + $0x98] sm:$0xff]  ;;  %v33_v11 = vld [vmem:[%s4249_s2 + $0x48] sm:$0xff]  ;;  %s3138_s21 = smov 104   ;;  %s3139_s22 = smov 56   ;;  %vm636_vm14 = vcmask 130048  }
   0x5   :  { %89 = vmatpush.msra.mxu1 %v46_v5  ;;  %v42_v12 = vld [vmem:[%s4249_s2 + $0x90] sm:$0xff]  ;;  %v32_v13 = vld [vmem:[%s4249_s2 + $0x40] sm:$0xff]  ;;  %v41_v14 = vld [vmem:[%s4249_s2 + $0x88] sm:$0xff]  ;;  %s3141_s23 = smov 40   ;;  %s3142_s24 = smov 8   ;;  %vm639_vm15 = vcmask 195584  }
   0x6   :  { %59 = vmatpush.msra.mxu0 %v37_v2  ;;  %v31_v15 = vld [vmem:[%s4249_s2 + $0x38] sm:$0xff]  ;;  %v40_v16 = vld [vmem:[%s4249_s2 + $0x80] sm:$0xff]  ;;  %v30_v17 = vld [vmem:[%s4249_s2 + $0x30] sm:$0xff]  ;;  %s3143_s25 = smov 16   ;;  %s3144_s26 = smov 24  }
   0x7   :  { %90 = vmatpush.msra.mxu1 %v45_v6  ;;  %v21_v18 = vld [vmem:[%s4250_s0 + $0x8] sm:$0xff]  ;;  %v28_v20 = vld [vmem:[%s4249_s2 + $0x20] sm:$0xff]  ;;  %v27_v21 = vld [vmem:[%s4249_s2 + $0x18] sm:$0xff]  ;;  %v2992_v41 = vpop.eup %2991 }
   0x8   :  { %60 = vmatpush.msra.mxu0 %v36_v4  ;;  %v29_v19 = vld [vmem:[%s4249_s2 + $0x28] sm:$0xff]  ;;  %v26_v22 = vld [vmem:[%s4249_s2 + $0x10] sm:$0xff]  ;;  %v23_v23 = vld [vmem:[%s4250_s0 + $0x18] sm:$0x3]  ;;  %v112_v42 = vmul.f32 32.0, %v2992_v41  ;;  %vm116_vm3 = vweird.f32 %v2992_v41 }
   0x9   :  { %91 = vmatpush.msra.mxu1 %v44_v8  ;;  %v25_v24 = vld [vmem:[%s4249_s2 + $0x8] sm:$0xff]  ;;  %v24_v25 = vld [vmem:[%s4249_s2] sm:$0xff]  ;;  %v22_v27 = vld [vmem:[%s4250_s0 + $0x10] sm:$0x3] }
   0xa   :  { %61 = vmatpush.msra.mxu0 %v35_v7  ;;  %v20_v26 = vld [vmem:[%s4250_s0] sm:$0xff]  ;;  %v49_v34 = vld [vmem:[%s4249_s2 + $0xc8] sm:$0x3]  ;;  %v113_v43 = vsub.f32 1.0, %v112_v42  ;;  %v166_v58 = vld [vmem:[%s4249_s2 + $0xf8] sm:$0xff]  ;;  %s3140_s0 = smov 48  }
   0xb   :  { %92 = vmatpush.msra.mxu1 %v43_v10  ;;  %v48_v28 = vld [vmem:[%s4249_s2 + $0xc0] sm:$0xff]  ;;  %v165_v59 = vld [vmem:[%s4249_s2 + $0xf0] sm:$0xff]  ;;  %v164_v60 = vld [vmem:[%s4249_s2 + $0xe8] sm:$0xff] }
   0xc   :  { %62 = vmatpush.msra.mxu0 %v34_v9  ;;  %v114_v44 = vmul.f32 %v2992_v41, %v113_v43  ;;  %v167_v57 = vld [vmem:[%s4249_s2 + $0x100] sm:$0xff]  ;;  %v3335_v40 = vld [vmem:[%s4249_s2 + $0xd8] sm:$0x3] }
   0xd   :  { %93 = vmatpush.msra.mxu1 %v42_v12  ;;  %188 = vmatpush.msra.mxu2 %v167_v57 }
   0xe   :  { %63 = vmatpush.msra.mxu0 %v33_v11  ;;  %v115_v45 = vadd.f32 %v2992_v41, %v114_v44  ;;  %v2947_v11 = vld [vmem:[%s4251_s3] ss:$0 sm:$0xff] }
   0xf   :  { %94 = vmatpush.msra.mxu1 %v41_v14  ;;  %189 = vmatpush.msra.mxu2 %v166_v58 }
  0x10   :  { %64 = vmatpush.msra.mxu0 %v32_v13  ;;  %v3270_v46 = vsel %vm116_vm3, %v2992_v41, %v115_v45 }
  0x11   :  { %95 = vmatpush.msra.mxu1 %v40_v16  ;;  %190 = vmatpush.msra.mxu2 %v165_v59 }
  0x12   :  { %65 = vmatpush.msra.mxu0 %v31_v15  ;;  %2770 = vmatmul.msk.f32.vlgmr.msra.gmra.mxu1 %vm50_vm0, %v21_v18  ;;  %v2948_v15 = vld [vmem:[%s4251_s3 + $0x1] ss:$0 sm:$0xff] }
  0x13   :  { %191 = vmatpush.msra.mxu2 %v164_v60 }
  0x14   :  { %66 = vmatpush.msra.mxu0 %v30_v17 }
  0x16   :  { %67 = vmatpush.msra.mxu0 %v29_v19 }
  0x18   :  { %68 = vmatpush.msra.mxu0 %v28_v20 }
  0x1a   :  { %69 = vmatpush.msra.mxu0 %v27_v21  ;;  %2771 = vmatmul.msk.f32.gmra.mxu1 %vm50_vm0, %v23_v23 }
  0x1c   :  { %70 = vmatpush.msra.mxu0 %v26_v22 }
  0x1e   :  { %71 = vmatpush.msra.mxu0 %v25_v24 }
  0x20   :  { %72 = vmatpush.msra.mxu0 %v24_v25  ;;  %v2949_v25 = vld [vmem:[%s4251_s3 + $0x2] ss:$0 sm:$0xff] }
  0x21   :  { %73 = vmatmul.f32.vlgmr.msra.gmra.mxu0 %v20_v26 }
  0x29   :  { %76 = vmatmul.f32.gmra.mxu0 %v22_v27 }
  0x8f   :  { %v97_v29 = vpop.f32.mrf.mxu1 }
  0x97   :  { %v100_v36 = vpop.f32.mrf.mxu1 }
  0x9e   :  { %v74_v30 = vpop.f32.mrf.mxu0 }
  0x9f   :  { %v75_v31 = vadd.f32 %v74_v30, %v48_v28 }
  0xa1   :  { %v3259_v32 = vadd.f32 %v97_v29, %v75_v31 }
  0xa3   :  { %v104_v33 = vsel %vm103_vm1, %v3259_v32, 0.0 }
  0xa4   :  { %105 = vadd.xlane.f32.xlu0 %v104_v33 }
  0xa6   :  { %v77_v35 = vpop.f32.mrf.mxu0 }
  0xa7   :  { %v78_v37 = vadd.f32 %v77_v35, %v49_v34  ;;  %v3328_v34 = vld [vmem:[%s4249_s2 + $0xd0] sm:$0xff] }
  0xa9   :  { %v3266_v38 = vadd.f32 %v100_v36, %v78_v37 }
  0xab   :  { %v108_v39 = vsel %vm107_vm2, %v3266_v38, 0.0 }
  0xac   :  { %109 = vadd.xlane.f32.xlu0 %v108_v39 }
 0x117   :  { %v106_v47 = vpop.xlane.xlu0 %105 }
 0x118   :  { %v118_v48 = vmul.f32 %v3270_v46, %v106_v47 }
 0x11a   :  { %v120_v49 = vsub.f32 %v3259_v32, %v118_v48 }
 0x11c   :  { %v122_v50 = vmul.f32 %v120_v49, %v120_v49 }
 0x11e   :  { %v124_v51 = vsel %vm103_vm1, %v122_v50, 0.0 }
 0x11f   :  { %125 = vadd.xlane.f32.xlu1 %v124_v51  ;;  %v110_v52 = vpop.xlane.xlu0 %109 }
 0x120   :  { %v119_v53 = vmul.f32 %v3270_v46, %v110_v52 }
 0x122   :  { %v121_v54 = vsub.f32 %v3266_v38, %v119_v53 }
 0x124   :  { %v123_v55 = vmul.f32 %v121_v54, %v121_v54 }
 0x126   :  { %v127_v56 = vsel %vm107_vm2, %v123_v55, 0.0 }
 0x127   :  { %128 = vadd.xlane.f32.xlu1 %v127_v56 }
 0x192   :  { %v126_v61 = vpop.xlane.xlu1 %125 }
 0x193   :  { %v130_v62 = vmul.f32 %v126_v61, %v3270_v46 }
 0x195   :  { %v132_v63 = vadd.f32 1e-12, %v130_v62 }
 0x197   :  { %2993 = vrsqrt.f32 %v132_v63  ;;  %vm140_vm5 = vweird.f32 %v132_v63 }
 0x19a   :  { %v129_v0 = vpop.xlane.xlu1 %128 }
 0x19b   :  { %v131_v1 = vmul.f32 %v129_v0, %v3270_v46 }
 0x19d   :  { %v2994_v2 = vpop.eup %2993  ;;  %v133_v3 = vadd.f32 1e-12, %v131_v1 }
 0x19e   :  { %v135_v4 = vmul.f32 %v2994_v2, %v132_v63  ;;  %vm141_vm4 = vweird.f32 %v2994_v2 }
 0x19f   :  { %2995 = vrsqrt.f32 %v133_v3  ;;  %vm142_vm6 = vmor %vm140_vm5, %vm141_vm4  ;;  %vm150_vm8 = vweird.f32 %v133_v3 }
 0x1a0   :  { %v136_v5 = vmul.f32 %v2994_v2, %v135_v4 }
 0x1a2   :  { %v137_v6 = vmul.f32 0.5, %v136_v5 }
 0x1a4   :  { %v138_v7 = vsub.f32 1.5, %v137_v6 }
 0x1a5   :  { %v2996_v8 = vpop.eup %2995 }
 0x1a6   :  { %v139_v9 = vmul.f32 %v2994_v2, %v138_v7  ;;  %v145_v10 = vmul.f32 %v2996_v8, %v133_v3  ;;  %vm151_vm7 = vweird.f32 %v2996_v8 }
 0x1a7   :  { %vm152_vm9 = vmor %vm150_vm8, %vm151_vm7 }
 0x1a8   :  { %v146_v12 = vmul.f32 %v2996_v8, %v145_v10  ;;  %v143_v13 = vsel %vm142_vm6, %v2994_v2, %v139_v9 }
 0x1a9   :  { %v154_v14 = vmul.f32 %v143_v13, %v120_v49 }
 0x1aa   :  { %v147_v16 = vmul.f32 0.5, %v146_v12 }
 0x1ab   :  { %v158_v17 = vmul.f32 %v2947_v11, %v154_v14 }
 0x1ac   :  { %v148_v18 = vsub.f32 1.5, %v147_v16 }
 0x1ad   :  { %v162_v19 = vadd.f32 %v2948_v15, %v158_v17 }
 0x1ae   :  { %v149_v20 = vmul.f32 %v2996_v8, %v148_v18 }
 0x1af   :  { %2772 = vmatmul.msk.f32.vlgmr.msra.gmra.mxu2 %vm103_vm1, %v162_v19 }
 0x1b0   :  { %v153_v21 = vsel %vm152_vm9, %v2996_v8, %v149_v20 }
 0x1b1   :  { %v155_v22 = vmul.f32 %v153_v21, %v121_v54 }
 0x1b3   :  { %v159_v23 = vmul.f32 %v2947_v11, %v155_v22 }
 0x1b5   :  { %v163_v24 = vadd.f32 %v2948_v15, %v159_v23 }
 0x1b7   :  { %2773 = vmatmul.msk.f32.gmra.mxu2 %vm103_vm1, %v163_v24 }
 0x232   :  { %v193_v26 = vpop.f32.mrf.mxu2 }
 0x233   :  { %v3303_v27 = vadd.f32 %v2949_v25, %v193_v26 }
 0x235   :  { %270 = vrot.lane.b32.xlu1 %v3303_v27, %s3131_s10 }
 0x23a   :  { %v196_v28 = vpop.f32.mrf.mxu2 }
 0x23b   :  { %v3307_v29 = vadd.f32 %v2949_v25, %v196_v28 }
 0x23d   :  { %307 = vrot.lane.b32.xlu1 %v3303_v27, %s3132_s11  ;;  %208 = vrot.lane.b32.xlu2 %v3307_v29, %s3133_s12 }
 0x245   :  { %309 = vrot.lane.b32.xlu1 %v3307_v29, %s3132_s11  ;;  %206 = vrot.lane.b32.xlu2 %v3303_v27, %s3133_s12 }
 0x24d   :  { %414 = vrot.lane.b32.xlu2 %v3307_v29, %s3134_s13 }
 0x297   :  { %v209_v30 = vpop.permute.xlu2 %208 }
 0x298   :  { %2774 = vmatpush.xpose.msk.msra.mxu3 %vm210_vm10, %v209_v30 }
 0x29f   :  { %v207_v31 = vpop.permute.xlu2 %206 }
 0x2a0   :  { %2775 = vmatpush.xpose.msk.msra.mxu3 %vm210_vm10, %v207_v31 }
 0x2a3   :  { %2776 = vmatmul.msk.f32.vlgmr.msra.gmra.mxu3 %vm210_vm10, %v3303_v27 }
 0x2a7   :  { %v271_v44 = vpop.permute.xlu1 %270  ;;  %v415_v59 = vpop.permute.xlu2 %414 }
 0x2ab   :  { %2777 = vmatmul.msk.f32.gmra.mxu3 %vm210_vm10, %v3307_v29 }
 0x2af   :  { %v308_v45 = vpop.permute.xlu1 %307 }
 0x2b7   :  { %v310_v47 = vpop.permute.xlu1 %309 }
 0x326   :  { %v236_v33 = vpop.f32.mrf.mxu3 }
 0x327   :  { %v242_v35 = vmul.f32 0.35355338, %v236_v33 }
 0x329   :  { %v244_v36 = vadd.f32 %v242_v35, %v3328_v34 }
 0x32b   :  { %v247_v37 = vsel %vm246_vm11, %v244_v36, -inf }
 0x32c   :  { %248 = vmax.xlane.f32.xlu0 %v247_v37 }
 0x32e   :  { %v239_v39 = vpop.f32.mrf.mxu3 }
 0x32f   :  { %v243_v41 = vmul.f32 0.35355338, %v239_v39 }
 0x331   :  { %v245_v42 = vadd.f32 %v243_v41, %v3335_v40 }
 0x333   :  { %v251_v43 = vsel %vm250_vm12, %v245_v42, -inf }
 0x334   :  { %252 = vmax.xlane.f32.xlu1 %v251_v43 }
 0x340   :  { %272 = vrot.lane.b32.xlu0 %v3307_v29, %s3131_s10 }
 0x348   :  { %313 = vrot.lane.b32.xlu0 %v3307_v29, %s3135_s18 }
 0x34d   :  { %515 = vrot.lane.b32.xlu1 %v3307_v29, %s3136_s19 }
 0x350   :  { %311 = vrot.lane.b32.xlu0 %v3303_v27, %s3135_s18 }
 0x358   :  { %412 = vrot.lane.b32.xlu0 %v3303_v27, %s3134_s13 }
 0x360   :  { %408 = vrot.lane.b32.xlu0 %v3303_v27, %s3137_s20 }
 0x368   :  { %410 = vrot.lane.b32.xlu0 %v3307_v29, %s3137_s20 }
 0x370   :  { %511 = vrot.lane.b32.xlu0 %v3307_v29, %s3138_s21 }
 0x39f   :  { %v249_v48 = vpop.xlane.xlu0 %248 }
 0x3a0   :  { %v254_v49 = vsub.f32 %v244_v36, %v249_v48 }
 0x3a2   :  { %v256_v50 = vmul.f32 1.442695, %v254_v49 }
 0x3a4   :  { %2997 = vpow2.f32 %v256_v50 }
 0x3a7   :  { %v253_v51 = vpop.xlane.xlu1 %252 }
 0x3a8   :  { %v255_v52 = vsub.f32 %v245_v42, %v253_v51 }
 0x3aa   :  { %v2998_v53 = vpop.eup %2997  ;;  %v258_v54 = vmul.f32 1.442695, %v255_v52 }
 0x3ab   :  { %v260_v55 = vsel %vm246_vm11, %v2998_v53, 0.0 }
 0x3ac   :  { %2999 = vpow2.f32 %v258_v54  ;;  %261 = vadd.xlane.f32.xlu2 %v260_v55 }
 0x3b2   :  { %v3000_v56 = vpop.eup %2999  ;;  %v273_v57 = vpop.permute.xlu0 %272 }
 0x3b3   :  { %2778 = vmatpush.msk.msrb.mxu2 %vm281_vm13, %v273_v57  ;;  %v263_v58 = vsel %vm250_vm12, %v3000_v56, 0.0 }
 0x3b4   :  { %264 = vadd.xlane.f32.xlu1 %v263_v58 }
 0x3b5   :  { %299 = vmatpush.msrb.mxu2 %v271_v44 }
 0x3b7   :  { %2788 = vmatpush.xpose.msk.msra.mxu2 %vm210_vm10, %v415_v59 }
 0x3ba   :  { %v314_v60 = vpop.permute.xlu0 %313 }
 0x3bb   :  { %2781 = vmatpush.xpose.msk.msrb.mxu3 %vm210_vm10, %v314_v60 }
 0x3bf   :  { %v516_v61 = vpop.permute.xlu1 %515 }
 0x3c0   :  { %2795 = vmatpush.xpose.msk.msrb.mxu0 %vm210_vm10, %v516_v61 }
 0x3c2   :  { %v312_v62 = vpop.permute.xlu0 %311 }
 0x3c3   :  { %2782 = vmatpush.xpose.msk.msrb.mxu3 %vm210_vm10, %v312_v62 }
 0x3c4   :  { %509 = vrot.lane.b32.xlu2 %v3303_v27, %s3138_s21 }
 0x3c6   :  { %2783 = vmatmul.msk.f32.vlgmr.msrb.gmra.mxu3 %vm210_vm10, %v308_v45 }
 0x3ca   :  { %v413_v63 = vpop.permute.xlu0 %412 }
 0x3cb   :  { %2789 = vmatpush.xpose.msk.msra.mxu2 %vm210_vm10, %v413_v63 }
 0x3cd   :  { %513 = vrot.lane.b32.xlu1 %v3303_v27, %s3136_s19 }
 0x3ce   :  { %2784 = vmatmul.msk.f32.gmra.mxu3 %vm210_vm10, %v310_v47 }
 0x3d2   :  { %v409_v6 = vpop.permute.xlu0 %408 }
 0x3da   :  { %v411_v8 = vpop.permute.xlu0 %410 }
 0x3e2   :  { %v512_v11 = vpop.permute.xlu0 %511 }
 0x41f   :  { %v262_v0 = vpop.xlane.xlu2 %261 }
 0x420   :  { %3001 = vrcp.f32 %v262_v0 }
 0x426   :  { %v3002_v1 = vpop.eup %3001 }
 0x427   :  { %v265_v2 = vpop.xlane.xlu1 %264  ;;  %v268_v3 = vmul.f32 %v3002_v1, %v2998_v53  ;;  %v510_v9 = vpop.permute.xlu2 %509 }
 0x428   :  { %3003 = vrcp.f32 %v265_v2 }
 0x429   :  { %2779 = vmatmul.msk.f32.vlgmr.msrb.gmra.mxu2 %vm246_vm11, %v268_v3 }
 0x42e   :  { %v3004_v4 = vpop.eup %3003 }
 0x42f   :  { %v269_v5 = vmul.f32 %v3004_v4, %v3000_v56 }
 0x431   :  { %2780 = vmatmul.msk.f32.gmra.mxu2 %vm246_vm11, %v269_v5 }
 0x439   :  { %2790 = vmatmul.msk.f32.vlgmr.msra.gmra.mxu2 %vm210_vm10, %v409_v6 }
 0x43f   :  { %v514_v7 = vpop.permute.xlu1 %513 }
 0x440   :  { %2796 = vmatpush.xpose.msk.msrb.mxu0 %vm210_vm10, %v514_v7 }
 0x441   :  { %2791 = vmatmul.msk.f32.gmra.mxu2 %vm210_vm10, %v411_v8 }
 0x443   :  { %2797 = vmatmul.msk.f32.vlgmr.msrb.gmra.mxu0 %vm210_vm10, %v510_v9 }
 0x449   :  { %v340_v10 = vpop.f32.mrf.mxu3 }
 0x44a   :  { %v346_v12 = vmul.f32 0.35355338, %v340_v10 }
 0x44b   :  { %2798 = vmatmul.msk.f32.gmra.mxu0 %vm210_vm10, %v512_v11 }
 0x44c   :  { %v348_v13 = vadd.f32 %v346_v12, %v3328_v34 }
 0x44e   :  { %v350_v14 = vsel %vm246_vm11, %v348_v13, -inf }
 0x44f   :  { %351 = vmax.xlane.f32.xlu1 %v350_v14 }
 0x451   :  { %v343_v15 = vpop.f32.mrf.mxu3 }
 0x452   :  { %v347_v16 = vmul.f32 0.35355338, %v343_v15 }
 0x454   :  { %v349_v17 = vadd.f32 %v347_v16, %v3335_v40 }
 0x456   :  { %v353_v18 = vsel %vm250_vm12, %v349_v17, -inf }
 0x457   :  { %354 = vmax.xlane.f32.xlu2 %v353_v18 }
 0x4ac   :  { %v3380_v19 = vpop.f32.mrf.mxu2 }
 0x4b4   :  { %v3382_v20 = vpop.f32.mrf.mxu2 }
 0x4bc   :  { %v441_v21 = vpop.f32.mrf.mxu2 }
 0x4bd   :  { %v447_v45 = vmul.f32 0.35355338, %v441_v21 }
 0x4bf   :  { %v449_v50 = vadd.f32 %v447_v45, %v3328_v34 }
 0x4c0   :  { %v542_v22 = vpop.f32.mrf.mxu0 }
 0x4c1   :  { %v548_v23 = vmul.f32 0.35355338, %v542_v22  ;;  %v451_v51 = vsel %vm246_vm11, %v449_v50, -inf }
 0x4c2   :  { %v352_v24 = vpop.xlane.xlu1 %351 }
 0x4c3   :  { %v356_v25 = vsub.f32 %v348_v13, %v352_v24  ;;  %v550_v26 = vadd.f32 %v548_v23, %v3328_v34 }
 0x4c4   :  { %v444_v28 = vpop.f32.mrf.mxu2 }
 0x4c5   :  { %v358_v30 = vmul.f32 1.442695, %v356_v25  ;;  %v448_v31 = vmul.f32 0.35355338, %v444_v28  ;;  %v552_v33 = vsel %vm246_vm11, %v550_v26, -inf }
 0x4c6   :  { %553 = vmax.xlane.f32.xlu2 %v552_v33 }
 0x4c7   :  { %3005 = vpow2.f32 %v358_v30  ;;  %v450_v35 = vadd.f32 %v448_v31, %v3335_v40 }
 0x4c8   :  { %v545_v36 = vpop.f32.mrf.mxu0 }
 0x4c9   :  { %v549_v37 = vmul.f32 0.35355338, %v545_v36  ;;  %v454_v39 = vsel %vm250_vm12, %v450_v35, -inf }
 0x4ca   :  { %v355_v41 = vpop.xlane.xlu2 %354  ;;  %455 = vmax.xlane.f32.xlu1 %v454_v39 }
 0x4cb   :  { %v3389_v42 = vadd.f32 %v549_v37, %v3335_v40  ;;  %v357_v43 = vsub.f32 %v349_v17, %v355_v41 }
 0x4cd   :  { %v3006_v44 = vpop.eup %3005  ;;  %v555_v47 = vsel %vm250_vm12, %v3389_v42, -inf  ;;  %v360_v49 = vmul.f32 1.442695, %v357_v43 }
 0x4ce   :  { %556 = vmax.xlane.f32.xlu0 %v555_v47  ;;  %v362_v48 = vsel %vm246_vm11, %v3006_v44, 0.0  ;;  %v202_v47 = vld [vmem:[%s4249_s2 + $0x120] sm:$0xff] }
 0x4cf   :  { %363 = vadd.xlane.f32.xlu2 %v362_v48  ;;  %3007 = vpow2.f32 %v360_v49  ;;  %v201_v48 = vld [vmem:[%s4249_s2 + $0x118] sm:$0xff]  ;;  %661 = vmatpush.msrb.mxu2 %v202_v47  ;;  %v200_v49 = vld [vmem:[%s4249_s2 + $0x110] sm:$0xff] }
 0x4d1   :  { %662 = vmatpush.msrb.mxu2 %v201_v48 }
 0x4d3   :  { %663 = vmatpush.msrb.mxu2 %v200_v49 }
 0x4d5   :  { %v3008_v52 = vpop.eup %3007 }
 0x4d6   :  { %452 = vmax.xlane.f32.xlu0 %v451_v51  ;;  %v365_v53 = vsel %vm250_vm12, %v3008_v52, 0.0 }
 0x4de   :  { %366 = vadd.xlane.f32.xlu0 %v365_v53 }
 0x4e3   :  { %374 = vrot.lane.b32.xlu1 %v3307_v29, %s3139_s22 }
 0x4e7   :  { %372 = vrot.lane.b32.xlu2 %v3303_v27, %s3139_s22 }
 0x4f2   :  { %475 = vrot.lane.b32.xlu0 %v3307_v29, %s3140_s0 }
 0x539   :  { %v554_v54 = vpop.xlane.xlu2 %553 }
 0x53a   :  { %v558_v55 = vsub.f32 %v550_v26, %v554_v54 }
 0x53c   :  { %v560_v56 = vmul.f32 1.442695, %v558_v55 }
 0x53d   :  { %v456_v57 = vpop.xlane.xlu1 %455 }
 0x53e   :  { %3009 = vpow2.f32 %v560_v56  ;;  %v458_v58 = vsub.f32 %v450_v35, %v456_v57 }
 0x540   :  { %v461_v59 = vmul.f32 1.442695, %v458_v58 }
 0x541   :  { %v557_v60 = vpop.xlane.xlu0 %556 }
 0x542   :  { %3011 = vpow2.f32 %v461_v59  ;;  %v364_v2 = vpop.xlane.xlu2 %363  ;;  %v559_v15 = vsub.f32 %v3389_v42, %v557_v60 }
 0x543   :  { %3013 = vrcp.f32 %v364_v2 }
 0x544   :  { %v3010_v61 = vpop.eup %3009  ;;  %v562_v16 = vmul.f32 1.442695, %v559_v15  ;;  %v728_v15 = vld [vmem:[%s4249_s2 + $0x138] sm:$0xff] }
 0x545   :  { %v564_v62 = vsel %vm246_vm11, %v3010_v61, 0.0 }
 0x546   :  { %565 = vadd.xlane.f32.xlu1 %v564_v62 }
 0x548   :  { %v3012_v63 = vpop.eup %3011 }
 0x549   :  { %v453_v0 = vpop.xlane.xlu0 %452  ;;  %v466_v1 = vsel %vm250_vm12, %v3012_v63, 0.0  ;;  %v3014_v5 = vpop.eup %3013 }
 0x54a   :  { %v457_v3 = vsub.f32 %v449_v50, %v453_v0  ;;  %467 = vadd.xlane.f32.xlu2 %v466_v1  ;;  %v373_v10 = vpop.permute.xlu2 %372  ;;  %v370_v11 = vmul.f32 %v3014_v5, %v3006_v44  ;;  %v199_v50 = vld [vmem:[%s4249_s2 + $0x108] sm:$0xff] }
 0x54b   :  { %664 = vmatpush.msrb.mxu2 %v199_v50 }
 0x54c   :  { %v459_v4 = vmul.f32 1.442695, %v457_v3 }
 0x54e   :  { %3015 = vpow2.f32 %v459_v4 }
 0x551   :  { %v367_v6 = vpop.xlane.xlu0 %366 }
 0x552   :  { %3017 = vrcp.f32 %v367_v6 }
 0x553   :  { %3019 = vpow2.f32 %v562_v16  ;;  %v727_v16 = vld [vmem:[%s4249_s2 + $0x130] sm:$0xff] }
 0x554   :  { %v3016_v7 = vpop.eup %3015 }
 0x555   :  { %v375_v8 = vpop.permute.xlu1 %374  ;;  %v463_v9 = vsel %vm246_vm11, %v3016_v7, 0.0 }
 0x556   :  { %464 = vadd.xlane.f32.xlu0 %v463_v9  ;;  %2785 = vmatpush.msk.msrb.mxu1 %vm281_vm13, %v375_v8 }
 0x558   :  { %400 = vmatpush.msrb.mxu1 %v373_v10  ;;  %v3018_v12 = vpop.eup %3017 }
 0x559   :  { %2786 = vmatmul.msk.f32.vlgmr.msrb.gmra.mxu1 %vm246_vm11, %v370_v11  ;;  %v371_v13 = vmul.f32 %v3018_v12, %v3008_v52  ;;  %v3020_v17 = vpop.eup %3019 }
 0x55a   :  { %v567_v18 = vsel %vm250_vm12, %v3020_v17, 0.0 }
 0x55f   :  { %574 = vrot.lane.b32.xlu1 %v3303_v27, %s3141_s23 }
 0x561   :  { %2787 = vmatmul.msk.f32.gmra.mxu1 %vm246_vm11, %v371_v13 }
 0x564   :  { %v476_v14 = vpop.permute.xlu0 %475 }
 0x565   :  { %2792 = vmatpush.msk.msra.mxu3 %vm281_vm13, %v476_v14  ;;  %v729_v14 = vld [vmem:[%s4249_s2 + $0x140] sm:$0xff] }
 0x56a   :  { %473 = vrot.lane.b32.xlu0 %v3303_v27, %s3140_s0 }
 0x572   :  { %576 = vrot.lane.b32.xlu0 %v3307_v29, %s3141_s23 }
 0x59c   :  { %568 = vadd.xlane.f32.xlu0 %v567_v18 }
 0x5b9   :  { %v566_v27 = vpop.xlane.xlu1 %565 }
 0x5bd   :  { %v468_v23 = vpop.xlane.xlu2 %467 }
 0x5c9   :  { %v465_v21 = vpop.xlane.xlu0 %464 }
 0x5ca   :  { %3021 = vrcp.f32 %v465_v21 }
 0x5cb   :  { %3023 = vrcp.f32 %v468_v23 }
 0x5cc   :  { %3025 = vrcp.f32 %v566_v27 }
 0x5d0   :  { %v3022_v24 = vpop.eup %3021 }
 0x5d1   :  { %v471_v25 = vmul.f32 %v3022_v24, %v3016_v7  ;;  %v3024_v28 = vpop.eup %3023  ;;  %v575_v36 = vpop.permute.xlu1 %574 }
 0x5d2   :  { %v3026_v30 = vpop.eup %3025  ;;  %v472_v33 = vmul.f32 %v3024_v28, %v3012_v63  ;;  %v2951_v28 = vld [vmem:[%s4251_s3 + $0x4] ss:$0 sm:$0xff] }
 0x5d3   :  { %v572_v35 = vmul.f32 %v3026_v30, %v3010_v61 }
 0x5d6   :  { %v402_v22 = vpop.f32.mrf.mxu1 }
 0x5d7   :  { %612 = vrot.lane.b32.xlu2 %v402_v22, %s3142_s24 }
 0x5dc   :  { %v474_v29 = vpop.permute.xlu0 %473 }
 0x5dd   :  { %501 = vmatpush.msra.mxu3 %v474_v29 }
 0x5de   :  { %v405_v26 = vpop.f32.mrf.mxu1  ;;  %2793 = vmatmul.msk.f32.vlgmr.msra.gmra.mxu3 %vm246_vm11, %v471_v25 }
 0x5df   :  { %614 = vrot.lane.b32.xlu0 %v405_v26, %s3142_s24  ;;  %750 = vmatpush.msrb.mxu3 %v729_v14 }
 0x5e1   :  { %751 = vmatpush.msrb.mxu3 %v728_v15 }
 0x5e3   :  { %752 = vmatpush.msrb.mxu3 %v727_v16 }
 0x5e4   :  { %v577_v31 = vpop.permute.xlu0 %576 }
 0x5e5   :  { %2799 = vmatpush.msk.msra.mxu1 %vm281_vm13, %v577_v31 }
 0x5e6   :  { %2794 = vmatmul.msk.f32.gmra.mxu3 %vm246_vm11, %v472_v33  ;;  %v2952_v33 = vld [vmem:[%s4251_s3 + $0x5] ss:$0 sm:$0xff] }
 0x5e7   :  { %602 = vmatpush.msra.mxu1 %v575_v36 }
 0x5e8   :  { %2800 = vmatmul.msk.f32.vlgmr.msra.gmra.mxu1 %vm246_vm11, %v572_v35 }
 0x60f   :  { %v569_v37 = vpop.xlane.xlu0 %568 }
 0x610   :  { %3027 = vrcp.f32 %v569_v37 }
 0x616   :  { %v3028_v39 = vpop.eup %3027 }
 0x617   :  { %v573_v41 = vmul.f32 %v3028_v39, %v3020_v17  ;;  %v726_v17 = vld [vmem:[%s4249_s2 + $0x128] sm:$0xff] }
 0x618   :  { %753 = vmatpush.msrb.mxu3 %v726_v17 }
 0x619   :  { %2801 = vmatmul.msk.f32.gmra.mxu1 %vm246_vm11, %v573_v41 }
 0x631   :  { %v613_v51 = vpop.permute.xlu2 %612 }
 0x632   :  { %v634_v52 = vsel %vm210_vm10, %v3380_v19, %v613_v51  ;;  %v2950_v19 = vld [vmem:[%s4251_s3 + $0x3] ss:$0 sm:$0xff] }
 0x651   :  { %v615_v57 = vpop.permute.xlu0 %614 }
 0x652   :  { %v635_v59 = vsel %vm210_vm10, %v3382_v20, %v615_v57  ;;  %v782_v57 = vld [vmem:[%s4249_s2 + $0x160] sm:$0xff] }
 0x661   :  { %v503_v42 = vpop.f32.mrf.mxu3 }
 0x662   :  { %620 = vrot.lane.b32.xlu1 %v503_v42, %s3143_s25 }
 0x665   :  { %v604_v43 = vpop.f32.mrf.mxu1 }
 0x666   :  { %628 = vrot.lane.b32.xlu2 %v604_v43, %s3144_s26 }
 0x669   :  { %v506_v44 = vpop.f32.mrf.mxu3 }
 0x66a   :  { %622 = vrot.lane.b32.xlu1 %v506_v44, %s3143_s25 }
 0x696   :  { %v607_v45 = vpop.f32.mrf.mxu1 }
 0x697   :  { %630 = vrot.lane.b32.xlu2 %v607_v45, %s3144_s26 }
 0x6c0   :  { %v629_v54 = vpop.permute.xlu2 %628 }
 0x6d4   :  { %v621_v53 = vpop.permute.xlu1 %620 }
 0x6d5   :  { %v637_v55 = vsel %vm636_vm14, %v634_v52, %v621_v53  ;;  %v786_v53 = vld [vmem:[%s4249_s2 + $0x180] sm:$0xff] }
 0x6d6   :  { %v640_v56 = vsel %vm639_vm15, %v637_v55, %v629_v54  ;;  %803 = vmatpush.msra.mxu0 %v786_v53  ;;  %v785_v54 = vld [vmem:[%s4249_s2 + $0x178] sm:$0xff]  ;;  %v784_v55 = vld [vmem:[%s4249_s2 + $0x170] sm:$0xff] }
 0x6d7   :  { %2802 = vmatmul.msk.f32.vlgmr.msrb.gmra.mxu2 %vm103_vm1, %v640_v56  ;;  %v783_v56 = vld [vmem:[%s4249_s2 + $0x168] sm:$0xff] }
 0x6d8   :  { %804 = vmatpush.msra.mxu0 %v785_v54 }
 0x6da   :  { %805 = vmatpush.msra.mxu0 %v784_v55  ;;  %v2955_v55 = vld [vmem:[%s4251_s3 + $0x8] ss:$0 sm:$0xff] }
 0x6dc   :  { %v623_v58 = vpop.permute.xlu1 %622  ;;  %806 = vmatpush.msra.mxu0 %v783_v56 }
 0x6dd   :  { %v638_v60 = vsel %vm636_vm14, %v635_v59, %v623_v58  ;;  %v781_v58 = vld [vmem:[%s4249_s2 + $0x158] sm:$0xff]  ;;  %v780_v59 = vld [vmem:[%s4249_s2 + $0x150] sm:$0xff] }
 0x6de   :  { %807 = vmatpush.msra.mxu0 %v782_v57 }
 0x6e0   :  { %808 = vmatpush.msra.mxu0 %v781_v58  ;;  %v2956_v58 = vld [vmem:[%s4251_s3 + $0x9] ss:$0 sm:$0xff] }
 0x6e2   :  { %809 = vmatpush.msra.mxu0 %v780_v59 }
 0x6f1   :  { %v631_v61 = vpop.permute.xlu2 %630 }
 0x6f2   :  { %v641_v62 = vsel %vm639_vm15, %v638_v60, %v631_v61  ;;  %v779_v60 = vld [vmem:[%s4249_s2 + $0x148] sm:$0xff]  ;;  %v2953_v61 = vld [vmem:[%s4251_s3 + $0x6] ss:$0 sm:$0xff] }
 0x6f3   :  { %2803 = vmatmul.msk.f32.gmra.mxu2 %vm103_vm1, %v641_v62  ;;  %810 = vmatpush.msra.mxu0 %v779_v60 }
 0x75a   :  { %v666_v63 = vpop.f32.mrf.mxu2 }
 0x75b   :  { %v667_v0 = vadd.f32 %v2950_v19, %v666_v63 }
 0x75d   :  { %v3455_v1 = vadd.f32 %v667_v0, %v3259_v32 }
 0x75f   :  { %v674_v2 = vsel %vm103_vm1, %v3455_v1, 0.0 }
 0x760   :  { %675 = vadd.xlane.f32.xlu1 %v674_v2 }
 0x776   :  { %v669_v20 = vpop.f32.mrf.mxu2 }
 0x777   :  { %v670_v3 = vadd.f32 %v2950_v19, %v669_v20 }
 0x779   :  { %v3460_v4 = vadd.f32 %v670_v3, %v3266_v38 }
 0x77b   :  { %v677_v5 = vsel %vm107_vm2, %v3460_v4, 0.0 }
 0x77c   :  { %678 = vadd.xlane.f32.xlu2 %v677_v5 }
 0x7d3   :  { %v676_v6 = vpop.xlane.xlu1 %675 }
 0x7d4   :  { %v680_v7 = vmul.f32 %v676_v6, %v3270_v46 }
 0x7d6   :  { %v682_v8 = vsub.f32 %v3455_v1, %v680_v7 }
 0x7d8   :  { %v684_v32 = vmul.f32 %v682_v8, %v682_v8 }
 0x7da   :  { %v686_v9 = vsel %vm103_vm1, %v684_v32, 0.0 }
 0x7db   :  { %687 = vadd.xlane.f32.xlu0 %v686_v9 }
 0x7ef   :  { %v679_v10 = vpop.xlane.xlu2 %678 }
 0x7f0   :  { %v681_v11 = vmul.f32 %v679_v10, %v3270_v46 }
 0x7f2   :  { %v683_v12 = vsub.f32 %v3460_v4, %v681_v11 }
 0x7f4   :  { %v685_v38 = vmul.f32 %v683_v12, %v683_v12 }
 0x7f6   :  { %v689_v13 = vsel %vm107_vm2, %v685_v38, 0.0 }
 0x7f7   :  { %690 = vadd.xlane.f32.xlu1 %v689_v13 }
 0x84e   :  { %v688_v18 = vpop.xlane.xlu0 %687 }
 0x84f   :  { %v692_v21 = vmul.f32 %v688_v18, %v3270_v46  ;;  %v2954_v18 = vld [vmem:[%s4251_s3 + $0x7] ss:$0 sm:$0xff] }
 0x851   :  { %v694_v22 = vadd.f32 1e-12, %v692_v21 }
 0x853   :  { %3029 = vrsqrt.f32 %v694_v22  ;;  %vm702_vm4 = vweird.f32 %v694_v22 }
 0x859   :  { %v3030_v23 = vpop.eup %3029 }
 0x85a   :  { %v697_v24 = vmul.f32 %v3030_v23, %v694_v22  ;;  %vm703_vm3 = vweird.f32 %v3030_v23 }
 0x85b   :  { %vm704_vm5 = vmor %vm702_vm4, %vm703_vm3 }
 0x85c   :  { %v698_v27 = vmul.f32 %v3030_v23, %v697_v24 }
 0x85e   :  { %v699_v25 = vmul.f32 0.5, %v698_v27 }
 0x860   :  { %v700_v29 = vsub.f32 1.5, %v699_v25 }
 0x862   :  { %v701_v26 = vmul.f32 %v3030_v23, %v700_v29 }
 0x864   :  { %v705_v30 = vsel %vm704_vm5, %v3030_v23, %v701_v26 }
 0x865   :  { %v716_v31 = vmul.f32 %v705_v30, %v682_v8 }
 0x867   :  { %v720_v35 = vmul.f32 %v2951_v28, %v716_v31 }
 0x869   :  { %v724_v36 = vadd.f32 %v2952_v33, %v720_v35 }
 0x86a   :  { %v691_v37 = vpop.xlane.xlu1 %690 }
 0x86b   :  { %v693_v39 = vmul.f32 %v691_v37, %v3270_v46  ;;  %2804 = vmatmul.msk.f32.vlgmr.msrb.gmra.mxu3 %vm103_vm1, %v724_v36 }
 0x86d   :  { %v695_v41 = vadd.f32 1e-12, %v693_v39 }
 0x86f   :  { %3031 = vrsqrt.f32 %v695_v41  ;;  %vm712_vm7 = vweird.f32 %v695_v41 }
 0x875   :  { %v3032_v42 = vpop.eup %3031 }
 0x876   :  { %v707_v43 = vmul.f32 %v3032_v42, %v695_v41  ;;  %vm713_vm6 = vweird.f32 %v3032_v42  ;;  %v875_v41 = vld [vmem:[%s4249_s2 + $0x1a0] sm:$0xff] }
 0x877   :  { %vm714_vm8 = vmor %vm712_vm7, %vm713_vm6  ;;  %896 = vmatpush.msrb.mxu1 %v875_v41 }
 0x878   :  { %v708_v44 = vmul.f32 %v3032_v42, %v707_v43  ;;  %v873_v43 = vld [vmem:[%s4249_s2 + $0x190] sm:$0xff] }
 0x87a   :  { %v709_v45 = vmul.f32 0.5, %v708_v44  ;;  %v872_v44 = vld [vmem:[%s4249_s2 + $0x188] sm:$0xff] }
 0x87c   :  { %v710_v47 = vsub.f32 1.5, %v709_v45 }
 0x87e   :  { %v711_v48 = vmul.f32 %v3032_v42, %v710_v47 }
 0x880   :  { %v715_v49 = vsel %vm714_vm8, %v3032_v42, %v711_v48  ;;  %v874_v42 = vld [vmem:[%s4249_s2 + $0x198] sm:$0xff] }
 0x881   :  { %v717_v50 = vmul.f32 %v715_v49, %v683_v12  ;;  %897 = vmatpush.msrb.mxu1 %v874_v42 }
 0x883   :  { %v721_v51 = vmul.f32 %v2951_v28, %v717_v50  ;;  %898 = vmatpush.msrb.mxu1 %v873_v43 }
 0x885   :  { %v725_v52 = vadd.f32 %v2952_v33, %v721_v51  ;;  %899 = vmatpush.msrb.mxu1 %v872_v44 }
 0x887   :  { %2805 = vmatmul.msk.f32.gmra.mxu3 %vm103_vm1, %v725_v52 }
 0x8ee   :  { %v755_v62 = vpop.f32.mrf.mxu3 }
 0x8ef   :  { %v756_v19 = vadd.f32 %v2953_v61, %v755_v62 }
 0x8f1   :  { %v761_v63 = vmul.f32 %v756_v19, %v756_v19 }
 0x8f3   :  { %v763_v0 = vmul.f32 %v761_v63, %v756_v19 }
 0x8f5   :  { %v765_v2 = vmul.f32 0.044715, %v763_v0 }
 0x8f7   :  { %v767_v20 = vadd.f32 %v765_v2, %v756_v19 }
 0x8f9   :  { %v769_v3 = vmul.f32 0.7978846, %v767_v20 }
 0x8fb   :  { %3033 = vtanh.f32 %v769_v3 }
 0x901   :  { %v3034_v5 = vpop.eup %3033 }
 0x902   :  { %v773_v6 = vadd.f32 1.0, %v3034_v5 }
 0x904   :  { %v775_v7 = vmul.f32 0.5, %v773_v6 }
 0x906   :  { %v777_v8 = vmul.f32 %v775_v7, %v756_v19 }
 0x908   :  { %2806 = vmatmul.msk.f32.vlgmr.msra.gmra.mxu0 %vm50_vm0, %v777_v8 }
 0x90a   :  { %v758_v32 = vpop.f32.mrf.mxu3 }
 0x90b   :  { %v759_v9 = vadd.f32 %v2953_v61, %v758_v32 }
 0x90d   :  { %v762_v10 = vmul.f32 %v759_v9, %v759_v9 }
 0x90f   :  { %v764_v11 = vmul.f32 %v762_v10, %v759_v9 }
 0x911   :  { %v766_v12 = vmul.f32 0.044715, %v764_v11 }
 0x913   :  { %v768_v38 = vadd.f32 %v766_v12, %v759_v9 }
 0x915   :  { %v770_v13 = vmul.f32 0.7978846, %v768_v38 }
 0x917   :  { %3035 = vtanh.f32 %v770_v13 }
 0x91d   :  { %v3036_v14 = vpop.eup %3035 }
 0x91e   :  { %v774_v15 = vadd.f32 1.0, %v3036_v14 }
 0x920   :  { %v776_v16 = vmul.f32 0.5, %v774_v15 }
 0x922   :  { %v778_v17 = vmul.f32 %v776_v16, %v759_v9  ;;  %v2957_v9 = vld [vmem:[%s4251_s3 + $0xa] ss:$0 sm:$0xff] }
 0x924   :  { %2807 = vmatmul.msk.f32.gmra.mxu0 %vm50_vm0, %v778_v17 }
 0x985   :  { %v812_v21 = vpop.f32.mrf.mxu0 }
 0x986   :  { %v813_v22 = vadd.f32 %v2954_v18, %v812_v21 }
 0x988   :  { %v3525_v23 = vadd.f32 %v813_v22, %v3455_v1 }
 0x98a   :  { %v820_v24 = vsel %vm103_vm1, %v3525_v23, 0.0 }
 0x98b   :  { %821 = vadd.xlane.f32.xlu2 %v820_v24 }
 0x9a1   :  { %v815_v27 = vpop.f32.mrf.mxu0 }
 0x9a2   :  { %v816_v25 = vadd.f32 %v2954_v18, %v815_v27 }
 0x9a4   :  { %v3530_v29 = vadd.f32 %v816_v25, %v3460_v4 }
 0x9a6   :  { %v823_v26 = vsel %vm107_vm2, %v3530_v29, 0.0 }
 0x9a7   :  { %824 = vadd.xlane.f32.xlu1 %v823_v26 }
 0x9fe   :  { %v822_v28 = vpop.xlane.xlu2 %821 }
 0x9ff   :  { %v826_v30 = vmul.f32 %v822_v28, %v3270_v46 }
 0xa01   :  { %v828_v31 = vsub.f32 %v3525_v23, %v826_v30 }
 0xa03   :  { %v830_v1 = vmul.f32 %v828_v31, %v828_v31 }
 0xa05   :  { %v832_v33 = vsel %vm103_vm1, %v830_v1, 0.0 }
 0xa06   :  { %833 = vadd.xlane.f32.xlu0 %v832_v33 }
 0xa1a   :  { %v825_v35 = vpop.xlane.xlu1 %824 }
 0xa1b   :  { %v827_v36 = vmul.f32 %v825_v35, %v3270_v46 }
 0xa1d   :  { %v829_v37 = vsub.f32 %v3530_v29, %v827_v36 }
 0xa1f   :  { %v831_v4 = vmul.f32 %v829_v37, %v829_v37 }
 0xa21   :  { %v835_v39 = vsel %vm107_vm2, %v831_v4, 0.0 }
 0xa22   :  { %836 = vadd.xlane.f32.xlu2 %v835_v39 }
 0xa79   :  { %v834_v45 = vpop.xlane.xlu0 %833 }
 0xa7a   :  { %v838_v47 = vmul.f32 %v834_v45, %v3270_v46 }
 0xa7c   :  { %v840_v48 = vadd.f32 1e-12, %v838_v47 }
 0xa7e   :  { %3037 = vrsqrt.f32 %v840_v48  ;;  %vm848_vm3 = vweird.f32 %v840_v48 }
 0xa84   :  { %v3038_v49 = vpop.eup %3037 }
 0xa85   :  { %v843_v50 = vmul.f32 %v3038_v49, %v840_v48  ;;  %vm849_vm9 = vweird.f32 %v3038_v49 }
 0xa86   :  { %vm850_vm4 = vmor %vm848_vm3, %vm849_vm9 }
 0xa87   :  { %v844_v51 = vmul.f32 %v3038_v49, %v843_v50 }
 0xa89   :  { %v845_v52 = vmul.f32 0.5, %v844_v51 }
 0xa8b   :  { %v846_v53 = vsub.f32 1.5, %v845_v52 }
 0xa8d   :  { %v847_v54 = vmul.f32 %v3038_v49, %v846_v53 }
 0xa8f   :  { %v851_v56 = vsel %vm850_vm4, %v3038_v49, %v847_v54 }
 0xa90   :  { %v862_v57 = vmul.f32 %v851_v56, %v828_v31 }
 0xa92   :  { %v866_v59 = vmul.f32 %v2955_v55, %v862_v57 }
 0xa94   :  { %v870_v60 = vadd.f32 %v2956_v58, %v866_v59 }
 0xa95   :  { %v837_v61 = vpop.xlane.xlu2 %836 }
 0xa96   :  { %v839_v62 = vmul.f32 %v837_v61, %v3270_v46  ;;  %2808 = vmatmul.msk.f32.vlgmr.msrb.gmra.mxu1 %vm103_vm1, %v870_v60 }
 0xa98   :  { %v841_v19 = vadd.f32 1e-12, %v839_v62 }
 0xa9a   :  { %3039 = vrsqrt.f32 %v841_v19  ;;  %vm858_vm6 = vweird.f32 %v841_v19 }
 0xaa0   :  { %v3040_v63 = vpop.eup %3039 }
 0xaa1   :  { %v853_v0 = vmul.f32 %v3040_v63, %v841_v19  ;;  %vm859_vm5 = vweird.f32 %v3040_v63 }
 0xaa2   :  { %vm860_vm7 = vmor %vm858_vm6, %vm859_vm5 }
 0xaa3   :  { %v854_v2 = vmul.f32 %v3040_v63, %v853_v0 }
 0xaa5   :  { %v855_v20 = vmul.f32 0.5, %v854_v2 }
 0xaa7   :  { %v856_v3 = vsub.f32 1.5, %v855_v20 }
 0xaa9   :  { %v857_v5 = vmul.f32 %v3040_v63, %v856_v3 }
 0xaab   :  { %v861_v6 = vsel %vm860_vm7, %v3040_v63, %v857_v5 }
 0xaac   :  { %v863_v7 = vmul.f32 %v861_v6, %v829_v37 }
 0xaae   :  { %v867_v8 = vmul.f32 %v2955_v55, %v863_v7 }
 0xab0   :  { %v871_v32 = vadd.f32 %v2956_v58, %v867_v8 }
 0xab2   :  { %2809 = vmatmul.msk.f32.gmra.mxu1 %vm103_vm1, %v871_v32 }
 0xb13   :  { %v901_v10 = vpop.f32.mrf.mxu1 }
 0xb14   :  { %v3565_v11 = vadd.f32 %v2957_v9, %v901_v10 }
 0xb16   :  { %914 = vrot.lane.b32.xlu0 %v3565_v11, %s3133_s12 }
 0xb2f   :  { %v904_v12 = vpop.f32.mrf.mxu1 }
 0xb30   :  { %v3569_v38 = vadd.f32 %v2957_v9, %v904_v12 }
 0xb32   :  { %1118 = vrot.lane.b32.xlu0 %v3569_v38, %s3134_s13  ;;  %1017 = vrot.lane.b32.xlu2 %v3569_v38, %s3135_s18 }
 0xb33   :  { %916 = vrot.lane.b32.xlu1 %v3569_v38, %s3133_s12 }
 0xb3a   :  { %1116 = vrot.lane.b32.xlu0 %v3565_v11, %s3134_s13  ;;  %1011 = vrot.lane.b32.xlu2 %v3565_v11, %s3132_s11 }
 0xb3b   :  { %1015 = vrot.lane.b32.xlu1 %v3565_v11, %s3135_s18 }
 0xb42   :  { %1219 = vrot.lane.b32.xlu0 %v3569_v38, %s3136_s19  ;;  %1013 = vrot.lane.b32.xlu2 %v3569_v38, %s3132_s11 }
 0xb43   :  { %1112 = vrot.lane.b32.xlu1 %v3565_v11, %s3137_s20 }
 0xb4a   :  { %1213 = vrot.lane.b32.xlu2 %v3565_v11, %s3138_s21 }
 0xb4b   :  { %1217 = vrot.lane.b32.xlu1 %v3565_v11, %s3136_s19 }
 0xb88   :  { %v915_v14 = vpop.permute.xlu0 %914 }
 0xb8c   :  { %v1018_v13 = vpop.permute.xlu2 %1017 }
 0xb8d   :  { %2817 = vmatpush.xpose.msk.msrb.mxu0 %vm210_vm10, %v1018_v13 }
 0xb94   :  { %v1012_v17 = vpop.permute.xlu2 %1011 }
 0xb9c   :  { %v1014_v27 = vpop.permute.xlu2 %1013 }
 0xba4   :  { %v1119_v15 = vpop.permute.xlu0 %1118  ;;  %v1214_v26 = vpop.permute.xlu2 %1213 }
 0xba5   :  { %v917_v16 = vpop.permute.xlu1 %916 }
 0xba6   :  { %2810 = vmatpush.xpose.msk.msra.mxu2 %vm210_vm10, %v917_v16 }
 0xbaa   :  { %2811 = vmatpush.xpose.msk.msra.mxu2 %vm210_vm10, %v915_v14 }
 0xbac   :  { %v1117_v18 = vpop.permute.xlu0 %1116 }
 0xbad   :  { %2812 = vmatmul.msk.f32.vlgmr.msra.gmra.mxu2 %vm210_vm10, %v3565_v11  ;;  %v1016_v21 = vpop.permute.xlu1 %1015 }
 0xbae   :  { %2824 = vmatpush.xpose.msk.msrb.mxu2 %vm210_vm10, %v1119_v15  ;;  %2818 = vmatpush.xpose.msk.msrb.mxu0 %vm210_vm10, %v1016_v21 }
 0xbb1   :  { %2819 = vmatmul.msk.f32.vlgmr.msrb.gmra.mxu0 %vm210_vm10, %v1012_v17 }
 0xbb2   :  { %2825 = vmatpush.xpose.msk.msrb.mxu2 %vm210_vm10, %v1117_v18 }
 0xbb4   :  { %v1220_v22 = vpop.permute.xlu0 %1219 }
 0xbb5   :  { %2813 = vmatmul.msk.f32.gmra.mxu2 %vm210_vm10, %v3569_v38  ;;  %v1113_v24 = vpop.permute.xlu1 %1112  ;;  %2831 = vmatpush.xpose.msk.msra.mxu0 %vm210_vm10, %v1220_v22 }
 0xbb9   :  { %2820 = vmatmul.msk.f32.gmra.mxu0 %vm210_vm10, %v1014_v27 }
 0xbbd   :  { %2826 = vmatmul.msk.f32.vlgmr.msrb.gmra.mxu2 %vm210_vm10, %v1113_v24  ;;  %v1218_v25 = vpop.permute.xlu1 %1217 }
 0xbbe   :  { %2832 = vmatpush.xpose.msk.msra.mxu0 %vm210_vm10, %v1218_v25 }
 0xbc1   :  { %2833 = vmatmul.msk.f32.vlgmr.msra.gmra.mxu0 %vm210_vm10, %v1214_v26 }
 0xc2e   :  { %v1044_v28 = vpop.f32.mrf.mxu0 }
 0xc2f   :  { %v1050_v30 = vmul.f32 0.35355338, %v1044_v28 }
 0xc30   :  { %v943_v31 = vpop.f32.mrf.mxu2 }
 0xc31   :  { %v949_v1 = vmul.f32 0.35355338, %v943_v31  ;;  %v1052_v33 = vadd.f32 %v1050_v30, %v3328_v34 }
 0xc33   :  { %v1054_v35 = vsel %vm246_vm11, %v1052_v33, -inf  ;;  %v951_v36 = vadd.f32 %v949_v1, %v3328_v34 }
 0xc34   :  { %1055 = vmax.xlane.f32.xlu1 %v1054_v35 }
 0xc35   :  { %v953_v37 = vsel %vm246_vm11, %v951_v36, -inf }
 0xc36   :  { %954 = vmax.xlane.f32.xlu0 %v953_v37  ;;  %v1047_v4 = vpop.f32.mrf.mxu0 }
 0xc37   :  { %v1051_v39 = vmul.f32 0.35355338, %v1047_v4 }
 0xc38   :  { %v946_v41 = vpop.f32.mrf.mxu2 }
 0xc39   :  { %v950_v42 = vmul.f32 0.35355338, %v946_v41  ;;  %v1053_v43 = vadd.f32 %v1051_v39, %v3335_v40 }
 0xc3b   :  { %v952_v44 = vadd.f32 %v950_v42, %v3335_v40  ;;  %v1057_v47 = vsel %vm250_vm12, %v1053_v43, -inf }
 0xc3d   :  { %v956_v45 = vsel %vm250_vm12, %v952_v44, -inf }
 0xc3e   :  { %957 = vmax.xlane.f32.xlu2 %v956_v45  ;;  %1058 = vmax.xlane.f32.xlu0 %v1057_v47  ;;  %v1246_v48 = vpop.f32.mrf.mxu0 }
 0xc3f   :  { %v1252_v49 = vmul.f32 0.35355338, %v1246_v48 }
 0xc40   :  { %v1145_v50 = vpop.f32.mrf.mxu2 }
 0xc41   :  { %v1151_v51 = vmul.f32 0.35355338, %v1145_v50  ;;  %v1254_v52 = vadd.f32 %v1252_v49, %v3328_v34 }
 0xc43   :  { %v1153_v53 = vadd.f32 %v1151_v51, %v3328_v34  ;;  %v1256_v55 = vsel %vm246_vm11, %v1254_v52, -inf }
 0xc45   :  { %v1155_v54 = vsel %vm246_vm11, %v1153_v53, -inf }
 0xc46   :  { %1156 = vmax.xlane.f32.xlu1 %v1155_v54  ;;  %1257 = vmax.xlane.f32.xlu2 %v1256_v55 }
 0xc52   :  { %1078 = vrot.lane.b32.xlu0 %v3569_v38, %s3139_s22 }
 0xc5a   :  { %1076 = vrot.lane.b32.xlu0 %v3565_v11, %s3139_s22 }
 0xc5e   :  { %975 = vrot.lane.b32.xlu2 %v3565_v11, %s3131_s10 }
 0xc5f   :  { %977 = vrot.lane.b32.xlu1 %v3569_v38, %s3131_s10 }
 0xc62   :  { %1179 = vrot.lane.b32.xlu0 %v3569_v38, %s3140_s0 }
 0xca7   :  { %v1056_v34 = vpop.xlane.xlu1 %1055 }
 0xca8   :  { %v1060_v40 = vsub.f32 %v1052_v33, %v1056_v34 }
 0xca9   :  { %v955_v56 = vpop.xlane.xlu0 %954 }
 0xcaa   :  { %v1062_v57 = vmul.f32 1.442695, %v1060_v40  ;;  %v959_v58 = vsub.f32 %v951_v36, %v955_v56 }
 0xcac   :  { %3041 = vpow2.f32 %v1062_v57  ;;  %v961_v59 = vmul.f32 1.442695, %v959_v58 }
 0xcae   :  { %3043 = vpow2.f32 %v961_v59  ;;  %v3129_v59 = vld [vmem:[%s4249_s2 + $0xd8] sm:$0x3] }
 0xcb1   :  { %v958_v60 = vpop.xlane.xlu2 %957  ;;  %v1059_v61 = vpop.xlane.xlu0 %1058 }
 0xcb2   :  { %v3042_v62 = vpop.eup %3041  ;;  %v960_v19 = vsub.f32 %v952_v44, %v958_v60  ;;  %v1061_v63 = vsub.f32 %v1053_v43, %v1059_v61 }
 0xcb3   :  { %v1066_v0 = vsel %vm246_vm11, %v3042_v62, 0.0 }
 0xcb4   :  { %v3044_v2 = vpop.eup %3043  ;;  %v963_v20 = vmul.f32 1.442695, %v960_v19  ;;  %v1064_v3 = vmul.f32 1.442695, %v1061_v63  ;;  %1067 = vadd.xlane.f32.xlu2 %v1066_v0  ;;  %v909_v19 = vld [vmem:[%s4249_s2 + $0x1b8] sm:$0xff]  ;;  %v908_v63 = vld [vmem:[%s4249_s2 + $0x1b0] sm:$0xff] }
 0xcb5   :  { %v965_v5 = vsel %vm246_vm11, %v3044_v2, 0.0  ;;  %v907_v0 = vld [vmem:[%s4249_s2 + $0x1a8] sm:$0xff] }
 0xcb6   :  { %3045 = vpow2.f32 %v963_v20  ;;  %966 = vadd.xlane.f32.xlu0 %v965_v5 }
 0xcb7   :  { %3047 = vpow2.f32 %v1064_v3 }
 0xcb9   :  { %v1258_v6 = vpop.xlane.xlu2 %1257  ;;  %v1157_v7 = vpop.xlane.xlu1 %1156 }
 0xcba   :  { %v1262_v8 = vsub.f32 %v1254_v52, %v1258_v6  ;;  %v1161_v32 = vsub.f32 %v1153_v53, %v1157_v7 }
 0xcbc   :  { %v3046_v9 = vpop.eup %3045  ;;  %v1264_v10 = vmul.f32 1.442695, %v1262_v8  ;;  %v1163_v12 = vmul.f32 1.442695, %v1161_v32 }
 0xcbd   :  { %v3048_v13 = vpop.eup %3047  ;;  %v968_v14 = vsel %vm250_vm12, %v3046_v9, 0.0 }
 0xcbe   :  { %3049 = vpow2.f32 %v1264_v10  ;;  %969 = vadd.xlane.f32.xlu0 %v968_v14  ;;  %v1069_v15 = vsel %vm250_vm12, %v3048_v13, 0.0 }
 0xcbf   :  { %3051 = vpow2.f32 %v1163_v12  ;;  %1070 = vadd.xlane.f32.xlu1 %v1069_v15 }
 0xcc1   :  { %v976_v25 = vpop.permute.xlu2 %975 }
 0xcc4   :  { %v3050_v16 = vpop.eup %3049  ;;  %v1079_v17 = vpop.permute.xlu0 %1078 }
 0xcc5   :  { %v3052_v18 = vpop.eup %3051  ;;  %2821 = vmatpush.msk.msra.mxu1 %vm281_vm13, %v1079_v17  ;;  %v1268_v21 = vsel %vm246_vm11, %v3050_v16, 0.0 }
 0xcc6   :  { %1269 = vadd.xlane.f32.xlu0 %v1268_v21  ;;  %v1167_v22 = vsel %vm246_vm11, %v3052_v18, 0.0 }
 0xcc7   :  { %1168 = vadd.xlane.f32.xlu2 %v1167_v22 }
 0xccc   :  { %v1077_v24 = vpop.permute.xlu0 %1076 }
 0xccd   :  { %1104 = vmatpush.msra.mxu1 %v1077_v24 }
 0xcd1   :  { %v978_v27 = vpop.permute.xlu1 %977 }
 0xcd2   :  { %2814 = vmatpush.msk.msra.mxu3 %vm281_vm13, %v978_v27 }
 0xcd4   :  { %v1180_v26 = vpop.permute.xlu0 %1179  ;;  %1003 = vmatpush.msra.mxu3 %v976_v25 }
 0xcd6   :  { %2828 = vmatpush.msk.msrb.mxu3 %vm281_vm13, %v1180_v26 }
 0xcd8   :  { %1177 = vrot.lane.b32.xlu1 %v3565_v11, %s3140_s0 }
 0xcda   :  { %1278 = vrot.lane.b32.xlu0 %v3565_v11, %s3141_s23 }
 0xcdf   :  { %1280 = vrot.lane.b32.xlu2 %v3569_v38, %s3141_s23 }
 0xce0   :  { %1114 = vrot.lane.b32.xlu1 %v3569_v38, %s3137_s20 }
 0xd27   :  { %v1068_v28 = vpop.xlane.xlu2 %1067 }
 0xd28   :  { %3053 = vrcp.f32 %v1068_v28 }
 0xd29   :  { %v967_v30 = vpop.xlane.xlu0 %966 }
 0xd2a   :  { %3055 = vrcp.f32 %v967_v30 }
 0xd2e   :  { %v3054_v31 = vpop.eup %3053 }
 0xd2f   :  { %v1074_v1 = vmul.f32 %v3054_v31, %v3042_v62  ;;  %v910_v62 = vld [vmem:[%s4249_s2 + $0x1c0] sm:$0xff] }
 0xd30   :  { %v3056_v33 = vpop.eup %3055  ;;  %1363 = vmatpush.msra.mxu2 %v910_v62  ;;  %v1487_v62 = vld [vmem:[%s4249_s2 + $0x218] sm:$0xff] }
 0xd31   :  { %v973_v35 = vmul.f32 %v3056_v33, %v3044_v2  ;;  %v970_v36 = vpop.xlane.xlu0 %969  ;;  %2822 = vmatmul.msk.f32.vlgmr.msra.gmra.mxu1 %vm246_vm11, %v1074_v1  ;;  %v1431_v33 = vld [vmem:[%s4249_s2 + $0x1e0] sm:$0xff] }
 0xd32   :  { %3057 = vrcp.f32 %v970_v36  ;;  %v1071_v37 = vpop.xlane.xlu1 %1070  ;;  %1364 = vmatpush.msra.mxu2 %v909_v19  ;;  %v1429_v36 = vld [vmem:[%s4249_s2 + $0x1d0] sm:$0xff] }
 0xd33   :  { %3059 = vrcp.f32 %v1071_v37  ;;  %2815 = vmatmul.msk.f32.vlgmr.msra.gmra.mxu3 %vm246_vm11, %v973_v35  ;;  %v1430_v35 = vld [vmem:[%s4249_s2 + $0x1d8] sm:$0xff]  ;;  %v1428_v37 = vld [vmem:[%s4249_s2 + $0x1c8] sm:$0xff]  ;;  %v1486_v19 = vld [vmem:[%s4249_s2 + $0x210] sm:$0xff] }
 0xd34   :  { %1365 = vmatpush.msra.mxu2 %v908_v63 }
 0xd36   :  { %1366 = vmatpush.msra.mxu2 %v907_v0 }
 0xd38   :  { %v3058_v11 = vpop.eup %3057 }
 0xd39   :  { %v3060_v4 = vpop.eup %3059  ;;  %v974_v39 = vmul.f32 %v3058_v11, %v3046_v9  ;;  %v1270_v43 = vpop.xlane.xlu0 %1269  ;;  %v3689_v9 = vld [vmem:[%s4251_s3 + $0xb] ss:$0 sm:$0xff] }
 0xd3a   :  { %v1169_v41 = vpop.xlane.xlu2 %1168  ;;  %v1075_v42 = vmul.f32 %v3060_v4, %v3048_v13 }
 0xd3b   :  { %2816 = vmatmul.msk.f32.gmra.mxu3 %vm246_vm11, %v974_v39  ;;  %3061 = vrcp.f32 %v1169_v41 }
 0xd3c   :  { %2823 = vmatmul.msk.f32.gmra.mxu1 %vm246_vm11, %v1075_v42  ;;  %3063 = vrcp.f32 %v1270_v43 }
 0xd41   :  { %v3062_v45 = vpop.eup %3061 }
 0xd42   :  { %v1281_v44 = vpop.permute.xlu2 %1280  ;;  %v3064_v47 = vpop.eup %3063  ;;  %v1175_v48 = vmul.f32 %v3062_v45, %v3052_v18 }
 0xd43   :  { %2835 = vmatpush.msk.msrb.mxu1 %vm281_vm13, %v1281_v44  ;;  %v1276_v50 = vmul.f32 %v3064_v47, %v3050_v16 }
 0xd4a   :  { %v1178_v49 = vpop.permute.xlu1 %1177 }
 0xd4b   :  { %1205 = vmatpush.msrb.mxu3 %v1178_v49 }
 0xd4c   :  { %2829 = vmatmul.msk.f32.vlgmr.msrb.gmra.mxu3 %vm246_vm11, %v1175_v48  ;;  %v1279_v51 = vpop.permute.xlu0 %1278 }
 0xd4d   :  { %1306 = vmatpush.msrb.mxu1 %v1279_v51  ;;  %1452 = vmatpush.msra.mxu3 %v1431_v33 }
 0xd4e   :  { %2836 = vmatmul.msk.f32.vlgmr.msrb.gmra.mxu1 %vm246_vm11, %v1276_v50 }
 0xd4f   :  { %1453 = vmatpush.msra.mxu3 %v1430_v35  ;;  %v1549_v35 = vld [vmem:[%s4249_s2 + $0x230] sm:$0xff] }
 0xd51   :  { %1454 = vmatpush.msra.mxu3 %v1429_v36  ;;  %v1548_v36 = vld [vmem:[%s4249_s2 + $0x228] sm:$0xff] }
 0xd52   :  { %v1115_v52 = vpop.permute.xlu1 %1114 }
 0xd53   :  { %2827 = vmatmul.msk.f32.gmra.mxu2 %vm210_vm10, %v1115_v52  ;;  %1455 = vmatpush.msra.mxu3 %v1428_v37 }
 0xdae   :  { %v1106_v53 = vpop.f32.mrf.mxu1 }
 0xdaf   :  { %1316 = vrot.lane.b32.xlu2 %v1106_v53, %s3142_s24  ;;  %v3720_v53 = vld [vmem:[%s4251_s3 + $0xc] ss:$0 sm:$0xff] }
 0xdb6   :  { %v1005_v54 = vpop.f32.mrf.mxu3 }
 0xdb9   :  { %v3657_v55 = vpop.f32.mrf.mxu1 }
 0xdbe   :  { %v3659_v34 = vpop.f32.mrf.mxu3 }
 0xdcb   :  { %v1308_v40 = vpop.f32.mrf.mxu1 }
 0xdcc   :  { %1332 = vrot.lane.b32.xlu2 %v1308_v40, %s3144_s26 }
 0xdcf   :  { %v1207_v56 = vpop.f32.mrf.mxu3 }
 0xdd0   :  { %1324 = vrot.lane.b32.xlu1 %v1207_v56, %s3143_s25  ;;  %v3725_v56 = vld [vmem:[%s4251_s3 + $0xd] ss:$0 sm:$0xff] }
 0xdd6   :  { %v1148_v57 = vpop.f32.mrf.mxu2 }
 0xdd7   :  { %v1152_v58 = vmul.f32 0.35355338, %v1148_v57 }
 0xdd9   :  { %v1154_v60 = vadd.f32 %v3129_v59, %v1152_v58 }
 0xddb   :  { %v1158_v61 = vsel %vm250_vm12, %v1154_v60, -inf }
 0xddc   :  { %1159 = vmax.xlane.f32.xlu0 %v1158_v61  ;;  %v1488_v61 = vld [vmem:[%s4249_s2 + $0x220] sm:$0xff] }
 0xddd   :  { %1505 = vmatpush.msrb.mxu0 %v1488_v61  ;;  %v1582_v61 = vld [vmem:[%s4249_s2 + $0x258] sm:$0xff] }
 0xddf   :  { %1506 = vmatpush.msrb.mxu0 %v1487_v62  ;;  %v1581_v62 = vld [vmem:[%s4249_s2 + $0x250] sm:$0xff] }
 0xde1   :  { %1507 = vmatpush.msrb.mxu0 %v1486_v19  ;;  %v1580_v19 = vld [vmem:[%s4249_s2 + $0x248] sm:$0xff] }
 0xdf0   :  { %1215 = vrot.lane.b32.xlu0 %v3569_v38, %s3138_s21 }
 0xe09   :  { %v1317_v38 = vpop.permute.xlu2 %1316 }
 0xe0a   :  { %v1338_v2 = vsel %vm210_vm10, %v1005_v54, %v1317_v38  ;;  %v1485_v38 = vld [vmem:[%s4249_s2 + $0x208] sm:$0xff] }
 0xe0b   :  { %1508 = vmatpush.msrb.mxu0 %v1485_v38 }
 0xe26   :  { %v1333_v3 = vpop.permute.xlu2 %1332 }
 0xe42   :  { %v1325_v20 = vpop.permute.xlu1 %1324 }
 0xe43   :  { %v1340_v5 = vsel %vm636_vm14, %v1338_v2, %v1325_v20  ;;  %v1484_v2 = vld [vmem:[%s4249_s2 + $0x200] sm:$0xff]  ;;  %v1483_v20 = vld [vmem:[%s4249_s2 + $0x1f8] sm:$0xff] }
 0xe44   :  { %v1342_v6 = vsel %vm639_vm15, %v1340_v5, %v1333_v3  ;;  %1509 = vmatpush.msrb.mxu0 %v1484_v2  ;;  %v1482_v3 = vld [vmem:[%s4249_s2 + $0x1f0] sm:$0xff]  ;;  %v1481_v5 = vld [vmem:[%s4249_s2 + $0x1e8] sm:$0xff] }
 0xe45   :  { %2838 = vmatmul.msk.f32.vlgmr.msra.gmra.mxu2 %vm103_vm1, %v1342_v6  ;;  %v3759_v6 = vld [vmem:[%s4251_s3 + $0xe] ss:$0 sm:$0xff] }
 0xe46   :  { %1510 = vmatpush.msrb.mxu0 %v1483_v20 }
 0xe48   :  { %1511 = vmatpush.msrb.mxu0 %v1482_v3 }
 0xe4a   :  { %1512 = vmatpush.msrb.mxu0 %v1481_v5 }
 0xe4f   :  { %v1160_v7 = vpop.xlane.xlu0 %1159 }
 0xe50   :  { %v1162_v32 = vsub.f32 %v1154_v60, %v1160_v7 }
 0xe52   :  { %v1165_v10 = vmul.f32 1.442695, %v1162_v32 }
 0xe54   :  { %3065 = vpow2.f32 %v1165_v10 }
 0xe5a   :  { %v3066_v16 = vpop.eup %3065 }
 0xe5b   :  { %v1170_v17 = vsel %vm250_vm12, %v3066_v16, 0.0 }
 0xe62   :  { %v1216_v8 = vpop.permute.xlu0 %1215 }
 0xe63   :  { %2834 = vmatmul.msk.f32.gmra.mxu0 %vm210_vm10, %v1216_v8 }
 0xec8   :  { %v1368_v12 = vpop.f32.mrf.mxu2 }
 0xec9   :  { %v1369_v13 = vadd.f32 %v3689_v9, %v1368_v12 }
 0xecb   :  { %v3693_v14 = vadd.f32 %v1369_v13, %v3525_v23 }
 0xecd   :  { %v1376_v15 = vsel %vm103_vm1, %v3693_v14, 0.0 }
 0xece   :  { %1377 = vadd.xlane.f32.xlu1 %v1376_v15 }
 0xed6   :  { %1171 = vadd.xlane.f32.xlu1 %v1170_v17 }
 0xee0   :  { %v1249_v24 = vpop.f32.mrf.mxu0 }
 0xee1   :  { %v1253_v25 = vmul.f32 0.35355338, %v1249_v24 }
 0xee3   :  { %v1255_v28 = vadd.f32 %v3129_v59, %v1253_v25 }
 0xee5   :  { %v1259_v31 = vsel %vm250_vm12, %v1255_v28, -inf }
 0xf41   :  { %v1378_v18 = vpop.xlane.xlu1 %1377 }
 0xf42   :  { %v1382_v21 = vmul.f32 %v1378_v18, %v3270_v46 }
 0xf44   :  { %v1384_v22 = vsub.f32 %v3693_v14, %v1382_v21 }
 0xf46   :  { %v1386_v27 = vmul.f32 %v1384_v22, %v1384_v22 }
 0xf48   :  { %v1388_v23 = vsel %vm103_vm1, %v1386_v27, 0.0 }
 0xf49   :  { %1389 = vadd.xlane.f32.xlu2 %v1388_v23  ;;  %v1172_v26 = vpop.xlane.xlu1 %1171 }
 0xf4a   :  { %3067 = vrcp.f32 %v1172_v26 }
 0xf50   :  { %v3068_v30 = vpop.eup %3067 }
 0xf51   :  { %1260 = vmax.xlane.f32.xlu2 %v1259_v31  ;;  %v1176_v1 = vmul.f32 %v3068_v30, %v3066_v16 }
 0xf53   :  { %2830 = vmatmul.msk.f32.gmra.mxu3 %vm246_vm11, %v1176_v1 }
 0xfbc   :  { %v1390_v11 = vpop.xlane.xlu2 %1389 }
 0xfbd   :  { %v1394_v4 = vmul.f32 %v1390_v11, %v3270_v46 }
 0xfbf   :  { %v1396_v39 = vadd.f32 1e-12, %v1394_v4 }
 0xfc1   :  { %3069 = vrsqrt.f32 %v1396_v39  ;;  %vm1404_vm9 = vweird.f32 %v1396_v39 }
 0xfc4   :  { %v1261_v41 = vpop.xlane.xlu2 %1260 }
 0xfc5   :  { %v1263_v42 = vsub.f32 %v1255_v28, %v1261_v41 }
 0xfc7   :  { %v3070_v43 = vpop.eup %3069  ;;  %v1266_v44 = vmul.f32 1.442695, %v1263_v42 }
 0xfc8   :  { %v1399_v45 = vmul.f32 %v3070_v43, %v1396_v39  ;;  %vm1405_vm8 = vweird.f32 %v3070_v43 }
 0xfc9   :  { %3071 = vpow2.f32 %v1266_v44  ;;  %vm1406_vm3 = vmor %vm1404_vm9, %vm1405_vm8 }
 0xfca   :  { %v1400_v47 = vmul.f32 %v3070_v43, %v1399_v45 }
 0xfcc   :  { %v1401_v48 = vmul.f32 0.5, %v1400_v47 }
 0xfce   :  { %v1402_v49 = vsub.f32 1.5, %v1401_v48 }
 0xfcf   :  { %v3072_v50 = vpop.eup %3071 }
 0xfd0   :  { %v1403_v51 = vmul.f32 %v3070_v43, %v1402_v49  ;;  %v1271_v52 = vsel %vm250_vm12, %v3072_v50, 0.0  ;;  %v2963_v49 = vld [vmem:[%s4251_s3 + $0x10] ss:$0 sm:$0xff] }
 0xfd1   :  { %1272 = vadd.xlane.f32.xlu1 %v1271_v52 }
 0xfd2   :  { %v1407_v54 = vsel %vm1406_vm3, %v3070_v43, %v1403_v51 }
 0xfd3   :  { %v1418_v40 = vmul.f32 %v1407_v54, %v1384_v22  ;;  %v2962_v22 = vld [vmem:[%s4251_s3 + $0xf] ss:$0 sm:$0xff]  ;;  %v2964_v54 = vld [vmem:[%s4251_s3 + $0x11] ss:$0 sm:$0xff] }
 0xfd5   :  { %v1422_v57 = vmul.f32 %v3720_v53, %v1418_v40 }
 0xfd6   :  { %v1210_v58 = vpop.f32.mrf.mxu3 }
 0xfd7   :  { %1326 = vrot.lane.b32.xlu0 %v1210_v58, %s3143_s25  ;;  %v1426_v59 = vadd.f32 %v3725_v56, %v1422_v57 }
 0xfd9   :  { %2840 = vmatmul.msk.f32.vlgmr.msra.gmra.mxu3 %vm103_vm1, %v1426_v59 }
0x1044   :  { %v1273_v60 = vpop.xlane.xlu1 %1272 }
0x1045   :  { %3073 = vrcp.f32 %v1273_v60  ;;  %v1583_v60 = vld [vmem:[%s4249_s2 + $0x260] sm:$0xff] }
0x1049   :  { %v1327_v51 = vpop.permute.xlu0 %1326 }
0x104b   :  { %v3074_v63 = vpop.eup %3073 }
0x104c   :  { %v1277_v0 = vmul.f32 %v3074_v63, %v3072_v50  ;;  %v2965_v63 = vld [vmem:[%s4251_s3 + $0x12] ss:$0 sm:$0xff] }
0x104e   :  { %2837 = vmatmul.msk.f32.gmra.mxu1 %vm246_vm11, %v1277_v0 }
0x105c   :  { %v1457_v7 = vpop.f32.mrf.mxu3 }
0x105d   :  { %v1458_v8 = vadd.f32 %v3759_v6, %v1457_v7 }
0x105f   :  { %v1463_v32 = vmul.f32 %v1458_v8, %v1458_v8 }
0x1061   :  { %v1465_v10 = vmul.f32 %v1463_v32, %v1458_v8 }
0x1063   :  { %v1467_v12 = vmul.f32 0.044715, %v1465_v10 }
0x1065   :  { %v1469_v13 = vadd.f32 %v1467_v12, %v1458_v8 }
0x1067   :  { %v1471_v15 = vmul.f32 0.7978846, %v1469_v13 }
0x1069   :  { %3075 = vtanh.f32 %v1471_v15 }
0x106f   :  { %v3076_v16 = vpop.eup %3075 }
0x1070   :  { %v1475_v17 = vadd.f32 1.0, %v3076_v16 }
0x1072   :  { %v1477_v18 = vmul.f32 0.5, %v1475_v17 }
0x1074   :  { %v1479_v21 = vmul.f32 %v1477_v18, %v1458_v8  ;;  %v1670_v18 = vld [vmem:[%s4249_s2 + $0x2a0] sm:$0xff] }
0x1075   :  { %1691 = vmatpush.msrb.mxu3 %v1670_v18 }
0x1076   :  { %2842 = vmatmul.msk.f32.vlgmr.msrb.gmra.mxu0 %vm50_vm0, %v1479_v21  ;;  %v1669_v21 = vld [vmem:[%s4249_s2 + $0x298] sm:$0xff] }
0x1077   :  { %1692 = vmatpush.msrb.mxu3 %v1669_v21 }
0x10cb   :  { %v1311_v33 = vpop.f32.mrf.mxu1 }
0x10f3   :  { %v1514_v24 = vpop.f32.mrf.mxu0 }
0x10f4   :  { %v1515_v27 = vadd.f32 %v2962_v22, %v1514_v24  ;;  %v1668_v22 = vld [vmem:[%s4249_s2 + $0x290] sm:$0xff] }
0x10f5   :  { %1693 = vmatpush.msrb.mxu3 %v1668_v22 }
0x10f6   :  { %v1519_v25 = vadd.f32 %v1515_v27, %v3693_v14  ;;  %v1551_v14 = vld [vmem:[%s4249_s2 + $0x240] sm:$0xff] }
0x10f7   :  { %1569 = vmatpush.msra.mxu1 %v1551_v14 }
0x10f8   :  { %v1520_v23 = vsel %vm103_vm1, %v1519_v25, 0.0 }
0x10f9   :  { %1521 = vadd.xlane.f32.xlu2 %v1520_v23 }
0x1111   :  { %1318 = vrot.lane.b32.xlu2 %v3657_v55, %s3142_s24  ;;  %v1550_v55 = vld [vmem:[%s4249_s2 + $0x238] sm:$0xff] }
0x1112   :  { %1570 = vmatpush.msra.mxu1 %v1550_v55 }
0x1114   :  { %1571 = vmatpush.msra.mxu1 %v1549_v35 }
0x1116   :  { %1572 = vmatpush.msra.mxu1 %v1548_v36 }
0x1118   :  { %1601 = vmatpush.msrb.mxu1 %v1583_v60  ;;  %v2968_v60 = vld [vmem:[%s4251_s3 + $0x18] ss:$0 sm:$0xff] }
0x111a   :  { %1602 = vmatpush.msrb.mxu1 %v1582_v61 }
0x111c   :  { %1603 = vmatpush.msrb.mxu1 %v1581_v62 }
0x111e   :  { %1604 = vmatpush.msrb.mxu1 %v1580_v19 }
0x116c   :  { %v1522_v26 = vpop.xlane.xlu2 %1521 }
0x116d   :  { %v1523_v28 = vmul.f32 %v1522_v26, %v3270_v46 }
0x116f   :  { %v1524_v30 = vsub.f32 %v1519_v25, %v1523_v28 }
0x1171   :  { %v1525_v31 = vmul.f32 %v1524_v30, %v1524_v30 }
0x1173   :  { %v1526_v1 = vsel %vm103_vm1, %v1525_v31, 0.0 }
0x1174   :  { %1527 = vadd.xlane.f32.xlu1 %v1526_v1  ;;  %v1319_v44 = vpop.permute.xlu2 %1318 }
0x1175   :  { %v1339_v48 = vsel %vm210_vm10, %v3659_v34, %v1319_v44  ;;  %v1639_v44 = vld [vmem:[%s4249_s2 + $0x270] sm:$0xff] }
0x1176   :  { %v1341_v57 = vsel %vm636_vm14, %v1339_v48, %v1327_v51 }
0x118d   :  { %1334 = vrot.lane.b32.xlu1 %v1311_v33, %s3144_s26 }
0x11e7   :  { %v1528_v37 = vpop.xlane.xlu1 %1527 }
0x11e8   :  { %v1529_v11 = vmul.f32 %v1528_v37, %v3270_v46 }
0x11ea   :  { %v1530_v4 = vadd.f32 1e-12, %v1529_v11 }
0x11ec   :  { %3077 = vrsqrt.f32 %v1530_v4  ;;  %vm1537_vm12 = vweird.f32 %v1530_v4 }
0x11f2   :  { %v3078_v39 = vpop.eup %3077 }
0x11f3   :  { %v1532_v41 = vmul.f32 %v3078_v39, %v1530_v4  ;;  %vm1538_vm11 = vweird.f32 %v3078_v39 }
0x11f4   :  { %vm1539_vm4 = vmor %vm1537_vm12, %vm1538_vm11  ;;  %vm1738_vm11 = vcmask 123904  }
0x11f5   :  { %v1533_v42 = vmul.f32 %v3078_v39, %v1532_v41  ;;  %v1667_v41 = vld [vmem:[%s4249_s2 + $0x288] sm:$0xff] }
0x11f6   :  { %1694 = vmatpush.msrb.mxu3 %v1667_v41 }
0x11f7   :  { %v1534_v43 = vmul.f32 0.5, %v1533_v42  ;;  %v3844_v42 = vld [vmem:[%s4252_s1] sm:$0xff] }
0x11f9   :  { %v1535_v45 = vsub.f32 1.5, %v1534_v43  ;;  %v1640_v43 = vld [vmem:[%s4249_s2 + $0x278] sm:$0xff] }
0x11fb   :  { %v1536_v47 = vmul.f32 %v3078_v39, %v1535_v45  ;;  %v1638_v45 = vld [vmem:[%s4249_s2 + $0x268] sm:$0xff] }
0x11fd   :  { %v1540_v50 = vsel %vm1539_vm4, %v3078_v39, %v1536_v47 }
0x11fe   :  { %v1541_v52 = vmul.f32 %v1540_v50, %v1524_v30 }
0x11ff   :  { %v1335_v40 = vpop.permute.xlu1 %1334 }
0x1200   :  { %v1544_v58 = vmul.f32 %v2963_v49, %v1541_v52  ;;  %v1343_v59 = vsel %vm639_vm15, %v1341_v57, %v1335_v40 }
0x1201   :  { %2839 = vmatmul.msk.f32.gmra.mxu2 %vm103_vm1, %v1343_v59 }
0x1202   :  { %v1547_v34 = vadd.f32 %v2964_v54, %v1544_v58  ;;  %v2967_v58 = vld [vmem:[%s4251_s3 + $0x17] ss:$0 sm:$0xff] }
0x1204   :  { %2844 = vmatmul.msk.f32.vlgmr.msra.gmra.mxu1 %vm103_vm1, %v1547_v34 }
0x1281   :  { %v1574_v0 = vpop.f32.mrf.mxu1 }
0x1282   :  { %v1575_v38 = vadd.f32 %v2965_v63, %v1574_v0 }
0x1284   :  { %3079 = vtanh.f32 %v1575_v38  ;;  %v1371_v2 = vpop.f32.mrf.mxu2 }
0x1285   :  { %v1372_v20 = vadd.f32 %v3689_v9, %v1371_v2  ;;  %v2966_v9 = vld [vmem:[%s4251_s3 + $0x13] ss:$0 sm:$0xff] }
0x1287   :  { %v1375_v3 = vadd.f32 %v1372_v20, %v3530_v29 }
0x1289   :  { %v1379_v5 = vsel %vm107_vm2, %v1375_v3, 0.0 }
0x128a   :  { %v3080_v7 = vpop.eup %3079  ;;  %1380 = vadd.xlane.f32.xlu0 %v1379_v5 }
0x128b   :  { %2845 = vmatmul.msk.f32.vlgmr.msrb.gmra.mxu1 %vm103_vm1, %v3080_v7 }
0x12fd   :  { %v1381_v8 = vpop.xlane.xlu0 %1380 }
0x12fe   :  { %v1383_v32 = vmul.f32 %v1381_v8, %v3270_v46 }
0x1300   :  { %v1385_v10 = vsub.f32 %v1375_v3, %v1383_v32 }
0x1302   :  { %v1387_v12 = vmul.f32 %v1385_v10, %v1385_v10 }
0x1304   :  { %v1391_v13 = vsel %vm107_vm2, %v1387_v12, 0.0 }
0x1305   :  { %1392 = vadd.xlane.f32.xlu1 %v1391_v13 }
0x1308   :  { %v1606_v15 = vpop.f32.mrf.mxu1 }
0x1309   :  { %v1607_v29 = vadd.f32 %v2966_v9, %v1606_v15 }
0x130b   :  { %v1609_v16 = vadd.f32 %v3080_v7, %v1607_v29  ;;  %v2970_v29 = vld [vmem:[%s4251_s3 + $0x14] ss:$0 sm:$0xff] }
0x130d   :  { %v1610_v17 = vsel %vm107_vm2, %v1609_v16, 0.0 }
0x130e   :  { %1611 = vadd.xlane.f32.xlu2 %v1610_v17 }
0x1378   :  { %v1393_v24 = vpop.xlane.xlu1 %1392 }
0x1379   :  { %v1395_v27 = vmul.f32 %v1393_v24, %v3270_v46 }
0x137b   :  { %v1397_v25 = vadd.f32 1e-12, %v1395_v27 }
0x137d   :  { %3081 = vrsqrt.f32 %v1397_v25  ;;  %vm1414_vm6 = vweird.f32 %v1397_v25 }
0x1381   :  { %v1612_v23 = vpop.xlane.xlu2 %1611 }
0x1382   :  { %v1613_v26 = vmul.f32 %v1612_v23, %v3270_v46  ;;  %v3901_v23 = vld [vmem:[%s4249_s2 + $0xe0] sm:$0x3] }
0x1383   :  { %v3082_v28 = vpop.eup %3081 }
0x1384   :  { %v1409_v30 = vmul.f32 %v3082_v28, %v1397_v25  ;;  %v1614_v31 = vsub.f32 %v1609_v16, %v1613_v26  ;;  %vm1415_vm5 = vweird.f32 %v3082_v28 }
0x1385   :  { %vm1416_vm7 = vmor %vm1414_vm6, %vm1415_vm5 }
0x1386   :  { %v1410_v1 = vmul.f32 %v3082_v28, %v1409_v30  ;;  %v1615_v33 = vmul.f32 %v1614_v31, %v1614_v31 }
0x1388   :  { %v1411_v14 = vmul.f32 0.5, %v1410_v1  ;;  %v1616_v55 = vsel %vm107_vm2, %v1615_v33, 0.0 }
0x1389   :  { %1617 = vadd.xlane.f32.xlu0 %v1616_v55 }
0x138a   :  { %v1412_v35 = vsub.f32 1.5, %v1411_v14 }
0x138c   :  { %v1413_v36 = vmul.f32 %v3082_v28, %v1412_v35 }
0x138e   :  { %v1417_v37 = vsel %vm1416_vm7, %v3082_v28, %v1413_v36 }
0x138f   :  { %v1419_v11 = vmul.f32 %v1417_v37, %v1385_v10  ;;  %v2969_v10 = vld [vmem:[%s4251_s3 + $0x15] ss:$0 sm:$0xff] }
0x1391   :  { %v1423_v4 = vmul.f32 %v3720_v53, %v1419_v11  ;;  %v3851_v53 = vld [vmem:[%s4252_s1 + $0x8] sm:$0xff] }
0x1393   :  { %v1427_v39 = vadd.f32 %v3725_v56, %v1423_v4  ;;  %v1641_v56 = vld [vmem:[%s4249_s2 + $0x280] sm:$0xff] }
0x1394   :  { %1659 = vmatpush.msrb.mxu2 %v1641_v56 }
0x1395   :  { %2841 = vmatmul.msk.f32.gmra.mxu3 %vm103_vm1, %v1427_v39 }
0x1396   :  { %1660 = vmatpush.msrb.mxu2 %v1640_v43 }
0x1398   :  { %1661 = vmatpush.msrb.mxu2 %v1639_v44 }
0x139a   :  { %1662 = vmatpush.msrb.mxu2 %v1638_v45 }
0x139d   :  { %2847 = vmatmul.msk.f32.vlgmr.msrb.gmra.mxu3 %vm103_vm1, %v3844_v42 }
0x13a5   :  { %2848 = vmatmul.msk.f32.gmra.mxu3 %vm103_vm1, %v3851_v53 }
0x13fc   :  { %v1618_v47 = vpop.xlane.xlu0 %1617 }
0x13fd   :  { %v1619_v48 = vmul.f32 %v1618_v47, %v3270_v46 }
0x13ff   :  { %v1620_v49 = vadd.f32 1e-05, %v1619_v48 }
0x1401   :  { %3083 = vrsqrt.f32 %v1620_v49  ;;  %vm1627_vm9 = vweird.f32 %v1620_v49 }
0x1407   :  { %v3084_v50 = vpop.eup %3083 }
0x1408   :  { %v1622_v51 = vmul.f32 %v3084_v50, %v1620_v49  ;;  %vm1628_vm8 = vweird.f32 %v3084_v50 }
0x1409   :  { %vm1629_vm3 = vmor %vm1627_vm9, %vm1628_vm8 }
0x140a   :  { %v1623_v52 = vmul.f32 %v3084_v50, %v1622_v51 }
0x140c   :  { %v1624_v54 = vmul.f32 0.5, %v1623_v52 }
0x140e   :  { %v1625_v40 = vsub.f32 1.5, %v1624_v54 }
0x1410   :  { %v1626_v57 = vmul.f32 %v3084_v50, %v1625_v40 }
0x1412   :  { %v1630_v59 = vsel %vm1629_vm3, %v3084_v50, %v1626_v57 }
0x1413   :  { %v1631_v34 = vmul.f32 %v1630_v59, %v1614_v31 }
0x1415   :  { %v1634_v61 = vmul.f32 %v2967_v58, %v1631_v34 }
0x1417   :  { %v3874_v62 = vadd.f32 %v2968_v60, %v1634_v61 }
0x1418   :  { %v1460_v19 = vpop.f32.mrf.mxu3 }
0x1419   :  { %v1461_v63 = vadd.f32 %v3759_v6, %v1460_v19  ;;  %2846 = vmatmul.msk.f32.vlgmr.msrb.gmra.mxu2 %vm103_vm1, %v3874_v62 }
0x141b   :  { %v1464_v0 = vmul.f32 %v1461_v63, %v1461_v63 }
0x141d   :  { %v1466_v38 = vmul.f32 %v1464_v0, %v1461_v63 }
0x141f   :  { %v1468_v2 = vmul.f32 0.044715, %v1466_v38 }
0x1420   :  { %v1696_v6 = vpop.f32.mrf.mxu3 }
0x1421   :  { %v1470_v20 = vadd.f32 %v1468_v2, %v1461_v63  ;;  %v1697_v12 = vadd.f32 %v2969_v10, %v1696_v6 }
0x1423   :  { %v1472_v3 = vmul.f32 0.7978846, %v1470_v20  ;;  %1781 = vrot.lane.b32.xlu2 %v1697_v12, %s3132_s11 }
0x1425   :  { %3085 = vtanh.f32 %v1472_v3 }
0x1428   :  { %v1699_v13 = vpop.f32.mrf.mxu3 }
0x1429   :  { %v1700_v9 = vadd.f32 %v2969_v10, %v1699_v13 }
0x142b   :  { %v3086_v5 = vpop.eup %3085  ;;  %2849 = vmatpush.xpose.msk.msra.mxu0 %vm210_vm10, %v1700_v9  ;;  %v3885_v15 = vpack.i.bf16 %v1697_v12, %v1700_v9  ;;  %1855 = vrot.lane.b32.xlu2 %v1697_v12, %s3137_s20 }
0x142c   :  { %v1476_v7 = vadd.f32 1.0, %v3086_v5 }
0x142d   :  { %2908 = vrot.lane.b32.xlu1 %v3885_v15, %s3133_s12 }
0x142e   :  { %v1478_v8 = vmul.f32 0.5, %v1476_v7 }
0x142f   :  { %2850 = vmatpush.xpose.msk.msra.mxu0 %vm210_vm10, %v1697_v12 }
0x1430   :  { %v1480_v32 = vmul.f32 %v1478_v8, %v1461_v63 }
0x1432   :  { %2843 = vmatmul.msk.f32.gmra.mxu0 %vm50_vm0, %v1480_v32 }
0x1435   :  { %1931 = vrot.lane.b32.xlu1 %v1700_v9, %s3138_s21 }
0x147d   :  { %v1782_v36 = vpop.permute.xlu2 %1781 }
0x1485   :  { %v1856_v4 = vpop.permute.xlu2 %1855 }
0x149c   :  { %v1664_v16 = vpop.f32.mrf.mxu2 }
0x149d   :  { %v1665_v17 = vadd.f32 %v2970_v29, %v1664_v16 }
0x149f   :  { %1853 = vrot.lane.b32.xlu1 %v1665_v17, %s3137_s20  ;;  %2851 = vmatmul.msk.f32.vlgmr.msra.gmra.mxu0 %vm210_vm10, %v1665_v17  ;;  %v2909_v21 = vpop.permute.xlu1 %2908 }
0x14a0   :  { %v2911_v22 = vunpack.i.h.bf16 %v2909_v21  ;;  %v2910_v24 = vunpack.i.l.bf16 %v2909_v21 }
0x14a2   :  { %1773 = vmatpush.msra.mxu1 %v2910_v24 }
0x14a4   :  { %1774 = vmatpush.msra.mxu1 %v2911_v22 }
0x14a7   :  { %v1932_v27 = vpop.permute.xlu1 %1931 }
0x14a8   :  { %2861 = vmatpush.xpose.msk.msra.mxu3 %vm210_vm10, %v1932_v27 }
0x14af   :  { %v1517_v18 = vpop.f32.mrf.mxu0 }
0x1511   :  { %v1854_v45 = vpop.permute.xlu1 %1853 }
0x151c   :  { %v1733_v25 = vpop.f32.mrf.mxu0 }
0x151d   :  { %v1736_v26 = vmul.f32 0.35355338, %v1733_v25 }
0x151f   :  { %v1737_v28 = vadd.f32 %v1736_v26, %v3901_v23 }
0x1521   :  { %v1739_v30 = vsel %vm1738_vm11, %v1737_v28, -inf }
0x1522   :  { %1740 = vmax.xlane.f32.xlu0 %v1739_v30 }
0x1536   :  { %1783 = vrot.lane.b32.xlu0 %v1700_v9, %s3132_s11 }
0x153e   :  { %1779 = vrot.lane.b32.xlu0 %v1665_v17, %s3132_s11 }
0x1546   :  { %1857 = vrot.lane.b32.xlu0 %v1700_v9, %s3137_s20 }
0x154e   :  { %1929 = vrot.lane.b32.xlu0 %v1697_v12, %s3138_s21 }
0x1595   :  { %v1741_v31 = vpop.xlane.xlu0 %1740 }
0x1596   :  { %v1742_v1 = vsub.f32 %v1737_v28, %v1741_v31 }
0x1598   :  { %v1743_v33 = vmul.f32 1.442695, %v1742_v1 }
0x159a   :  { %3087 = vpow2.f32 %v1743_v33 }
0x15a0   :  { %v3088_v14 = vpop.eup %3087 }
0x15a1   :  { %v1745_v55 = vsel %vm1738_vm11, %v3088_v14, 0.0 }
0x15a2   :  { %1746 = vadd.xlane.f32.xlu2 %v1745_v55 }
0x15a8   :  { %v1784_v35 = vpop.permute.xlu0 %1783 }
0x15a9   :  { %2853 = vmatpush.xpose.msk.msra.mxu2 %vm210_vm10, %v1784_v35 }
0x15ad   :  { %2854 = vmatpush.xpose.msk.msra.mxu2 %vm210_vm10, %v1782_v36  ;;  %v1705_v36 = vld [vmem:[%s4249_s2 + $0x2c0] sm:$0xff] }
0x15b0   :  { %v1780_v37 = vpop.permute.xlu0 %1779 }
0x15b1   :  { %2855 = vmatmul.msk.f32.vlgmr.msra.gmra.mxu2 %vm210_vm10, %v1780_v37  ;;  %v1704_v37 = vld [vmem:[%s4249_s2 + $0x2b8] sm:$0xff] }
0x15b8   :  { %v1858_v11 = vpop.permute.xlu0 %1857 }
0x15b9   :  { %2857 = vmatpush.xpose.msk.msrb.mxu1 %vm210_vm10, %v1858_v11  ;;  %v1703_v11 = vld [vmem:[%s4249_s2 + $0x2b0] sm:$0xff] }
0x15ba   :  { %1927 = vrot.lane.b32.xlu2 %v1665_v17, %s3138_s21 }
0x15bd   :  { %2858 = vmatpush.xpose.msk.msrb.mxu1 %vm210_vm10, %v1856_v4  ;;  %v1702_v4 = vld [vmem:[%s4249_s2 + $0x2a8] sm:$0xff] }
0x15c0   :  { %v1930_v39 = vpop.permute.xlu0 %1929 }
0x15c1   :  { %2862 = vmatpush.xpose.msk.msra.mxu3 %vm210_vm10, %v1930_v39 }
0x1615   :  { %v1747_v41 = vpop.xlane.xlu2 %1746 }
0x1616   :  { %3089 = vrcp.f32 %v1747_v41 }
0x161c   :  { %v3090_v56 = vpop.eup %3089 }
0x161d   :  { %v1749_v43 = vmul.f32 %v3090_v56, %v3088_v14  ;;  %v1928_v44 = vpop.permute.xlu2 %1927 }
0x161e   :  { %2863 = vmatmul.msk.f32.vlgmr.msra.gmra.mxu3 %vm210_vm10, %v1928_v44 }
0x161f   :  { %2852 = vmatmul.msk.f32.vlgmr.msra.gmra.mxu1 %vm636_vm14, %v1749_v43 }
0x1620   :  { %2032 = vmatpush.msra.mxu1 %v1705_v36 }
0x1622   :  { %2033 = vmatpush.msra.mxu1 %v1704_v37  ;;  %v2164_v37 = vld [vmem:[%s4249_s2 + $0x340] sm:$0xff] }
0x1624   :  { %2034 = vmatpush.msra.mxu1 %v1703_v11  ;;  %v2163_v11 = vld [vmem:[%s4249_s2 + $0x338] sm:$0xff] }
0x1626   :  { %2035 = vmatpush.msra.mxu1 %v1702_v4  ;;  %v2162_v4 = vld [vmem:[%s4249_s2 + $0x330] sm:$0xff] }
0x1627   :  { %2859 = vmatmul.msk.f32.vlgmr.msrb.gmra.mxu1 %vm210_vm10, %v1854_v45 }
0x1634   :  { %v1808_v47 = vpop.f32.mrf.mxu2 }
0x1635   :  { %v1811_v48 = vmul.f32 0.35355338, %v1808_v47  ;;  %v2971_v47 = vld [vmem:[%s4251_s3 + $0x16] ss:$0 sm:$0xff] }
0x1637   :  { %v1812_v49 = vadd.f32 %v1811_v48, %v3901_v23 }
0x1639   :  { %v1813_v50 = vsel %vm1738_vm11, %v1812_v49, -inf }
0x163a   :  { %1814 = vmax.xlane.f32.xlu0 %v1813_v50 }
0x169c   :  { %v3922_v51 = vpop.f32.mrf.mxu1 }
0x16a1   :  { %v1956_v52 = vpop.f32.mrf.mxu3 }
0x16a2   :  { %v1959_v54 = vmul.f32 0.35355338, %v1956_v52 }
0x16a4   :  { %v1882_v40 = vpop.f32.mrf.mxu1  ;;  %v1960_v57 = vadd.f32 %v1959_v54, %v3901_v23 }
0x16a5   :  { %v1885_v58 = vmul.f32 0.35355338, %v1882_v40 }
0x16a6   :  { %v1961_v59 = vsel %vm1738_vm11, %v1960_v57, -inf }
0x16a7   :  { %1962 = vmax.xlane.f32.xlu2 %v1961_v59  ;;  %v1886_v34 = vadd.f32 %v1885_v58, %v3901_v23  ;;  %v2072_v59 = vld [vmem:[%s4249_s2 + $0x2e0] sm:$0xff] }
0x16a9   :  { %v1887_v60 = vsel %vm1738_vm11, %v1886_v34, -inf }
0x16aa   :  { %1888 = vmax.xlane.f32.xlu1 %v1887_v60  ;;  %v2069_v60 = vld [vmem:[%s4249_s2 + $0x2c8] sm:$0xff] }
0x16ad   :  { %v1815_v61 = vpop.xlane.xlu0 %1814 }
0x16ae   :  { %v1816_v19 = vsub.f32 %v1812_v49, %v1815_v61  ;;  %v2106_v61 = vld [vmem:[%s4249_s2 + $0x320] sm:$0xff] }
0x16af   :  { %2120 = vmatpush.msrb.mxu3 %v2106_v61 }
0x16b0   :  { %v1817_v63 = vmul.f32 1.442695, %v1816_v19  ;;  %v2105_v19 = vld [vmem:[%s4249_s2 + $0x318] sm:$0xff] }
0x16b1   :  { %2121 = vmatpush.msrb.mxu3 %v2105_v19  ;;  %v2251_v19 = vld [vmem:[%s4249_s2 + $0x380] sm:$0xff] }
0x16b2   :  { %3091 = vpow2.f32 %v1817_v63  ;;  %v2104_v63 = vld [vmem:[%s4249_s2 + $0x310] sm:$0xff] }
0x16b3   :  { %2122 = vmatpush.msrb.mxu3 %v2104_v63  ;;  %v2250_v63 = vld [vmem:[%s4249_s2 + $0x378] sm:$0xff] }
0x16b8   :  { %v3092_v0 = vpop.eup %3091 }
0x16b9   :  { %v1819_v38 = vsel %vm1738_vm11, %v3092_v0, 0.0 }
0x16ba   :  { %1820 = vadd.xlane.f32.xlu0 %v1819_v38 }
0x16bf   :  { %2913 = vrot.lane.b32.xlu2 %v3885_v15, %s3135_s18 }
0x16ce   :  { %2918 = vrot.lane.b32.xlu0 %v3885_v15, %s3134_s13 }
0x171a   :  { %v1963_v2 = vpop.xlane.xlu2 %1962 }
0x171b   :  { %v1964_v20 = vsub.f32 %v1960_v57, %v1963_v2  ;;  %v2103_v2 = vld [vmem:[%s4249_s2 + $0x308] sm:$0xff] }
0x171c   :  { %2123 = vmatpush.msrb.mxu3 %v2103_v2 }
0x171d   :  { %v1965_v3 = vmul.f32 1.442695, %v1964_v20  ;;  %v1889_v5 = vpop.xlane.xlu1 %1888 }
0x171e   :  { %v1890_v7 = vsub.f32 %v1886_v34, %v1889_v5  ;;  %v2070_v34 = vld [vmem:[%s4249_s2 + $0x2d0] sm:$0xff] }
0x171f   :  { %3093 = vpow2.f32 %v1965_v3  ;;  %v2102_v3 = vld [vmem:[%s4249_s2 + $0x300] sm:$0xff] }
0x1720   :  { %v1891_v8 = vmul.f32 1.442695, %v1890_v7  ;;  %2124 = vmatpush.msrb.mxu3 %v2102_v3 }
0x1722   :  { %v2914_v32 = vpop.permute.xlu2 %2913  ;;  %3095 = vpow2.f32 %v1891_v8 }
0x1723   :  { %v2915_v10 = vunpack.i.l.bf16 %v2914_v32  ;;  %v2916_v12 = vunpack.i.h.bf16 %v2914_v32 }
0x1725   :  { %v3094_v6 = vpop.eup %3093  ;;  %1847 = vmatpush.msrb.mxu0 %v2915_v10 }
0x1726   :  { %v1967_v13 = vsel %vm1738_vm11, %v3094_v6, 0.0 }
0x1727   :  { %1968 = vadd.xlane.f32.xlu1 %v1967_v13  ;;  %1848 = vmatpush.msrb.mxu0 %v2916_v12  ;;  %v2972_v12 = vld [vmem:[%s4251_s3 + $0x19] ss:$0 sm:$0xff] }
0x1728   :  { %v3096_v9 = vpop.eup %3095 }
0x1729   :  { %v1893_v16 = vsel %vm1738_vm11, %v3096_v9, 0.0 }
0x172d   :  { %v1821_v29 = vpop.xlane.xlu0 %1820 }
0x172e   :  { %3097 = vrcp.f32 %v1821_v29  ;;  %v2973_v29 = vld [vmem:[%s4251_s3 + $0x1a] ss:$0 sm:$0xff] }
0x172f   :  { %1894 = vadd.xlane.f32.xlu1 %v1893_v16 }
0x1734   :  { %v3098_v17 = vpop.eup %3097 }
0x1735   :  { %v1823_v18 = vmul.f32 %v3098_v17, %v3092_v0 }
0x1737   :  { %2856 = vmatmul.msk.f32.vlgmr.msrb.gmra.mxu0 %vm636_vm14, %v1823_v18  ;;  %v2101_v18 = vld [vmem:[%s4249_s2 + $0x2f8] sm:$0xff] }
0x1738   :  { %2125 = vmatpush.msrb.mxu3 %v2101_v18 }
0x1740   :  { %v2919_v21 = vpop.permute.xlu0 %2918 }
0x1741   :  { %v2920_v22 = vunpack.i.l.bf16 %v2919_v21  ;;  %v2921_v24 = vunpack.i.h.bf16 %v2919_v21  ;;  %v2100_v21 = vld [vmem:[%s4249_s2 + $0x2f0] sm:$0xff] }
0x1742   :  { %2126 = vmatpush.msrb.mxu3 %v2100_v21 }
0x1743   :  { %1921 = vmatpush.msrb.mxu2 %v2920_v22  ;;  %v2099_v22 = vld [vmem:[%s4249_s2 + $0x2e8] sm:$0xff] }
0x1744   :  { %2127 = vmatpush.msrb.mxu3 %v2099_v22 }
0x1745   :  { %1922 = vmatpush.msrb.mxu2 %v2921_v24  ;;  %v2974_v24 = vld [vmem:[%s4251_s3 + $0x1d] ss:$0 sm:$0xff] }
0x1747   :  { %2090 = vmatpush.msra.mxu2 %v2072_v59  ;;  %v2978_v59 = vld [vmem:[%s4251_s3 + $0x1f] ss:$0 sm:$0xff] }
0x1748   :  { %2923 = vrot.lane.b32.xlu1 %v3885_v15, %s3136_s19 }
0x179a   :  { %v1969_v27 = vpop.xlane.xlu1 %1968 }
0x17a2   :  { %v1895_v25 = vpop.xlane.xlu1 %1894 }
0x17a3   :  { %3099 = vrcp.f32 %v1895_v25 }
0x17a4   :  { %3101 = vrcp.f32 %v1969_v27 }
0x17a9   :  { %v3100_v26 = vpop.eup %3099 }
0x17aa   :  { %v1897_v28 = vmul.f32 %v3100_v26, %v3096_v9  ;;  %v3102_v1 = vpop.eup %3101 }
0x17ab   :  { %v1971_v55 = vmul.f32 %v3102_v1, %v3094_v6 }
0x17ac   :  { %2860 = vmatmul.msk.f32.vlgmr.msrb.gmra.mxu2 %vm636_vm14, %v1897_v28  ;;  %v2975_v28 = vld [vmem:[%s4251_s3 + $0x1e] ss:$0 sm:$0xff] }
0x17b4   :  { %v1850_v30 = vpop.f32.mrf.mxu0 }
0x17b5   :  { %2002 = vrot.lane.b32.xlu2 %v1850_v30, %s3142_s24 }
0x17ba   :  { %v2924_v31 = vpop.permute.xlu1 %2923 }
0x17bb   :  { %v2925_v33 = vunpack.i.l.bf16 %v2924_v31  ;;  %v2926_v14 = vunpack.i.h.bf16 %v2924_v31 }
0x17bd   :  { %1995 = vmatpush.msra.mxu0 %v2925_v33 }
0x17bf   :  { %1996 = vmatpush.msra.mxu0 %v2926_v14 }
0x17c0   :  { %2864 = vmatmul.msk.f32.vlgmr.msra.gmra.mxu0 %vm636_vm14, %v1971_v55 }
0x17c1   :  { %2182 = vmatpush.msrb.mxu0 %v2164_v37 }
0x17c3   :  { %2183 = vmatpush.msrb.mxu0 %v2163_v11 }
0x17c5   :  { %2184 = vmatpush.msrb.mxu0 %v2162_v4 }
0x180f   :  { %v2003_v39 = vpop.permute.xlu2 %2002 }
0x1810   :  { %v2013_v41 = vsel %vm210_vm10, %v3922_v51, %v2003_v39  ;;  %v2161_v39 = vld [vmem:[%s4249_s2 + $0x328] sm:$0xff] }
0x1811   :  { %2185 = vmatpush.msrb.mxu0 %v2161_v39 }
0x182f   :  { %v1924_v15 = vpop.f32.mrf.mxu2 }
0x1830   :  { %2006 = vrot.lane.b32.xlu0 %v1924_v15, %s3143_s25 }
0x183d   :  { %v1998_v35 = vpop.f32.mrf.mxu0 }
0x183e   :  { %2010 = vrot.lane.b32.xlu2 %v1998_v35, %s3144_s26 }
0x1898   :  { %v2011_v43 = vpop.permute.xlu2 %2010 }
0x18a2   :  { %v2007_v56 = vpop.permute.xlu0 %2006 }
0x18a3   :  { %v2014_v44 = vsel %vm636_vm14, %v2013_v41, %v2007_v56 }
0x18a4   :  { %v2015_v45 = vsel %vm639_vm15, %v2014_v44, %v2011_v43 }
0x18a5   :  { %2865 = vmatmul.msk.f32.vlgmr.msra.gmra.mxu1 %vm103_vm1, %v2015_v45 }
0x1922   :  { %v2037_v48 = vpop.f32.mrf.mxu1 }
0x1923   :  { %v2038_v49 = vadd.f32 %v2971_v47, %v2037_v48 }
0x1925   :  { %v2040_v50 = vadd.f32 %v2038_v49, %v3874_v62  ;;  %v2071_v62 = vld [vmem:[%s4249_s2 + $0x2d8] sm:$0xff] }
0x1926   :  { %2091 = vmatpush.msra.mxu2 %v2071_v62 }
0x1927   :  { %v2041_v52 = vsel %vm107_vm2, %v2040_v50, 0.0 }
0x1928   :  { %2042 = vadd.xlane.f32.xlu0 %v2041_v52  ;;  %2092 = vmatpush.msra.mxu2 %v2070_v34  ;;  %v2976_v52 = vld [vmem:[%s4251_s3 + $0x1b] ss:$0 sm:$0xff] }
0x192a   :  { %2093 = vmatpush.msra.mxu2 %v2069_v60 }
0x192c   :  { %2266 = vmatpush.msrb.mxu2 %v2251_v19 }
0x192e   :  { %2267 = vmatpush.msrb.mxu2 %v2250_v63 }
0x199b   :  { %v2043_v51 = vpop.xlane.xlu0 %2042 }
0x199c   :  { %v2044_v54 = vmul.f32 %v2043_v51, %v3270_v46 }
0x199e   :  { %v2045_v40 = vsub.f32 %v2040_v50, %v2044_v54 }
0x19a0   :  { %v2046_v57 = vmul.f32 %v2045_v40, %v2045_v40 }
0x19a2   :  { %v2047_v58 = vsel %vm107_vm2, %v2046_v57, 0.0 }
0x19a3   :  { %2048 = vadd.xlane.f32.xlu1 %v2047_v58 }
0x1a16   :  { %v2049_v0 = vpop.xlane.xlu1 %2048 }
0x1a17   :  { %v2050_v38 = vmul.f32 %v2049_v0, %v3270_v46  ;;  %v2249_v0 = vld [vmem:[%s4249_s2 + $0x370] sm:$0xff] }
0x1a18   :  { %2268 = vmatpush.msrb.mxu2 %v2249_v0 }
0x1a19   :  { %v2051_v20 = vadd.f32 1e-05, %v2050_v38  ;;  %v2248_v38 = vld [vmem:[%s4249_s2 + $0x368] sm:$0xff] }
0x1a1a   :  { %2269 = vmatpush.msrb.mxu2 %v2248_v38 }
0x1a1b   :  { %3103 = vrsqrt.f32 %v2051_v20  ;;  %vm2058_vm4 = vweird.f32 %v2051_v20 }
0x1a21   :  { %v3104_v5 = vpop.eup %3103 }
0x1a22   :  { %v2053_v7 = vmul.f32 %v3104_v5, %v2051_v20  ;;  %vm2059_vm12 = vweird.f32 %v3104_v5 }
0x1a23   :  { %vm2060_vm5 = vmor %vm2058_vm4, %vm2059_vm12 }
0x1a24   :  { %v2054_v8 = vmul.f32 %v3104_v5, %v2053_v7 }
0x1a26   :  { %v2055_v32 = vmul.f32 0.5, %v2054_v8  ;;  %v2222_v8 = vld [vmem:[%s4249_s2 + $0x360] sm:$0xff] }
0x1a27   :  { %2240 = vmatpush.msrb.mxu1 %v2222_v8 }
0x1a28   :  { %v2056_v10 = vsub.f32 1.5, %v2055_v32  ;;  %v2219_v32 = vld [vmem:[%s4249_s2 + $0x348] sm:$0xff] }
0x1a2a   :  { %v2057_v6 = vmul.f32 %v3104_v5, %v2056_v10  ;;  %v2981_v10 = vld [vmem:[%s4251_s3 + $0x21] ss:$0 sm:$0xff] }
0x1a2c   :  { %v2061_v13 = vsel %vm2060_vm5, %v3104_v5, %v2057_v6 }
0x1a2d   :  { %v2062_v9 = vmul.f32 %v2061_v13, %v2045_v40  ;;  %v2977_v40 = vld [vmem:[%s4251_s3 + $0x1c] ss:$0 sm:$0xff] }
0x1a2f   :  { %v2065_v16 = vmul.f32 %v2972_v12, %v2062_v9 }
0x1a31   :  { %v2068_v17 = vadd.f32 %v2973_v29, %v2065_v16 }
0x1a33   :  { %2866 = vmatmul.msk.f32.vlgmr.msra.gmra.mxu2 %vm103_vm1, %v2068_v17 }
0x1a3b   :  { %2870 = vmatmul.msk.f32.vlgmr.msrb.gmra.mxu2 %vm103_vm1, %v3844_v42  ;;  %v2221_v42 = vld [vmem:[%s4249_s2 + $0x358] sm:$0xff] }
0x1a3c   :  { %2241 = vmatpush.msrb.mxu1 %v2221_v42 }
0x1a43   :  { %2871 = vmatmul.msk.f32.gmra.mxu2 %vm103_vm1, %v3851_v53  ;;  %v2220_v53 = vld [vmem:[%s4249_s2 + $0x350] sm:$0xff] }
0x1a44   :  { %2242 = vmatpush.msrb.mxu1 %v2220_v53 }
0x1a46   :  { %2243 = vmatpush.msrb.mxu1 %v2219_v32 }
0x1ab6   :  { %v2095_v27 = vpop.f32.mrf.mxu2 }
0x1ab7   :  { %v2096_v25 = vadd.f32 %v2974_v24, %v2095_v27 }
0x1ab9   :  { %v2098_v26 = vmax.f32 %v2096_v25, 0.0 }
0x1abb   :  { %2867 = vmatmul.msk.f32.vlgmr.msrb.gmra.mxu3 %vm50_vm0, %v2098_v26  ;;  %v2979_v26 = vld [vmem:[%s4251_s3 + $0x23] ss:$0 sm:$0xff] }
0x1abe   :  { %v2271_v6 = vpop.f32.mrf.mxu2 }
0x1abf   :  { %v2272_v12 = vadd.f32 %v2981_v10, %v2271_v6 }
0x1ac6   :  { %v2274_v16 = vpop.f32.mrf.mxu2 }
0x1b3e   :  { %v2129_v30 = vpop.f32.mrf.mxu3 }
0x1b3f   :  { %v2130_v31 = vadd.f32 %v2975_v28, %v2129_v30 }
0x1b41   :  { %v2132_v1 = vadd.f32 %v2130_v31, %v2068_v17  ;;  %v2275_v17 = vadd.f32 %v2981_v10, %v2274_v16  ;;  %v2980_v31 = vld [vmem:[%s4251_s3 + $0x24] ss:$0 sm:$0xff] }
0x1b43   :  { %v2133_v33 = vsel %vm107_vm2, %v2132_v1, 0.0  ;;  %2872 = vmatpush.xpose.msk.msra.mxu0 %vm210_vm10, %v2275_v17 }
0x1b44   :  { %2134 = vadd.xlane.f32.xlu2 %v2133_v33 }
0x1b47   :  { %2873 = vmatpush.xpose.msk.msra.mxu0 %vm210_vm10, %v2272_v12 }
0x1bb7   :  { %v2135_v14 = vpop.xlane.xlu2 %2134 }
0x1bb8   :  { %v2136_v55 = vmul.f32 %v2135_v14, %v3270_v46 }
0x1bba   :  { %v2137_v15 = vsub.f32 %v2132_v1, %v2136_v55 }
0x1bbc   :  { %v2138_v35 = vmul.f32 %v2137_v15, %v2137_v15 }
0x1bbe   :  { %v2139_v36 = vsel %vm107_vm2, %v2138_v35, 0.0 }
0x1bbf   :  { %2140 = vadd.xlane.f32.xlu0 %v2139_v36 }
0x1c32   :  { %v2141_v41 = vpop.xlane.xlu0 %2140 }
0x1c33   :  { %v2142_v56 = vmul.f32 %v2141_v41, %v3270_v46  ;;  %v4104_v41 = vpack.i.bf16 %v2272_v12, %v2275_v17 }
0x1c35   :  { %v2143_v43 = vadd.f32 1e-05, %v2142_v56 }
0x1c37   :  { %3105 = vrsqrt.f32 %v2143_v43  ;;  %vm2150_vm7 = vweird.f32 %v2143_v43 }
0x1c3d   :  { %v3106_v44 = vpop.eup %3105 }
0x1c3e   :  { %v2145_v45 = vmul.f32 %v3106_v44, %v2143_v43  ;;  %vm2151_vm6 = vweird.f32 %v3106_v44 }
0x1c3f   :  { %vm2152_vm8 = vmor %vm2150_vm7, %vm2151_vm6 }
0x1c40   :  { %v2146_v47 = vmul.f32 %v3106_v44, %v2145_v45 }
0x1c42   :  { %v2147_v48 = vmul.f32 0.5, %v2146_v47 }
0x1c44   :  { %v2148_v49 = vsub.f32 1.5, %v2147_v48 }
0x1c46   :  { %v2149_v50 = vmul.f32 %v3106_v44, %v2148_v49 }
0x1c48   :  { %v2153_v51 = vsel %vm2152_vm8, %v3106_v44, %v2149_v50 }
0x1c49   :  { %v2154_v54 = vmul.f32 %v2153_v51, %v2137_v15  ;;  %v2982_v15 = vld [vmem:[%s4251_s3 + $0x20] ss:$0 sm:$0xff] }
0x1c4b   :  { %v2157_v57 = vmul.f32 %v2976_v52, %v2154_v54 }
0x1c4d   :  { %v2160_v58 = vadd.f32 %v2977_v40, %v2157_v57 }
0x1c4f   :  { %2868 = vmatmul.msk.f32.vlgmr.msrb.gmra.mxu0 %vm103_vm1, %v2160_v58 }
0x1ccc   :  { %v2187_v62 = vpop.f32.mrf.mxu0 }
0x1ccd   :  { %v2188_v34 = vadd.f32 %v2978_v59, %v2187_v62 }
0x1ccf   :  { %v2190_v60 = vadd.f32 %v2188_v34, %v2160_v58 }
0x1cd1   :  { %v2191_v61 = vsel %vm107_vm2, %v2190_v60, 0.0 }
0x1cd2   :  { %2192 = vadd.xlane.f32.xlu2 %v2191_v61 }
0x1cea   :  { %2355 = vrot.lane.b32.xlu2 %v2272_v12, %s3132_s11 }
0x1cf2   :  { %2429 = vrot.lane.b32.xlu2 %v2272_v12, %s3137_s20 }
0x1d45   :  { %v2193_v2 = vpop.xlane.xlu2 %2192 }
0x1d46   :  { %v2194_v20 = vmul.f32 %v2193_v2, %v3270_v46 }
0x1d48   :  { %v2195_v3 = vsub.f32 %v2190_v60, %v2194_v20 }
0x1d4a   :  { %v2196_v5 = vmul.f32 %v2195_v3, %v2195_v3 }
0x1d4c   :  { %v2197_v7 = vsel %vm107_vm2, %v2196_v5, 0.0 }
0x1d4d   :  { %2198 = vadd.xlane.f32.xlu1 %v2197_v7  ;;  %v2356_v55 = vpop.permute.xlu2 %2355 }
0x1d55   :  { %v2430_v54 = vpop.permute.xlu2 %2429 }
0x1d66   :  { %2357 = vrot.lane.b32.xlu1 %v2275_v17, %s3132_s11 }
0x1d6e   :  { %2431 = vrot.lane.b32.xlu1 %v2275_v17, %s3137_s20 }
0x1d76   :  { %2503 = vrot.lane.b32.xlu1 %v2272_v12, %s3138_s21 }
0x1dc0   :  { %v2199_v13 = vpop.xlane.xlu1 %2198 }
0x1dc1   :  { %v2200_v9 = vmul.f32 %v2199_v13, %v3270_v46 }
0x1dc3   :  { %v2201_v29 = vadd.f32 1e-05, %v2200_v9 }
0x1dc5   :  { %3107 = vrsqrt.f32 %v2201_v29  ;;  %vm2208_vm3 = vweird.f32 %v2201_v29 }
0x1dcb   :  { %v3108_v18 = vpop.eup %3107 }
0x1dcc   :  { %v2203_v21 = vmul.f32 %v3108_v18, %v2201_v29  ;;  %vm2209_vm9 = vweird.f32 %v3108_v18 }
0x1dcd   :  { %vm2210_vm12 = vmor %vm2208_vm3, %vm2209_vm9 }
0x1dce   :  { %v2204_v22 = vmul.f32 %v3108_v18, %v2203_v21 }
0x1dd0   :  { %v2205_v24 = vmul.f32 0.5, %v2204_v22 }
0x1dd2   :  { %v2206_v27 = vsub.f32 1.5, %v2205_v24 }
0x1dd4   :  { %v2207_v25 = vmul.f32 %v3108_v18, %v2206_v27 }
0x1dd6   :  { %v2211_v28 = vsel %vm2210_vm12, %v3108_v18, %v2207_v25 }
0x1dd7   :  { %v2212_v30 = vmul.f32 %v2211_v28, %v2195_v3 }
0x1dd8   :  { %v2358_v14 = vpop.permute.xlu1 %2357 }
0x1dd9   :  { %v2215_v1 = vmul.f32 %v2979_v26, %v2212_v30  ;;  %2876 = vmatpush.xpose.msk.msra.mxu3 %vm210_vm10, %v2358_v14 }
0x1ddb   :  { %v4092_v33 = vadd.f32 %v2980_v31, %v2215_v1 }
0x1ddd   :  { %2869 = vmatmul.msk.f32.vlgmr.msrb.gmra.mxu1 %vm103_vm1, %v4092_v33  ;;  %2877 = vmatpush.xpose.msk.msra.mxu3 %vm210_vm10, %v2356_v55 }
0x1de0   :  { %v2432_v52 = vpop.permute.xlu1 %2431 }
0x1de8   :  { %v2504_v57 = vpop.permute.xlu1 %2503 }
0x1e5a   :  { %v2245_v35 = vpop.f32.mrf.mxu1 }
0x1e5b   :  { %v2246_v36 = vadd.f32 %v2982_v15, %v2245_v35 }
0x1e5d   :  { %2874 = vmatmul.msk.f32.vlgmr.msra.gmra.mxu0 %vm210_vm10, %v2246_v36 }
0x1eda   :  { %v2308_v37 = vpop.f32.mrf.mxu0 }
0x1edb   :  { %v2311_v11 = vmul.f32 0.35355338, %v2308_v37 }
0x1edd   :  { %v2312_v4 = vadd.f32 %v2311_v11, %v3901_v23 }
0x1edf   :  { %v2313_v39 = vsel %vm1738_vm11, %v2312_v4, -inf }
0x1ee0   :  { %2314 = vmax.xlane.f32.xlu0 %v2313_v39 }
0x1ef4   :  { %2928 = vrot.lane.b32.xlu0 %v4104_v41, %s3133_s12 }
0x1efc   :  { %2353 = vrot.lane.b32.xlu0 %v2246_v36, %s3132_s11 }
0x1f04   :  { %2505 = vrot.lane.b32.xlu0 %v2275_v17, %s3138_s21 }
0x1f0c   :  { %2427 = vrot.lane.b32.xlu0 %v2246_v36, %s3137_s20 }
0x1f53   :  { %v2315_v56 = vpop.xlane.xlu0 %2314 }
0x1f54   :  { %v2316_v43 = vsub.f32 %v2312_v4, %v2315_v56 }
0x1f56   :  { %v2317_v44 = vmul.f32 1.442695, %v2316_v43 }
0x1f58   :  { %3109 = vpow2.f32 %v2317_v44 }
0x1f5e   :  { %v3110_v45 = vpop.eup %3109 }
0x1f5f   :  { %v2319_v47 = vsel %vm1738_vm11, %v3110_v45, 0.0 }
0x1f60   :  { %2320 = vadd.xlane.f32.xlu2 %v2319_v47  ;;  %v2279_v47 = vld [vmem:[%s4249_s2 + $0x398] sm:$0xff] }
0x1f66   :  { %v2929_v48 = vpop.permute.xlu0 %2928 }
0x1f67   :  { %v2930_v49 = vunpack.i.l.bf16 %v2929_v48  ;;  %v2931_v50 = vunpack.i.h.bf16 %v2929_v48 }
0x1f69   :  { %2347 = vmatpush.msra.mxu1 %v2930_v49 }
0x1f6b   :  { %2348 = vmatpush.msra.mxu1 %v2931_v50  ;;  %v2278_v50 = vld [vmem:[%s4249_s2 + $0x390] sm:$0xff] }
0x1f6d   :  { %2880 = vmatpush.xpose.msk.msrb.mxu1 %vm210_vm10, %v2432_v52  ;;  %v2277_v52 = vld [vmem:[%s4249_s2 + $0x388] sm:$0xff] }
0x1f6e   :  { %v2354_v51 = vpop.permute.xlu0 %2353 }
0x1f6f   :  { %2878 = vmatmul.msk.f32.vlgmr.msra.gmra.mxu3 %vm210_vm10, %v2354_v51 }
0x1f71   :  { %2881 = vmatpush.xpose.msk.msrb.mxu1 %vm210_vm10, %v2430_v54 }
0x1f76   :  { %v2506_v40 = vpop.permute.xlu0 %2505 }
0x1f77   :  { %2884 = vmatpush.xpose.msk.msrb.mxu3 %vm210_vm10, %v2506_v40 }
0x1f78   :  { %2501 = vrot.lane.b32.xlu2 %v2246_v36, %s3138_s21 }
0x1f7b   :  { %2885 = vmatpush.xpose.msk.msrb.mxu3 %vm210_vm10, %v2504_v57 }
0x1f7e   :  { %v2428_v60 = vpop.permute.xlu0 %2427 }
0x1fd3   :  { %v2321_v58 = vpop.xlane.xlu2 %2320 }
0x1fd4   :  { %3111 = vrcp.f32 %v2321_v58 }
0x1fda   :  { %v3112_v59 = vpop.eup %3111 }
0x1fdb   :  { %v2323_v62 = vmul.f32 %v3112_v59, %v3110_v45  ;;  %v2502_v34 = vpop.permute.xlu2 %2501  ;;  %v2280_v45 = vld [vmem:[%s4249_s2 + $0x3a0] sm:$0xff] }
0x1fdc   :  { %2886 = vmatmul.msk.f32.vlgmr.msrb.gmra.mxu3 %vm210_vm10, %v2502_v34 }
0x1fdd   :  { %2875 = vmatmul.msk.f32.vlgmr.msra.gmra.mxu1 %vm636_vm14, %v2323_v62  ;;  %v2983_v62 = vld [vmem:[%s4251_s3 + $0x22] ss:$0 sm:$0xff] }
0x1fde   :  { %2606 = vmatpush.msra.mxu1 %v2280_v45  ;;  %v2738_v45 = vld [vmem:[%s4249_s2 + $0x420] sm:$0xff] }
0x1fe0   :  { %2607 = vmatpush.msra.mxu1 %v2279_v47  ;;  %v2737_v47 = vld [vmem:[%s4249_s2 + $0x418] sm:$0xff] }
0x1fe2   :  { %2608 = vmatpush.msra.mxu1 %v2278_v50 }
0x1fe4   :  { %2609 = vmatpush.msra.mxu1 %v2277_v52 }
0x1fe5   :  { %2882 = vmatmul.msk.f32.vlgmr.msrb.gmra.mxu1 %vm210_vm10, %v2428_v60 }
0x1ff2   :  { %v2382_v61 = vpop.f32.mrf.mxu3 }
0x1ff3   :  { %v2385_v19 = vmul.f32 0.35355338, %v2382_v61 }
0x1ff5   :  { %v2386_v63 = vadd.f32 %v2385_v19, %v3901_v23 }
0x1ff7   :  { %v2387_v0 = vsel %vm1738_vm11, %v2386_v63, -inf }
0x1ff8   :  { %2388 = vmax.xlane.f32.xlu1 %v2387_v0 }
0x205a   :  { %v4123_v38 = vpop.f32.mrf.mxu1 }
0x205f   :  { %v2530_v2 = vpop.f32.mrf.mxu3 }
0x2060   :  { %v2533_v20 = vmul.f32 0.35355338, %v2530_v2 }
0x2062   :  { %v2456_v3 = vpop.f32.mrf.mxu1  ;;  %v2534_v5 = vadd.f32 %v2533_v20, %v3901_v23 }
0x2063   :  { %v2459_v7 = vmul.f32 0.35355338, %v2456_v3  ;;  %v2646_v3 = vld [vmem:[%s4249_s2 + $0x3c0] sm:$0xff] }
0x2064   :  { %v2535_v8 = vsel %vm1738_vm11, %v2534_v5, -inf }
0x2065   :  { %v2460_v42 = vadd.f32 %v2459_v7, %v3901_v23  ;;  %2536 = vmax.xlane.f32.xlu2 %v2535_v8  ;;  %v2643_v7 = vld [vmem:[%s4249_s2 + $0x3a8] sm:$0xff]  ;;  %v2680_v8 = vld [vmem:[%s4249_s2 + $0x400] sm:$0xff] }
0x2066   :  { %2694 = vmatpush.msra.mxu3 %v2680_v8 }
0x2067   :  { %v2461_v53 = vsel %vm1738_vm11, %v2460_v42, -inf }
0x2068   :  { %2462 = vmax.xlane.f32.xlu0 %v2461_v53  ;;  %v2678_v53 = vld [vmem:[%s4249_s2 + $0x3f0] sm:$0xff] }
0x206b   :  { %v2389_v32 = vpop.xlane.xlu1 %2388 }
0x206c   :  { %v2390_v10 = vsub.f32 %v2386_v63, %v2389_v32 }
0x206e   :  { %v2391_v6 = vmul.f32 1.442695, %v2390_v10 }
0x2070   :  { %3113 = vpow2.f32 %v2391_v6  ;;  %v2677_v6 = vld [vmem:[%s4249_s2 + $0x3e8] sm:$0xff] }
0x2076   :  { %v3114_v12 = vpop.eup %3113 }
0x2077   :  { %v2393_v13 = vsel %vm1738_vm11, %v3114_v12, 0.0 }
0x2078   :  { %2394 = vadd.xlane.f32.xlu1 %v2393_v13  ;;  %v2676_v13 = vld [vmem:[%s4249_s2 + $0x3e0] sm:$0xff] }
0x207c   :  { %2933 = vrot.lane.b32.xlu0 %v4104_v41, %s3135_s18 }
0x2091   :  { %2938 = vrot.lane.b32.xlu1 %v4104_v41, %s3134_s13 }
0x20d8   :  { %v2537_v9 = vpop.xlane.xlu2 %2536 }
0x20d9   :  { %v2538_v23 = vsub.f32 %v2534_v5, %v2537_v9  ;;  %v2644_v5 = vld [vmem:[%s4249_s2 + $0x3b0] sm:$0xff] }
0x20db   :  { %v2539_v29 = vmul.f32 1.442695, %v2538_v23  ;;  %v2463_v16 = vpop.xlane.xlu0 %2462 }
0x20dc   :  { %v2464_v17 = vsub.f32 %v2460_v42, %v2463_v16  ;;  %v2679_v42 = vld [vmem:[%s4249_s2 + $0x3f8] sm:$0xff] }
0x20dd   :  { %3115 = vpow2.f32 %v2539_v29  ;;  %2695 = vmatpush.msra.mxu3 %v2679_v42 }
0x20de   :  { %v2465_v18 = vmul.f32 1.442695, %v2464_v17 }
0x20df   :  { %2696 = vmatpush.msra.mxu3 %v2678_v53 }
0x20e0   :  { %3117 = vpow2.f32 %v2465_v18 }
0x20e1   :  { %2697 = vmatpush.msra.mxu3 %v2677_v6 }
0x20e3   :  { %v3116_v21 = vpop.eup %3115  ;;  %2698 = vmatpush.msra.mxu3 %v2676_v13 }
0x20e4   :  { %v2541_v22 = vsel %vm1738_vm11, %v3116_v21, 0.0 }
0x20e5   :  { %2542 = vadd.xlane.f32.xlu2 %v2541_v22 }
0x20e6   :  { %v3118_v24 = vpop.eup %3117 }
0x20e7   :  { %v2467_v25 = vsel %vm1738_vm11, %v3118_v24, 0.0 }
0x20eb   :  { %v2395_v27 = vpop.xlane.xlu1 %2394 }
0x20ec   :  { %3119 = vrcp.f32 %v2395_v27  ;;  %v2985_v27 = vld [vmem:[%s4251_s3 + $0x26] ss:$0 sm:$0xff] }
0x20ed   :  { %2468 = vadd.xlane.f32.xlu2 %v2467_v25 }
0x20ee   :  { %v2934_v26 = vpop.permute.xlu0 %2933 }
0x20ef   :  { %v2935_v28 = vunpack.i.l.bf16 %v2934_v26  ;;  %v2936_v30 = vunpack.i.h.bf16 %v2934_v26 }
0x20f1   :  { %2421 = vmatpush.msrb.mxu0 %v2935_v28  ;;  %v2675_v28 = vld [vmem:[%s4249_s2 + $0x3d8] sm:$0xff] }
0x20f2   :  { %v3120_v31 = vpop.eup %3119  ;;  %2699 = vmatpush.msra.mxu3 %v2675_v28 }
0x20f3   :  { %v2397_v1 = vmul.f32 %v3120_v31, %v3114_v12  ;;  %2422 = vmatpush.msrb.mxu0 %v2936_v30  ;;  %v2674_v30 = vld [vmem:[%s4249_s2 + $0x3d0] sm:$0xff]  ;;  %v2673_v31 = vld [vmem:[%s4249_s2 + $0x3c8] sm:$0xff] }
0x20f4   :  { %2700 = vmatpush.msra.mxu3 %v2674_v30 }
0x20f5   :  { %2879 = vmatmul.msk.f32.vlgmr.msrb.gmra.mxu0 %vm636_vm14, %v2397_v1  ;;  %v2986_v1 = vld [vmem:[%s4251_s3 + $0x29] ss:$0 sm:$0xff] }
0x20f6   :  { %2701 = vmatpush.msra.mxu3 %v2673_v31 }
0x2103   :  { %v2939_v14 = vpop.permute.xlu1 %2938 }
0x2104   :  { %v2940_v55 = vunpack.i.l.bf16 %v2939_v14  ;;  %v2941_v15 = vunpack.i.h.bf16 %v2939_v14 }
0x2105   :  { %2943 = vrot.lane.b32.xlu2 %v4104_v41, %s3136_s19 }
0x2106   :  { %2495 = vmatpush.msra.mxu2 %v2940_v55 }
0x2108   :  { %2496 = vmatpush.msra.mxu2 %v2941_v15 }
0x210a   :  { %2664 = vmatpush.msrb.mxu2 %v2646_v3 }
0x2158   :  { %v2543_v35 = vpop.xlane.xlu2 %2542 }
0x2160   :  { %v2469_v36 = vpop.xlane.xlu2 %2468 }
0x2161   :  { %3121 = vrcp.f32 %v2469_v36 }
0x2162   :  { %3123 = vrcp.f32 %v2543_v35  ;;  %v2987_v35 = vld [vmem:[%s4251_s3 + $0x2a] ss:$0 sm:$0xff] }
0x2167   :  { %v3122_v37 = vpop.eup %3121 }
0x2168   :  { %v2471_v11 = vmul.f32 %v3122_v37, %v3118_v24  ;;  %v2944_v4 = vpop.permute.xlu2 %2943  ;;  %v3124_v39 = vpop.eup %3123 }
0x2169   :  { %v2945_v56 = vunpack.i.l.bf16 %v2944_v4  ;;  %v2946_v43 = vunpack.i.h.bf16 %v2944_v4  ;;  %v2545_v44 = vmul.f32 %v3124_v39, %v3116_v21  ;;  %v2984_v21 = vld [vmem:[%s4251_s3 + $0x25] ss:$0 sm:$0xff] }
0x216a   :  { %2883 = vmatmul.msk.f32.vlgmr.msra.gmra.mxu2 %vm636_vm14, %v2471_v11 }
0x216b   :  { %2569 = vmatpush.msra.mxu0 %v2945_v56 }
0x216d   :  { %2570 = vmatpush.msra.mxu0 %v2946_v43 }
0x216e   :  { %2887 = vmatmul.msk.f32.vlgmr.msra.gmra.mxu0 %vm636_vm14, %v2545_v44 }
0x216f   :  { %2756 = vmatpush.msrb.mxu0 %v2738_v45 }
0x2171   :  { %2757 = vmatpush.msrb.mxu0 %v2737_v47 }
0x2172   :  { %v2424_v41 = vpop.f32.mrf.mxu0 }
0x2173   :  { %2576 = vrot.lane.b32.xlu0 %v2424_v41, %s3142_s24 }
0x21e5   :  { %v2577_v51 = vpop.permute.xlu0 %2576 }
0x21e6   :  { %v2587_v54 = vsel %vm210_vm10, %v4123_v38, %v2577_v51 }
0x21eb   :  { %v2572_v48 = vpop.f32.mrf.mxu0 }
0x21ec   :  { %2584 = vrot.lane.b32.xlu0 %v2572_v48, %s3144_s26  ;;  %v2736_v48 = vld [vmem:[%s4249_s2 + $0x410] sm:$0xff] }
0x21ed   :  { %v2498_v49 = vpop.f32.mrf.mxu2  ;;  %2758 = vmatpush.msrb.mxu0 %v2736_v48 }
0x21ee   :  { %2580 = vrot.lane.b32.xlu1 %v2498_v49, %s3143_s25  ;;  %v2735_v49 = vld [vmem:[%s4249_s2 + $0x408] sm:$0xff] }
0x21ef   :  { %2759 = vmatpush.msrb.mxu0 %v2735_v49 }
0x225e   :  { %v2585_v57 = vpop.permute.xlu0 %2584 }
0x2260   :  { %v2581_v40 = vpop.permute.xlu1 %2580 }
0x2261   :  { %v2588_v58 = vsel %vm636_vm14, %v2587_v54, %v2581_v40 }
0x2262   :  { %v2589_v59 = vsel %vm639_vm15, %v2588_v58, %v2585_v57 }
0x2263   :  { %2888 = vmatmul.msk.f32.vlgmr.msra.gmra.mxu1 %vm103_vm1, %v2589_v59 }
0x22e0   :  { %v2611_v34 = vpop.f32.mrf.mxu1 }
0x22e1   :  { %v2612_v60 = vadd.f32 %v2983_v62, %v2611_v34  ;;  %v2988_v34 = vld [vmem:[%s4251_s3 + $0x27] ss:$0 sm:$0xff] }
0x22e3   :  { %v2614_v61 = vadd.f32 %v2612_v60, %v4092_v33  ;;  %v2645_v33 = vld [vmem:[%s4249_s2 + $0x3b8] sm:$0xff] }
0x22e4   :  { %2665 = vmatpush.msrb.mxu2 %v2645_v33 }
0x22e5   :  { %v2615_v19 = vsel %vm107_vm2, %v2614_v61, 0.0 }
0x22e6   :  { %2616 = vadd.xlane.f32.xlu1 %v2615_v19  ;;  %2666 = vmatpush.msrb.mxu2 %v2644_v5 }
0x22e8   :  { %2667 = vmatpush.msrb.mxu2 %v2643_v7 }
0x2359   :  { %v2617_v63 = vpop.xlane.xlu1 %2616 }
0x235a   :  { %v2618_v0 = vmul.f32 %v2617_v63, %v3270_v46 }
0x235c   :  { %v2619_v38 = vsub.f32 %v2614_v61, %v2618_v0  ;;  %v2990_v0 = vld [vmem:[%s4251_s3 + $0x2b] ss:$0 sm:$0xff] }
0x235e   :  { %v2620_v2 = vmul.f32 %v2619_v38, %v2619_v38 }
0x2360   :  { %v2621_v20 = vsel %vm107_vm2, %v2620_v2, 0.0 }
0x2361   :  { %2622 = vadd.xlane.f32.xlu0 %v2621_v20 }
0x23d4   :  { %v2623_v32 = vpop.xlane.xlu0 %2622 }
0x23d5   :  { %v2624_v10 = vmul.f32 %v2623_v32, %v3270_v46 }
0x23d7   :  { %v2625_v12 = vadd.f32 1e-05, %v2624_v10 }
0x23d9   :  { %3125 = vrsqrt.f32 %v2625_v12  ;;  %vm2632_vm14 = vweird.f32 %v2625_v12 }
0x23df   :  { %v3126_v9 = vpop.eup %3125 }
0x23e0   :  { %v2627_v23 = vmul.f32 %v3126_v9, %v2625_v12  ;;  %vm2633_vm10 = vweird.f32 %v3126_v9 }
0x23e1   :  { %vm2634_vm15 = vmor %vm2632_vm14, %vm2633_vm10 }
0x23e2   :  { %v2628_v29 = vmul.f32 %v3126_v9, %v2627_v23 }
0x23e4   :  { %v2629_v16 = vmul.f32 0.5, %v2628_v29 }
0x23e6   :  { %v2630_v17 = vsub.f32 1.5, %v2629_v16 }
0x23e8   :  { %v2631_v18 = vmul.f32 %v3126_v9, %v2630_v17 }
0x23ea   :  { %v2635_v22 = vsel %vm2634_vm15, %v3126_v9, %v2631_v18 }
0x23eb   :  { %v2636_v24 = vmul.f32 %v2635_v22, %v2619_v38 }
0x23ed   :  { %v2639_v25 = vmul.f32 %v2984_v21, %v2636_v24 }
0x23ef   :  { %v2642_v26 = vadd.f32 %v2985_v27, %v2639_v25 }
0x23f1   :  { %2889 = vmatmul.msk.f32.vlgmr.msrb.gmra.mxu2 %vm103_vm1, %v2642_v26 }
0x2474   :  { %v2669_v14 = vpop.f32.mrf.mxu2 }
0x2475   :  { %v2670_v55 = vadd.f32 %v2986_v1, %v2669_v14 }
0x2477   :  { %v2672_v15 = vmax.f32 %v2670_v55, 0.0 }
0x2479   :  { %2890 = vmatmul.msk.f32.vlgmr.msra.gmra.mxu3 %vm50_vm0, %v2672_v15 }
0x24fc   :  { %v2703_v36 = vpop.f32.mrf.mxu3 }
0x24fd   :  { %v2704_v37 = vadd.f32 %v2987_v35, %v2703_v36 }
0x24ff   :  { %v2706_v11 = vadd.f32 %v2704_v37, %v2642_v26 }
0x2501   :  { %v2707_v4 = vsel %vm107_vm2, %v2706_v11, 0.0 }
0x2502   :  { %2708 = vadd.xlane.f32.xlu2 %v2707_v4 }
0x2575   :  { %v2709_v39 = vpop.xlane.xlu2 %2708 }
0x2576   :  { %v2710_v56 = vmul.f32 %v2709_v39, %v3270_v46 }
0x2578   :  { %v2711_v43 = vsub.f32 %v2706_v11, %v2710_v56 }
0x257a   :  { %v2712_v44 = vmul.f32 %v2711_v43, %v2711_v43 }
0x257c   :  { %v2713_v41 = vsel %vm107_vm2, %v2712_v44, 0.0 }
0x257d   :  { %2714 = vadd.xlane.f32.xlu1 %v2713_v41 }
0x25f0   :  { %v2715_v50 = vpop.xlane.xlu1 %2714 }
0x25f1   :  { %v2716_v52 = vmul.f32 %v2715_v50, %v3270_v46  ;;  %v2989_v46 = vld [vmem:[%s4251_s3 + $0x28] ss:$0 sm:$0xff] }
0x25f3   :  { %v2717_v51 = vadd.f32 1e-05, %v2716_v52 }
0x25f5   :  { %3127 = vrsqrt.f32 %v2717_v51  ;;  %vm2724_vm2 = vweird.f32 %v2717_v51 }
0x25fb   :  { %v3128_v54 = vpop.eup %3127 }
0x25fc   :  { %v2719_v40 = vmul.f32 %v3128_v54, %v2717_v51  ;;  %vm2725_vm0 = vweird.f32 %v3128_v54 }
0x25fd   :  { %vm2726_vm11 = vmor %vm2724_vm2, %vm2725_vm0 }
0x25fe   :  { %v2720_v57 = vmul.f32 %v3128_v54, %v2719_v40 }
0x2600   :  { %v2721_v58 = vmul.f32 0.5, %v2720_v57 }
0x2602   :  { %v2722_v59 = vsub.f32 1.5, %v2721_v58 }
0x2604   :  { %v2723_v62 = vmul.f32 %v3128_v54, %v2722_v59 }
0x2606   :  { %v2727_v60 = vsel %vm2726_vm11, %v3128_v54, %v2723_v62 }
0x2607   :  { %v2728_v61 = vmul.f32 %v2727_v60, %v2711_v43 }
0x2609   :  { %v2731_v19 = vmul.f32 %v2988_v34, %v2728_v61 }
0x260b   :  { %v2734_v63 = vadd.f32 %v2989_v46, %v2731_v19 }
0x260d   :  { %2891 = vmatmul.msk.f32.vlgmr.msrb.gmra.mxu0 %vm103_vm1, %v2734_v63 }
0x268a   :  { %v2761_v38 = vpop.f32.mrf.mxu0 }
0x268b   :  { %v2762_v2 = vadd.f32 %v2990_v0, %v2761_v38 }
0x268d   :  { %v2764_v20 = vsel %vm281_vm13, %v2762_v2, 0.0 }
0x268e   :  { %2765 = vst [vmem:[%s4253_s4] sm:$0xff] %v2764_v20 }

</bundles_post_ra>
